<compile_context>
chip_gen: v5e
topology: v5e:2x2
jax: 0.10.0
libtpu: 0.0.40
codegen_flags: <defaults>
</compile_context>

<pallas_src>
import math
import functools

import jax
import jax.numpy as jnp
from jax.experimental import pallas as pl
from jax.experimental.pallas import tpu as pltpu

# module hyper-parameters (embedding_size must be divisible by nhead=5)
EMBED = 20
NHEAD = 5
FFN_DIM = 10
NLAYERS = 4
SEQ = 8
BATCH = 2
LN_EPS = 1e-5


def _vmem_spec():
    return pl.BlockSpec(memory_space=pltpu.MemorySpace.VMEM)


# ---------------- fused (PE + NLAYERS post-norm encoder layers) kernel ----------------
def fused_transformer_kernel(x_ref, pe_ref, bmask_ref, hmask_ref,
                             wbig_ref, vecs_ref, o_ref,
                             *, nlayers, nhead, d, ffn):
    T, D = x_ref.shape                     # T = S*B tokens, D = embedding
    H = nhead

    # positional encoding add (Dropout(p=0.5) omitted: eval-mode identity)
    h = x_ref[...] + pe_ref[...]           # (T, D)

    bmask = bmask_ref[...]                 # (1, T, T) additive batch-separation mask
    hmask = hmask_ref[...]                 # (H, T, D) 0/1 head-selection mask (pre-broadcast)

    for layer in range(nlayers):           # static unroll; all weights stay VMEM-resident
        wbig = wbig_ref[layer]             # (D, 6D): [wqkv | wo | w1(pad) | w2(pad)]
        vec = vecs_ref[layer]              # (8, 3D): packed bias / LayerNorm rows

        wqkv = wbig[:, 0:3 * d]            # (D, 3D)  (1/sqrt(dh) pre-folded into Q cols)
        wo = wbig[:, 3 * d:4 * d]          # (D, D)
        w1 = wbig[:, 4 * d:5 * d]          # (D, D)   cols ffn..D-1 are zero
        w2 = wbig[:, 5 * d:6 * d]          # (D, D)   rows ffn..D-1 are zero

        bqkv = vec[0:1, 0:3 * d]           # (1, 3D)
        bo = vec[1:2, 0:d]
        ln1w = vec[2:3, 0:d]
        ln1b = vec[3:4, 0:d]
        b1 = vec[4:5, 0:d]                 # entries ffn..D-1 are zero
        b2 = vec[5:6, 0:d]
        ln2w = vec[6:7, 0:d]
        ln2b = vec[7:8, 0:d]

        # ---- multi-head self-attention: ONE fused QKV matmul, static lane splits ----
        qkv = jnp.dot(h, wqkv, preferred_element_type=jnp.float32) + bqkv    # (T, 3D)
        q = qkv[:, 0:d]
        k = qkv[:, d:2 * d]
        v = qkv[:, 2 * d:3 * d]

        # head-masked copies of q: (H, T, D) -> flatten heads into the row dim
        qh = (q[None, :, :] * hmask).reshape(H * T, d)

        # scores[h*T+i, j] = sum_{lanes of head h} q[i,:]*k[j,:]  (one MXU matmul, rhs-T)
        s = jax.lax.dot_general(qh, k, (((1,), (1,)), ((), ())),
                                preferred_element_type=jnp.float32)          # (H*T, T)
        s = s.reshape(H, T, T) + bmask      # mask out cross-batch token pairs
        s = s - jnp.max(s, axis=-1, keepdims=True)
        p = jnp.exp(s)                                                        # (H, T, T)
        denom = jnp.sum(p, axis=-1, keepdims=True)                            # (H, T, 1)

        # un-normalized per-head context; normalize AFTER the matmul so the EUP
        # reciprocal overlaps the MXU work instead of sitting on the serial chain
        o_heads = jnp.dot(p.reshape(H * T, T), v,
                          preferred_element_type=jnp.float32)                 # (H*T, D)
        inv = pl.reciprocal(denom, approx=True)                               # (H, T, 1)
        attn = jnp.sum(o_heads.reshape(H, T, d) * inv * hmask, axis=0)        # (T, D)

        attn = jnp.dot(attn, wo, preferred_element_type=jnp.float32) + bo
        # TODO(synk): dropout1(p=0.5) omitted (eval-mode identity).

        # ---- add & LayerNorm 1 (post-norm) ----
        h1 = h + attn
        mu = jnp.mean(h1, axis=-1, keepdims=True)
        var = jnp.mean((h1 - mu) ** 2, axis=-1, keepdims=True)
        h1 = (h1 - mu) * jax.lax.rsqrt(var + LN_EPS) * ln1w + ln1b

        # ---- feed-forward: linear1 -> ReLU -> linear2 (zero-padded to width D) ----
        f = jnp.dot(h1, w1, preferred_element_type=jnp.float32) + b1
        f = jnp.maximum(f, 0.0)
        f = jnp.dot(f, w2, preferred_element_type=jnp.float32) + b2
        # TODO(synk): FFN dropout / dropout2 (p=0.5) omitted (eval-mode identity).

        # ---- add & LayerNorm 2 ----
        h2 = h1 + f
        mu2 = jnp.mean(h2, axis=-1, keepdims=True)
        var2 = jnp.mean((h2 - mu2) ** 2, axis=-1, keepdims=True)
        h = (h2 - mu2) * jax.lax.rsqrt(var2 + LN_EPS) * ln2w + ln2b

    o_ref[...] = h.astype(o_ref.dtype)


def pos_transformer_forward(src, pe_flat, bmask, hmask, wbig, vecs):
    S, B, D = src.shape
    x2 = src.reshape(S * B, D)                       # flatten tokens once, outside kernel
    kern = functools.partial(fused_transformer_kernel,
                             nlayers=NLAYERS, nhead=NHEAD, d=D, ffn=FFN_DIM)
    out2 = pl.pallas_call(
        kern,
        out_shape=jax.ShapeDtypeStruct((S * B, D), src.dtype),
        in_specs=[_vmem_spec()] * 6,
        out_specs=_vmem_spec(),
    )(x2, pe_flat, bmask, hmask, wbig, vecs)
    return out2.reshape(S, B, D)


# ---------------- parameter / buffer construction (plain JAX glue) ----------------
def make_pe(seq, d):
    position = jnp.arange(seq, dtype=jnp.float32)[:, None]
    div_term = jnp.exp(jnp.arange(0, d, 2, dtype=jnp.float32) * (-math.log(10000.0) / d))
    pe = jnp.zeros((seq, d), jnp.float32)
    pe = pe.at[:, 0::2].set(jnp.sin(position * div_term))
    pe = pe.at[:, 1::2].set(jnp.cos(position * div_term))
    return pe                                         # (S, D)


def make_masks(seq, batch, d, nhead):
    T = seq * batch
    # batch-separation additive mask: tokens flattened s-major -> token i has batch i % B
    tok_b = jnp.arange(T) % batch
    same = tok_b[:, None] == tok_b[None, :]
    bmask = jnp.where(same, 0.0, -1e9).astype(jnp.float32)[None]        # (1, T, T)
    # head-selection 0/1 mask over the embedding lanes, PRE-broadcast to (H, T, D)
    dh = d // nhead
    head_of_lane = jnp.arange(d) // dh
    hmask = (head_of_lane[None, :] == jnp.arange(nhead)[:, None]).astype(jnp.float32)
    hmask = jnp.broadcast_to(hmask[:, None, :], (nhead, T, d))           # (H, T, D)
    return bmask, hmask


def init_layer_params(key, d, ffn, nhead):
    """Return (wbig, vecs) slabs for one layer.

    wbig : (D, 6D)  = [wq*scale | wk | wv | wo | w1 (cols zero-padded) | w2 (rows zero-padded)]
    vecs : (8, 3D)  = rows [bqkv(scaled Q part), bo, ln1w, ln1b, b1(pad), b2, ln2w, ln2b]
    """
    ks = jax.random.split(key, 6)
    s = 0.1
    dh = d // nhead
    scale = 1.0 / math.sqrt(dh)
    wqkv = jax.random.normal(ks[0], (3 * d, d), jnp.float32) * s   # in_proj_weight (3D, D)
    bqkv = jax.random.normal(ks[1], (3 * d,), jnp.float32) * s     # in_proj_bias
    wo = jax.random.normal(ks[2], (d, d), jnp.float32) * s         # out_proj.weight
    bo = jax.random.normal(ks[3], (d,), jnp.float32) * s
    w1 = jax.random.normal(ks[4], (ffn, d), jnp.float32) * s       # linear1.weight
    b1 = jnp.zeros((ffn,), jnp.float32)
    w2 = jax.random.normal(ks[5], (d, ffn), jnp.float32) * s       # linear2.weight
    b2 = jnp.zeros((d,), jnp.float32)
    ln1w = jnp.ones((d,), jnp.float32); ln1b = jnp.zeros((d,), jnp.float32)
    ln2w = jnp.ones((d,), jnp.float32); ln2b = jnp.zeros((d,), jnp.float32)

    # pre-transpose to (in, out), fold 1/sqrt(dh) into Q, zero-pad FFN mats to (D, D)
    wq_t = wqkv[0 * d:1 * d].T * scale
    wk_t = wqkv[1 * d:2 * d].T
    wv_t = wqkv[2 * d:3 * d].T
    wo_t = wo.T
    w1p = jnp.zeros((d, d), jnp.float32).at[:, :ffn].set(w1.T)
    w2p = jnp.zeros((d, d), jnp.float32).at[:ffn, :].set(w2.T)
    wbig = jnp.concatenate([wq_t, wk_t, wv_t, wo_t, w1p, w2p], axis=1)   # (D, 6D)

    width = 3 * d

    def row(v):
        return jnp.zeros((width,), jnp.float32).at[:v.shape[0]].set(v)

    bqkv_row = jnp.concatenate([bqkv[0:d] * scale, bqkv[d:2 * d], bqkv[2 * d:3 * d]])
    vecs = jnp.stack([row(bqkv_row), row(bo), row(ln1w), row(ln1b),
                      row(b1), row(b2), row(ln2w), row(ln2b)], axis=0)   # (8, 3D)
    return wbig, vecs


if __name__ == "__main__":
    key = jax.random.PRNGKey(0)
    xk, pk = jax.random.split(key)
    src = jax.random.normal(xk, (SEQ, BATCH, EMBED), jnp.float32)

    layer_keys = jax.random.split(pk, NLAYERS)
    per_layer = [init_layer_params(k, EMBED, FFN_DIM, NHEAD) for k in layer_keys]
    wbig = jnp.stack([p[0] for p in per_layer], axis=0)    # (NLAYERS, D, 6D)
    vecs = jnp.stack([p[1] for p in per_layer], axis=0)    # (NLAYERS, 8, 3D)

    pe = make_pe(SEQ, EMBED)                               # (S, D)
    pe_flat = jnp.repeat(pe, BATCH, axis=0)                # (S*B, D), matches s-major flattening
    bmask, hmask = make_masks(SEQ, BATCH, EMBED, NHEAD)

    out = pos_transformer_forward(src, pe_flat, bmask, hmask, wbig, vecs)
    jax.block_until_ready(out)
    assert out.shape == (SEQ, BATCH, EMBED)
    assert bool(jnp.all(jnp.isfinite(out)))
    print("KERNEL_OK")
</pallas_src>

<mosaic_0001>
module attributes {stable_mosaic.version = 11 : i64} {
  func.func @fused_transformer_kernel(%arg0: memref<16x20xf32, #tpu.memory_space<vmem>>, %arg1: memref<16x20xf32, #tpu.memory_space<vmem>>, %arg2: memref<1x16x16xf32, #tpu.memory_space<vmem>>, %arg3: memref<5x16x20xf32, #tpu.memory_space<vmem>>, %arg4: memref<4x20x120xf32, #tpu.memory_space<vmem>>, %arg5: memref<4x8x60xf32, #tpu.memory_space<vmem>>, %arg6: memref<16x20xf32, #tpu.memory_space<vmem>>) attributes {dimension_semantics = [], scalar_prefetch = 0 : i64, scratch_operands = 0 : i64, tpu.core_type = #tpu.core_type<tc>} {
    %c0 = arith.constant 0 : index
    %c0_0 = arith.constant 0 : index
    %0 = vector.load %arg0[%c0, %c0_0] : memref<16x20xf32, #tpu.memory_space<vmem>>, vector<16x20xf32>
    %c0_1 = arith.constant 0 : index
    %c0_2 = arith.constant 0 : index
    %1 = vector.load %arg1[%c0_1, %c0_2] : memref<16x20xf32, #tpu.memory_space<vmem>>, vector<16x20xf32>
    %2 = arith.addf %0, %1 : vector<16x20xf32>
    %c0_3 = arith.constant 0 : index
    %c0_4 = arith.constant 0 : index
    %c0_5 = arith.constant 0 : index
    %3 = vector.load %arg2[%c0_3, %c0_4, %c0_5] : memref<1x16x16xf32, #tpu.memory_space<vmem>>, vector<1x16x16xf32>
    %c0_6 = arith.constant 0 : index
    %c0_7 = arith.constant 0 : index
    %c0_8 = arith.constant 0 : index
    %4 = vector.load %arg3[%c0_6, %c0_7, %c0_8] : memref<5x16x20xf32, #tpu.memory_space<vmem>>, vector<5x16x20xf32>
    %c0_9 = arith.constant 0 : index
    %c0_10 = arith.constant 0 : index
    %c0_11 = arith.constant 0 : index
    %5 = vector.load %arg4[%c0_9, %c0_10, %c0_11] : memref<4x20x120xf32, #tpu.memory_space<vmem>>, vector<1x20x120xf32>
    %6 = vector.shape_cast %5 : vector<1x20x120xf32> to vector<20x120xf32>
    %c0_12 = arith.constant 0 : index
    %c0_13 = arith.constant 0 : index
    %c0_14 = arith.constant 0 : index
    %7 = vector.load %arg5[%c0_12, %c0_13, %c0_14] : memref<4x8x60xf32, #tpu.memory_space<vmem>>, vector<1x8x60xf32>
    %8 = vector.shape_cast %7 : vector<1x8x60xf32> to vector<8x60xf32>
    %9 = vector.extract_strided_slice %6 {offsets = [0, 0], sizes = [20, 60], strides = [1, 1]} : vector<20x120xf32> to vector<20x60xf32>
    %10 = vector.extract_strided_slice %6 {offsets = [0, 60], sizes = [20, 20], strides = [1, 1]} : vector<20x120xf32> to vector<20x20xf32>
    %11 = vector.extract_strided_slice %6 {offsets = [0, 80], sizes = [20, 20], strides = [1, 1]} : vector<20x120xf32> to vector<20x20xf32>
    %12 = vector.extract_strided_slice %6 {offsets = [0, 100], sizes = [20, 20], strides = [1, 1]} : vector<20x120xf32> to vector<20x20xf32>
    %13 = vector.extract_strided_slice %8 {offsets = [0, 0], sizes = [1, 60], strides = [1, 1]} : vector<8x60xf32> to vector<1x60xf32>
    %14 = vector.extract_strided_slice %8 {offsets = [1, 0], sizes = [1, 20], strides = [1, 1]} : vector<8x60xf32> to vector<1x20xf32>
    %15 = vector.extract_strided_slice %8 {offsets = [2, 0], sizes = [1, 20], strides = [1, 1]} : vector<8x60xf32> to vector<1x20xf32>
    %16 = vector.extract_strided_slice %8 {offsets = [3, 0], sizes = [1, 20], strides = [1, 1]} : vector<8x60xf32> to vector<1x20xf32>
    %17 = vector.extract_strided_slice %8 {offsets = [4, 0], sizes = [1, 20], strides = [1, 1]} : vector<8x60xf32> to vector<1x20xf32>
    %18 = vector.extract_strided_slice %8 {offsets = [5, 0], sizes = [1, 20], strides = [1, 1]} : vector<8x60xf32> to vector<1x20xf32>
    %19 = vector.extract_strided_slice %8 {offsets = [6, 0], sizes = [1, 20], strides = [1, 1]} : vector<8x60xf32> to vector<1x20xf32>
    %20 = vector.extract_strided_slice %8 {offsets = [7, 0], sizes = [1, 20], strides = [1, 1]} : vector<8x60xf32> to vector<1x20xf32>
    %cst = arith.constant dense<0.000000e+00> : vector<16x60xf32>
    %21 = tpu.matmul %2, %9, %cst {dimension_numbers = #tpu.dot_dimension_numbers<[1], [0], [0], [1], [0, 0, 1, 1], [], []>} : vector<16x20xf32>, vector<20x60xf32>, vector<16x60xf32> -> vector<16x60xf32>
    %22 = vector.broadcast %13 : vector<1x60xf32> to vector<16x60xf32>
    %23 = arith.addf %21, %22 : vector<16x60xf32>
    %24 = vector.extract_strided_slice %23 {offsets = [0, 0], sizes = [16, 20], strides = [1, 1]} : vector<16x60xf32> to vector<16x20xf32>
    %25 = vector.extract_strided_slice %23 {offsets = [0, 20], sizes = [16, 20], strides = [1, 1]} : vector<16x60xf32> to vector<16x20xf32>
    %26 = vector.extract_strided_slice %23 {offsets = [0, 40], sizes = [16, 20], strides = [1, 1]} : vector<16x60xf32> to vector<16x20xf32>
    %27 = vector.shape_cast %24 : vector<16x20xf32> to vector<1x16x20xf32>
    %28 = vector.broadcast %27 : vector<1x16x20xf32> to vector<5x16x20xf32>
    %29 = arith.mulf %28, %4 : vector<5x16x20xf32>
    %30 = vector.shape_cast %29 : vector<5x16x20xf32> to vector<80x20xf32>
    %cst_15 = arith.constant dense<0.000000e+00> : vector<80x16xf32>
    %31 = tpu.matmul %30, %25, %cst_15 {dimension_numbers = #tpu.dot_dimension_numbers<[1], [1], [0], [0], [0, 0, 1, 0], [], []>} : vector<80x20xf32>, vector<16x20xf32>, vector<80x16xf32> -> vector<80x16xf32>
    %32 = vector.shape_cast %31 : vector<80x16xf32> to vector<5x16x16xf32>
    %33 = vector.broadcast %3 : vector<1x16x16xf32> to vector<5x16x16xf32>
    %34 = arith.addf %32, %33 : vector<5x16x16xf32>
    %cst_16 = arith.constant dense<0xFF800000> : vector<5x16xf32>
    %35 = vector.multi_reduction <maximumf>, %34, %cst_16 [2] : vector<5x16x16xf32> to vector<5x16xf32>
    %36 = vector.shape_cast %35 : vector<5x16xf32> to vector<5x16x1xf32>
    %37 = vector.broadcast %36 : vector<5x16x1xf32> to vector<5x16x16xf32>
    %38 = arith.subf %34, %37 : vector<5x16x16xf32>
    %39 = math.exp %38 : vector<5x16x16xf32>
    %cst_17 = arith.constant dense<0.000000e+00> : vector<5x16xf32>
    %40 = vector.multi_reduction <add>, %39, %cst_17 [2] : vector<5x16x16xf32> to vector<5x16xf32>
    %41 = vector.shape_cast %40 : vector<5x16xf32> to vector<5x16x1xf32>
    %42 = vector.shape_cast %39 : vector<5x16x16xf32> to vector<80x16xf32>
    %cst_18 = arith.constant dense<0.000000e+00> : vector<80x20xf32>
    %43 = tpu.matmul %42, %26, %cst_18 {dimension_numbers = #tpu.dot_dimension_numbers<[1], [0], [0], [1], [0, 0, 1, 1], [], []>} : vector<80x16xf32>, vector<16x20xf32>, vector<80x20xf32> -> vector<80x20xf32>
    %44 = tpu.reciprocal %41 {approx = true} : vector<5x16x1xf32> -> vector<5x16x1xf32>
    %45 = vector.shape_cast %43 : vector<80x20xf32> to vector<5x16x20xf32>
    %46 = vector.broadcast %44 : vector<5x16x1xf32> to vector<5x16x20xf32>
    %47 = arith.mulf %45, %46 : vector<5x16x20xf32>
    %48 = arith.mulf %47, %4 : vector<5x16x20xf32>
    %cst_19 = arith.constant dense<0.000000e+00> : vector<16x20xf32>
    %49 = vector.multi_reduction <add>, %48, %cst_19 [0] : vector<5x16x20xf32> to vector<16x20xf32>
    %cst_20 = arith.constant dense<0.000000e+00> : vector<16x20xf32>
    %50 = tpu.matmul %49, %10, %cst_20 {dimension_numbers = #tpu.dot_dimension_numbers<[1], [0], [0], [1], [0, 0, 1, 1], [], []>} : vector<16x20xf32>, vector<20x20xf32>, vector<16x20xf32> -> vector<16x20xf32>
    %51 = vector.broadcast %14 : vector<1x20xf32> to vector<16x20xf32>
    %52 = arith.addf %50, %51 : vector<16x20xf32>
    %53 = arith.addf %2, %52 : vector<16x20xf32>
    %cst_21 = arith.constant dense<0.000000e+00> : vector<16xf32>
    %54 = vector.multi_reduction <add>, %53, %cst_21 [1] : vector<16x20xf32> to vector<16xf32>
    %55 = vector.shape_cast %54 : vector<16xf32> to vector<16x1xf32>
    %cst_22 = arith.constant 2.000000e+01 : f32
    %56 = vector.broadcast %cst_22 : f32 to vector<16x1xf32>
    %57 = arith.divf %55, %56 : vector<16x1xf32>
    %58 = vector.broadcast %57 : vector<16x1xf32> to vector<16x20xf32>
    %59 = arith.subf %53, %58 : vector<16x20xf32>
    %60 = arith.mulf %59, %59 : vector<16x20xf32>
    %cst_23 = arith.constant dense<0.000000e+00> : vector<16xf32>
    %61 = vector.multi_reduction <add>, %60, %cst_23 [1] : vector<16x20xf32> to vector<16xf32>
    %62 = vector.shape_cast %61 : vector<16xf32> to vector<16x1xf32>
    %cst_24 = arith.constant 2.000000e+01 : f32
    %63 = vector.broadcast %cst_24 : f32 to vector<16x1xf32>
    %64 = arith.divf %62, %63 : vector<16x1xf32>
    %65 = vector.broadcast %57 : vector<16x1xf32> to vector<16x20xf32>
    %66 = arith.subf %53, %65 : vector<16x20xf32>
    %cst_25 = arith.constant 9.99999974E-6 : f32
    %67 = vector.broadcast %cst_25 : f32 to vector<16x1xf32>
    %68 = arith.addf %64, %67 : vector<16x1xf32>
    %69 = math.rsqrt %68 : vector<16x1xf32>
    %70 = vector.broadcast %69 : vector<16x1xf32> to vector<16x20xf32>
    %71 = arith.mulf %66, %70 : vector<16x20xf32>
    %72 = vector.broadcast %15 : vector<1x20xf32> to vector<16x20xf32>
    %73 = arith.mulf %71, %72 : vector<16x20xf32>
    %74 = vector.broadcast %16 : vector<1x20xf32> to vector<16x20xf32>
    %75 = arith.addf %73, %74 : vector<16x20xf32>
    %cst_26 = arith.constant dense<0.000000e+00> : vector<16x20xf32>
    %76 = tpu.matmul %75, %11, %cst_26 {dimension_numbers = #tpu.dot_dimension_numbers<[1], [0], [0], [1], [0, 0, 1, 1], [], []>} : vector<16x20xf32>, vector<20x20xf32>, vector<16x20xf32> -> vector<16x20xf32>
    %77 = vector.broadcast %17 : vector<1x20xf32> to vector<16x20xf32>
    %78 = arith.addf %76, %77 : vector<16x20xf32>
    %cst_27 = arith.constant 0.000000e+00 : f32
    %79 = vector.broadcast %cst_27 : f32 to vector<16x20xf32>
    %80 = arith.maximumf %78, %79 : vector<16x20xf32>
    %cst_28 = arith.constant dense<0.000000e+00> : vector<16x20xf32>
    %81 = tpu.matmul %80, %12, %cst_28 {dimension_numbers = #tpu.dot_dimension_numbers<[1], [0], [0], [1], [0, 0, 1, 1], [], []>} : vector<16x20xf32>, vector<20x20xf32>, vector<16x20xf32> -> vector<16x20xf32>
    %82 = vector.broadcast %18 : vector<1x20xf32> to vector<16x20xf32>
    %83 = arith.addf %81, %82 : vector<16x20xf32>
    %84 = arith.addf %75, %83 : vector<16x20xf32>
    %cst_29 = arith.constant dense<0.000000e+00> : vector<16xf32>
    %85 = vector.multi_reduction <add>, %84, %cst_29 [1] : vector<16x20xf32> to vector<16xf32>
    %86 = vector.shape_cast %85 : vector<16xf32> to vector<16x1xf32>
    %cst_30 = arith.constant 2.000000e+01 : f32
    %87 = vector.broadcast %cst_30 : f32 to vector<16x1xf32>
    %88 = arith.divf %86, %87 : vector<16x1xf32>
    %89 = vector.broadcast %88 : vector<16x1xf32> to vector<16x20xf32>
    %90 = arith.subf %84, %89 : vector<16x20xf32>
    %91 = arith.mulf %90, %90 : vector<16x20xf32>
    %cst_31 = arith.constant dense<0.000000e+00> : vector<16xf32>
    %92 = vector.multi_reduction <add>, %91, %cst_31 [1] : vector<16x20xf32> to vector<16xf32>
    %93 = vector.shape_cast %92 : vector<16xf32> to vector<16x1xf32>
    %cst_32 = arith.constant 2.000000e+01 : f32
    %94 = vector.broadcast %cst_32 : f32 to vector<16x1xf32>
    %95 = arith.divf %93, %94 : vector<16x1xf32>
    %96 = vector.broadcast %88 : vector<16x1xf32> to vector<16x20xf32>
    %97 = arith.subf %84, %96 : vector<16x20xf32>
    %cst_33 = arith.constant 9.99999974E-6 : f32
    %98 = vector.broadcast %cst_33 : f32 to vector<16x1xf32>
    %99 = arith.addf %95, %98 : vector<16x1xf32>
    %100 = math.rsqrt %99 : vector<16x1xf32>
    %101 = vector.broadcast %100 : vector<16x1xf32> to vector<16x20xf32>
    %102 = arith.mulf %97, %101 : vector<16x20xf32>
    %103 = vector.broadcast %19 : vector<1x20xf32> to vector<16x20xf32>
    %104 = arith.mulf %102, %103 : vector<16x20xf32>
    %105 = vector.broadcast %20 : vector<1x20xf32> to vector<16x20xf32>
    %106 = arith.addf %104, %105 : vector<16x20xf32>
    %c1 = arith.constant 1 : index
    %c0_34 = arith.constant 0 : index
    %c0_35 = arith.constant 0 : index
    %107 = vector.load %arg4[%c1, %c0_34, %c0_35] : memref<4x20x120xf32, #tpu.memory_space<vmem>>, vector<1x20x120xf32>
    %108 = vector.shape_cast %107 : vector<1x20x120xf32> to vector<20x120xf32>
    %c1_36 = arith.constant 1 : index
    %c0_37 = arith.constant 0 : index
    %c0_38 = arith.constant 0 : index
    %109 = vector.load %arg5[%c1_36, %c0_37, %c0_38] : memref<4x8x60xf32, #tpu.memory_space<vmem>>, vector<1x8x60xf32>
    %110 = vector.shape_cast %109 : vector<1x8x60xf32> to vector<8x60xf32>
    %111 = vector.extract_strided_slice %108 {offsets = [0, 0], sizes = [20, 60], strides = [1, 1]} : vector<20x120xf32> to vector<20x60xf32>
    %112 = vector.extract_strided_slice %108 {offsets = [0, 60], sizes = [20, 20], strides = [1, 1]} : vector<20x120xf32> to vector<20x20xf32>
    %113 = vector.extract_strided_slice %108 {offsets = [0, 80], sizes = [20, 20], strides = [1, 1]} : vector<20x120xf32> to vector<20x20xf32>
    %114 = vector.extract_strided_slice %108 {offsets = [0, 100], sizes = [20, 20], strides = [1, 1]} : vector<20x120xf32> to vector<20x20xf32>
    %115 = vector.extract_strided_slice %110 {offsets = [0, 0], sizes = [1, 60], strides = [1, 1]} : vector<8x60xf32> to vector<1x60xf32>
    %116 = vector.extract_strided_slice %110 {offsets = [1, 0], sizes = [1, 20], strides = [1, 1]} : vector<8x60xf32> to vector<1x20xf32>
    %117 = vector.extract_strided_slice %110 {offsets = [2, 0], sizes = [1, 20], strides = [1, 1]} : vector<8x60xf32> to vector<1x20xf32>
    %118 = vector.extract_strided_slice %110 {offsets = [3, 0], sizes = [1, 20], strides = [1, 1]} : vector<8x60xf32> to vector<1x20xf32>
    %119 = vector.extract_strided_slice %110 {offsets = [4, 0], sizes = [1, 20], strides = [1, 1]} : vector<8x60xf32> to vector<1x20xf32>
    %120 = vector.extract_strided_slice %110 {offsets = [5, 0], sizes = [1, 20], strides = [1, 1]} : vector<8x60xf32> to vector<1x20xf32>
    %121 = vector.extract_strided_slice %110 {offsets = [6, 0], sizes = [1, 20], strides = [1, 1]} : vector<8x60xf32> to vector<1x20xf32>
    %122 = vector.extract_strided_slice %110 {offsets = [7, 0], sizes = [1, 20], strides = [1, 1]} : vector<8x60xf32> to vector<1x20xf32>
    %cst_39 = arith.constant dense<0.000000e+00> : vector<16x60xf32>
    %123 = tpu.matmul %106, %111, %cst_39 {dimension_numbers = #tpu.dot_dimension_numbers<[1], [0], [0], [1], [0, 0, 1, 1], [], []>} : vector<16x20xf32>, vector<20x60xf32>, vector<16x60xf32> -> vector<16x60xf32>
    %124 = vector.broadcast %115 : vector<1x60xf32> to vector<16x60xf32>
    %125 = arith.addf %123, %124 : vector<16x60xf32>
    %126 = vector.extract_strided_slice %125 {offsets = [0, 0], sizes = [16, 20], strides = [1, 1]} : vector<16x60xf32> to vector<16x20xf32>
    %127 = vector.extract_strided_slice %125 {offsets = [0, 20], sizes = [16, 20], strides = [1, 1]} : vector<16x60xf32> to vector<16x20xf32>
    %128 = vector.extract_strided_slice %125 {offsets = [0, 40], sizes = [16, 20], strides = [1, 1]} : vector<16x60xf32> to vector<16x20xf32>
    %129 = vector.shape_cast %126 : vector<16x20xf32> to vector<1x16x20xf32>
    %130 = vector.broadcast %129 : vector<1x16x20xf32> to vector<5x16x20xf32>
    %131 = arith.mulf %130, %4 : vector<5x16x20xf32>
    %132 = vector.shape_cast %131 : vector<5x16x20xf32> to vector<80x20xf32>
    %cst_40 = arith.constant dense<0.000000e+00> : vector<80x16xf32>
    %133 = tpu.matmul %132, %127, %cst_40 {dimension_numbers = #tpu.dot_dimension_numbers<[1], [1], [0], [0], [0, 0, 1, 0], [], []>} : vector<80x20xf32>, vector<16x20xf32>, vector<80x16xf32> -> vector<80x16xf32>
    %134 = vector.shape_cast %133 : vector<80x16xf32> to vector<5x16x16xf32>
    %135 = vector.broadcast %3 : vector<1x16x16xf32> to vector<5x16x16xf32>
    %136 = arith.addf %134, %135 : vector<5x16x16xf32>
    %cst_41 = arith.constant dense<0xFF800000> : vector<5x16xf32>
    %137 = vector.multi_reduction <maximumf>, %136, %cst_41 [2] : vector<5x16x16xf32> to vector<5x16xf32>
    %138 = vector.shape_cast %137 : vector<5x16xf32> to vector<5x16x1xf32>
    %139 = vector.broadcast %138 : vector<5x16x1xf32> to vector<5x16x16xf32>
    %140 = arith.subf %136, %139 : vector<5x16x16xf32>
    %141 = math.exp %140 : vector<5x16x16xf32>
    %cst_42 = arith.constant dense<0.000000e+00> : vector<5x16xf32>
    %142 = vector.multi_reduction <add>, %141, %cst_42 [2] : vector<5x16x16xf32> to vector<5x16xf32>
    %143 = vector.shape_cast %142 : vector<5x16xf32> to vector<5x16x1xf32>
    %144 = vector.shape_cast %141 : vector<5x16x16xf32> to vector<80x16xf32>
    %cst_43 = arith.constant dense<0.000000e+00> : vector<80x20xf32>
    %145 = tpu.matmul %144, %128, %cst_43 {dimension_numbers = #tpu.dot_dimension_numbers<[1], [0], [0], [1], [0, 0, 1, 1], [], []>} : vector<80x16xf32>, vector<16x20xf32>, vector<80x20xf32> -> vector<80x20xf32>
    %146 = tpu.reciprocal %143 {approx = true} : vector<5x16x1xf32> -> vector<5x16x1xf32>
    %147 = vector.shape_cast %145 : vector<80x20xf32> to vector<5x16x20xf32>
    %148 = vector.broadcast %146 : vector<5x16x1xf32> to vector<5x16x20xf32>
    %149 = arith.mulf %147, %148 : vector<5x16x20xf32>
    %150 = arith.mulf %149, %4 : vector<5x16x20xf32>
    %cst_44 = arith.constant dense<0.000000e+00> : vector<16x20xf32>
    %151 = vector.multi_reduction <add>, %150, %cst_44 [0] : vector<5x16x20xf32> to vector<16x20xf32>
    %cst_45 = arith.constant dense<0.000000e+00> : vector<16x20xf32>
    %152 = tpu.matmul %151, %112, %cst_45 {dimension_numbers = #tpu.dot_dimension_numbers<[1], [0], [0], [1], [0, 0, 1, 1], [], []>} : vector<16x20xf32>, vector<20x20xf32>, vector<16x20xf32> -> vector<16x20xf32>
    %153 = vector.broadcast %116 : vector<1x20xf32> to vector<16x20xf32>
    %154 = arith.addf %152, %153 : vector<16x20xf32>
    %155 = arith.addf %106, %154 : vector<16x20xf32>
    %cst_46 = arith.constant dense<0.000000e+00> : vector<16xf32>
    %156 = vector.multi_reduction <add>, %155, %cst_46 [1] : vector<16x20xf32> to vector<16xf32>
    %157 = vector.shape_cast %156 : vector<16xf32> to vector<16x1xf32>
    %cst_47 = arith.constant 2.000000e+01 : f32
    %158 = vector.broadcast %cst_47 : f32 to vector<16x1xf32>
    %159 = arith.divf %157, %158 : vector<16x1xf32>
    %160 = vector.broadcast %159 : vector<16x1xf32> to vector<16x20xf32>
    %161 = arith.subf %155, %160 : vector<16x20xf32>
    %162 = arith.mulf %161, %161 : vector<16x20xf32>
    %cst_48 = arith.constant dense<0.000000e+00> : vector<16xf32>
    %163 = vector.multi_reduction <add>, %162, %cst_48 [1] : vector<16x20xf32> to vector<16xf32>
    %164 = vector.shape_cast %163 : vector<16xf32> to vector<16x1xf32>
    %cst_49 = arith.constant 2.000000e+01 : f32
    %165 = vector.broadcast %cst_49 : f32 to vector<16x1xf32>
    %166 = arith.divf %164, %165 : vector<16x1xf32>
    %167 = vector.broadcast %159 : vector<16x1xf32> to vector<16x20xf32>
    %168 = arith.subf %155, %167 : vector<16x20xf32>
    %cst_50 = arith.constant 9.99999974E-6 : f32
    %169 = vector.broadcast %cst_50 : f32 to vector<16x1xf32>
    %170 = arith.addf %166, %169 : vector<16x1xf32>
    %171 = math.rsqrt %170 : vector<16x1xf32>
    %172 = vector.broadcast %171 : vector<16x1xf32> to vector<16x20xf32>
    %173 = arith.mulf %168, %172 : vector<16x20xf32>
    %174 = vector.broadcast %117 : vector<1x20xf32> to vector<16x20xf32>
    %175 = arith.mulf %173, %174 : vector<16x20xf32>
    %176 = vector.broadcast %118 : vector<1x20xf32> to vector<16x20xf32>
    %177 = arith.addf %175, %176 : vector<16x20xf32>
    %cst_51 = arith.constant dense<0.000000e+00> : vector<16x20xf32>
    %178 = tpu.matmul %177, %113, %cst_51 {dimension_numbers = #tpu.dot_dimension_numbers<[1], [0], [0], [1], [0, 0, 1, 1], [], []>} : vector<16x20xf32>, vector<20x20xf32>, vector<16x20xf32> -> vector<16x20xf32>
    %179 = vector.broadcast %119 : vector<1x20xf32> to vector<16x20xf32>
    %180 = arith.addf %178, %179 : vector<16x20xf32>
    %cst_52 = arith.constant 0.000000e+00 : f32
    %181 = vector.broadcast %cst_52 : f32 to vector<16x20xf32>
    %182 = arith.maximumf %180, %181 : vector<16x20xf32>
    %cst_53 = arith.constant dense<0.000000e+00> : vector<16x20xf32>
    %183 = tpu.matmul %182, %114, %cst_53 {dimension_numbers = #tpu.dot_dimension_numbers<[1], [0], [0], [1], [0, 0, 1, 1], [], []>} : vector<16x20xf32>, vector<20x20xf32>, vector<16x20xf32> -> vector<16x20xf32>
    %184 = vector.broadcast %120 : vector<1x20xf32> to vector<16x20xf32>
    %185 = arith.addf %183, %184 : vector<16x20xf32>
    %186 = arith.addf %177, %185 : vector<16x20xf32>
    %cst_54 = arith.constant dense<0.000000e+00> : vector<16xf32>
    %187 = vector.multi_reduction <add>, %186, %cst_54 [1] : vector<16x20xf32> to vector<16xf32>
    %188 = vector.shape_cast %187 : vector<16xf32> to vector<16x1xf32>
    %cst_55 = arith.constant 2.000000e+01 : f32
    %189 = vector.broadcast %cst_55 : f32 to vector<16x1xf32>
    %190 = arith.divf %188, %189 : vector<16x1xf32>
    %191 = vector.broadcast %190 : vector<16x1xf32> to vector<16x20xf32>
    %192 = arith.subf %186, %191 : vector<16x20xf32>
    %193 = arith.mulf %192, %192 : vector<16x20xf32>
    %cst_56 = arith.constant dense<0.000000e+00> : vector<16xf32>
    %194 = vector.multi_reduction <add>, %193, %cst_56 [1] : vector<16x20xf32> to vector<16xf32>
    %195 = vector.shape_cast %194 : vector<16xf32> to vector<16x1xf32>
    %cst_57 = arith.constant 2.000000e+01 : f32
    %196 = vector.broadcast %cst_57 : f32 to vector<16x1xf32>
    %197 = arith.divf %195, %196 : vector<16x1xf32>
    %198 = vector.broadcast %190 : vector<16x1xf32> to vector<16x20xf32>
    %199 = arith.subf %186, %198 : vector<16x20xf32>
    %cst_58 = arith.constant 9.99999974E-6 : f32
    %200 = vector.broadcast %cst_58 : f32 to vector<16x1xf32>
    %201 = arith.addf %197, %200 : vector<16x1xf32>
    %202 = math.rsqrt %201 : vector<16x1xf32>
    %203 = vector.broadcast %202 : vector<16x1xf32> to vector<16x20xf32>
    %204 = arith.mulf %199, %203 : vector<16x20xf32>
    %205 = vector.broadcast %121 : vector<1x20xf32> to vector<16x20xf32>
    %206 = arith.mulf %204, %205 : vector<16x20xf32>
    %207 = vector.broadcast %122 : vector<1x20xf32> to vector<16x20xf32>
    %208 = arith.addf %206, %207 : vector<16x20xf32>
    %c2 = arith.constant 2 : index
    %c0_59 = arith.constant 0 : index
    %c0_60 = arith.constant 0 : index
    %209 = vector.load %arg4[%c2, %c0_59, %c0_60] : memref<4x20x120xf32, #tpu.memory_space<vmem>>, vector<1x20x120xf32>
    %210 = vector.shape_cast %209 : vector<1x20x120xf32> to vector<20x120xf32>
    %c2_61 = arith.constant 2 : index
    %c0_62 = arith.constant 0 : index
    %c0_63 = arith.constant 0 : index
    %211 = vector.load %arg5[%c2_61, %c0_62, %c0_63] : memref<4x8x60xf32, #tpu.memory_space<vmem>>, vector<1x8x60xf32>
    %212 = vector.shape_cast %211 : vector<1x8x60xf32> to vector<8x60xf32>
    %213 = vector.extract_strided_slice %210 {offsets = [0, 0], sizes = [20, 60], strides = [1, 1]} : vector<20x120xf32> to vector<20x60xf32>
    %214 = vector.extract_strided_slice %210 {offsets = [0, 60], sizes = [20, 20], strides = [1, 1]} : vector<20x120xf32> to vector<20x20xf32>
    %215 = vector.extract_strided_slice %210 {offsets = [0, 80], sizes = [20, 20], strides = [1, 1]} : vector<20x120xf32> to vector<20x20xf32>
    %216 = vector.extract_strided_slice %210 {offsets = [0, 100], sizes = [20, 20], strides = [1, 1]} : vector<20x120xf32> to vector<20x20xf32>
    %217 = vector.extract_strided_slice %212 {offsets = [0, 0], sizes = [1, 60], strides = [1, 1]} : vector<8x60xf32> to vector<1x60xf32>
    %218 = vector.extract_strided_slice %212 {offsets = [1, 0], sizes = [1, 20], strides = [1, 1]} : vector<8x60xf32> to vector<1x20xf32>
    %219 = vector.extract_strided_slice %212 {offsets = [2, 0], sizes = [1, 20], strides = [1, 1]} : vector<8x60xf32> to vector<1x20xf32>
    %220 = vector.extract_strided_slice %212 {offsets = [3, 0], sizes = [1, 20], strides = [1, 1]} : vector<8x60xf32> to vector<1x20xf32>
    %221 = vector.extract_strided_slice %212 {offsets = [4, 0], sizes = [1, 20], strides = [1, 1]} : vector<8x60xf32> to vector<1x20xf32>
    %222 = vector.extract_strided_slice %212 {offsets = [5, 0], sizes = [1, 20], strides = [1, 1]} : vector<8x60xf32> to vector<1x20xf32>
    %223 = vector.extract_strided_slice %212 {offsets = [6, 0], sizes = [1, 20], strides = [1, 1]} : vector<8x60xf32> to vector<1x20xf32>
    %224 = vector.extract_strided_slice %212 {offsets = [7, 0], sizes = [1, 20], strides = [1, 1]} : vector<8x60xf32> to vector<1x20xf32>
    %cst_64 = arith.constant dense<0.000000e+00> : vector<16x60xf32>
    %225 = tpu.matmul %208, %213, %cst_64 {dimension_numbers = #tpu.dot_dimension_numbers<[1], [0], [0], [1], [0, 0, 1, 1], [], []>} : vector<16x20xf32>, vector<20x60xf32>, vector<16x60xf32> -> vector<16x60xf32>
    %226 = vector.broadcast %217 : vector<1x60xf32> to vector<16x60xf32>
    %227 = arith.addf %225, %226 : vector<16x60xf32>
    %228 = vector.extract_strided_slice %227 {offsets = [0, 0], sizes = [16, 20], strides = [1, 1]} : vector<16x60xf32> to vector<16x20xf32>
    %229 = vector.extract_strided_slice %227 {offsets = [0, 20], sizes = [16, 20], strides = [1, 1]} : vector<16x60xf32> to vector<16x20xf32>
    %230 = vector.extract_strided_slice %227 {offsets = [0, 40], sizes = [16, 20], strides = [1, 1]} : vector<16x60xf32> to vector<16x20xf32>
    %231 = vector.shape_cast %228 : vector<16x20xf32> to vector<1x16x20xf32>
    %232 = vector.broadcast %231 : vector<1x16x20xf32> to vector<5x16x20xf32>
    %233 = arith.mulf %232, %4 : vector<5x16x20xf32>
    %234 = vector.shape_cast %233 : vector<5x16x20xf32> to vector<80x20xf32>
    %cst_65 = arith.constant dense<0.000000e+00> : vector<80x16xf32>
    %235 = tpu.matmul %234, %229, %cst_65 {dimension_numbers = #tpu.dot_dimension_numbers<[1], [1], [0], [0], [0, 0, 1, 0], [], []>} : vector<80x20xf32>, vector<16x20xf32>, vector<80x16xf32> -> vector<80x16xf32>
    %236 = vector.shape_cast %235 : vector<80x16xf32> to vector<5x16x16xf32>
    %237 = vector.broadcast %3 : vector<1x16x16xf32> to vector<5x16x16xf32>
    %238 = arith.addf %236, %237 : vector<5x16x16xf32>
    %cst_66 = arith.constant dense<0xFF800000> : vector<5x16xf32>
    %239 = vector.multi_reduction <maximumf>, %238, %cst_66 [2] : vector<5x16x16xf32> to vector<5x16xf32>
    %240 = vector.shape_cast %239 : vector<5x16xf32> to vector<5x16x1xf32>
    %241 = vector.broadcast %240 : vector<5x16x1xf32> to vector<5x16x16xf32>
    %242 = arith.subf %238, %241 : vector<5x16x16xf32>
    %243 = math.exp %242 : vector<5x16x16xf32>
    %cst_67 = arith.constant dense<0.000000e+00> : vector<5x16xf32>
    %244 = vector.multi_reduction <add>, %243, %cst_67 [2] : vector<5x16x16xf32> to vector<5x16xf32>
    %245 = vector.shape_cast %244 : vector<5x16xf32> to vector<5x16x1xf32>
    %246 = vector.shape_cast %243 : vector<5x16x16xf32> to vector<80x16xf32>
    %cst_68 = arith.constant dense<0.000000e+00> : vector<80x20xf32>
    %247 = tpu.matmul %246, %230, %cst_68 {dimension_numbers = #tpu.dot_dimension_numbers<[1], [0], [0], [1], [0, 0, 1, 1], [], []>} : vector<80x16xf32>, vector<16x20xf32>, vector<80x20xf32> -> vector<80x20xf32>
    %248 = tpu.reciprocal %245 {approx = true} : vector<5x16x1xf32> -> vector<5x16x1xf32>
    %249 = vector.shape_cast %247 : vector<80x20xf32> to vector<5x16x20xf32>
    %250 = vector.broadcast %248 : vector<5x16x1xf32> to vector<5x16x20xf32>
    %251 = arith.mulf %249, %250 : vector<5x16x20xf32>
    %252 = arith.mulf %251, %4 : vector<5x16x20xf32>
    %cst_69 = arith.constant dense<0.000000e+00> : vector<16x20xf32>
    %253 = vector.multi_reduction <add>, %252, %cst_69 [0] : vector<5x16x20xf32> to vector<16x20xf32>
    %cst_70 = arith.constant dense<0.000000e+00> : vector<16x20xf32>
    %254 = tpu.matmul %253, %214, %cst_70 {dimension_numbers = #tpu.dot_dimension_numbers<[1], [0], [0], [1], [0, 0, 1, 1], [], []>} : vector<16x20xf32>, vector<20x20xf32>, vector<16x20xf32> -> vector<16x20xf32>
    %255 = vector.broadcast %218 : vector<1x20xf32> to vector<16x20xf32>
    %256 = arith.addf %254, %255 : vector<16x20xf32>
    %257 = arith.addf %208, %256 : vector<16x20xf32>
    %cst_71 = arith.constant dense<0.000000e+00> : vector<16xf32>
    %258 = vector.multi_reduction <add>, %257, %cst_71 [1] : vector<16x20xf32> to vector<16xf32>
    %259 = vector.shape_cast %258 : vector<16xf32> to vector<16x1xf32>
    %cst_72 = arith.constant 2.000000e+01 : f32
    %260 = vector.broadcast %cst_72 : f32 to vector<16x1xf32>
    %261 = arith.divf %259, %260 : vector<16x1xf32>
    %262 = vector.broadcast %261 : vector<16x1xf32> to vector<16x20xf32>
    %263 = arith.subf %257, %262 : vector<16x20xf32>
    %264 = arith.mulf %263, %263 : vector<16x20xf32>
    %cst_73 = arith.constant dense<0.000000e+00> : vector<16xf32>
    %265 = vector.multi_reduction <add>, %264, %cst_73 [1] : vector<16x20xf32> to vector<16xf32>
    %266 = vector.shape_cast %265 : vector<16xf32> to vector<16x1xf32>
    %cst_74 = arith.constant 2.000000e+01 : f32
    %267 = vector.broadcast %cst_74 : f32 to vector<16x1xf32>
    %268 = arith.divf %266, %267 : vector<16x1xf32>
    %269 = vector.broadcast %261 : vector<16x1xf32> to vector<16x20xf32>
    %270 = arith.subf %257, %269 : vector<16x20xf32>
    %cst_75 = arith.constant 9.99999974E-6 : f32
    %271 = vector.broadcast %cst_75 : f32 to vector<16x1xf32>
    %272 = arith.addf %268, %271 : vector<16x1xf32>
    %273 = math.rsqrt %272 : vector<16x1xf32>
    %274 = vector.broadcast %273 : vector<16x1xf32> to vector<16x20xf32>
    %275 = arith.mulf %270, %274 : vector<16x20xf32>
    %276 = vector.broadcast %219 : vector<1x20xf32> to vector<16x20xf32>
    %277 = arith.mulf %275, %276 : vector<16x20xf32>
    %278 = vector.broadcast %220 : vector<1x20xf32> to vector<16x20xf32>
    %279 = arith.addf %277, %278 : vector<16x20xf32>
    %cst_76 = arith.constant dense<0.000000e+00> : vector<16x20xf32>
    %280 = tpu.matmul %279, %215, %cst_76 {dimension_numbers = #tpu.dot_dimension_numbers<[1], [0], [0], [1], [0, 0, 1, 1], [], []>} : vector<16x20xf32>, vector<20x20xf32>, vector<16x20xf32> -> vector<16x20xf32>
    %281 = vector.broadcast %221 : vector<1x20xf32> to vector<16x20xf32>
    %282 = arith.addf %280, %281 : vector<16x20xf32>
    %cst_77 = arith.constant 0.000000e+00 : f32
    %283 = vector.broadcast %cst_77 : f32 to vector<16x20xf32>
    %284 = arith.maximumf %282, %283 : vector<16x20xf32>
    %cst_78 = arith.constant dense<0.000000e+00> : vector<16x20xf32>
    %285 = tpu.matmul %284, %216, %cst_78 {dimension_numbers = #tpu.dot_dimension_numbers<[1], [0], [0], [1], [0, 0, 1, 1], [], []>} : vector<16x20xf32>, vector<20x20xf32>, vector<16x20xf32> -> vector<16x20xf32>
    %286 = vector.broadcast %222 : vector<1x20xf32> to vector<16x20xf32>
    %287 = arith.addf %285, %286 : vector<16x20xf32>
    %288 = arith.addf %279, %287 : vector<16x20xf32>
    %cst_79 = arith.constant dense<0.000000e+00> : vector<16xf32>
    %289 = vector.multi_reduction <add>, %288, %cst_79 [1] : vector<16x20xf32> to vector<16xf32>
    %290 = vector.shape_cast %289 : vector<16xf32> to vector<16x1xf32>
    %cst_80 = arith.constant 2.000000e+01 : f32
    %291 = vector.broadcast %cst_80 : f32 to vector<16x1xf32>
    %292 = arith.divf %290, %291 : vector<16x1xf32>
    %293 = vector.broadcast %292 : vector<16x1xf32> to vector<16x20xf32>
    %294 = arith.subf %288, %293 : vector<16x20xf32>
    %295 = arith.mulf %294, %294 : vector<16x20xf32>
    %cst_81 = arith.constant dense<0.000000e+00> : vector<16xf32>
    %296 = vector.multi_reduction <add>, %295, %cst_81 [1] : vector<16x20xf32> to vector<16xf32>
    %297 = vector.shape_cast %296 : vector<16xf32> to vector<16x1xf32>
    %cst_82 = arith.constant 2.000000e+01 : f32
    %298 = vector.broadcast %cst_82 : f32 to vector<16x1xf32>
    %299 = arith.divf %297, %298 : vector<16x1xf32>
    %300 = vector.broadcast %292 : vector<16x1xf32> to vector<16x20xf32>
    %301 = arith.subf %288, %300 : vector<16x20xf32>
    %cst_83 = arith.constant 9.99999974E-6 : f32
    %302 = vector.broadcast %cst_83 : f32 to vector<16x1xf32>
    %303 = arith.addf %299, %302 : vector<16x1xf32>
    %304 = math.rsqrt %303 : vector<16x1xf32>
    %305 = vector.broadcast %304 : vector<16x1xf32> to vector<16x20xf32>
    %306 = arith.mulf %301, %305 : vector<16x20xf32>
    %307 = vector.broadcast %223 : vector<1x20xf32> to vector<16x20xf32>
    %308 = arith.mulf %306, %307 : vector<16x20xf32>
    %309 = vector.broadcast %224 : vector<1x20xf32> to vector<16x20xf32>
    %310 = arith.addf %308, %309 : vector<16x20xf32>
    %c3 = arith.constant 3 : index
    %c0_84 = arith.constant 0 : index
    %c0_85 = arith.constant 0 : index
    %311 = vector.load %arg4[%c3, %c0_84, %c0_85] : memref<4x20x120xf32, #tpu.memory_space<vmem>>, vector<1x20x120xf32>
    %312 = vector.shape_cast %311 : vector<1x20x120xf32> to vector<20x120xf32>
    %c3_86 = arith.constant 3 : index
    %c0_87 = arith.constant 0 : index
    %c0_88 = arith.constant 0 : index
    %313 = vector.load %arg5[%c3_86, %c0_87, %c0_88] : memref<4x8x60xf32, #tpu.memory_space<vmem>>, vector<1x8x60xf32>
    %314 = vector.shape_cast %313 : vector<1x8x60xf32> to vector<8x60xf32>
    %315 = vector.extract_strided_slice %312 {offsets = [0, 0], sizes = [20, 60], strides = [1, 1]} : vector<20x120xf32> to vector<20x60xf32>
    %316 = vector.extract_strided_slice %312 {offsets = [0, 60], sizes = [20, 20], strides = [1, 1]} : vector<20x120xf32> to vector<20x20xf32>
    %317 = vector.extract_strided_slice %312 {offsets = [0, 80], sizes = [20, 20], strides = [1, 1]} : vector<20x120xf32> to vector<20x20xf32>
    %318 = vector.extract_strided_slice %312 {offsets = [0, 100], sizes = [20, 20], strides = [1, 1]} : vector<20x120xf32> to vector<20x20xf32>
    %319 = vector.extract_strided_slice %314 {offsets = [0, 0], sizes = [1, 60], strides = [1, 1]} : vector<8x60xf32> to vector<1x60xf32>
    %320 = vector.extract_strided_slice %314 {offsets = [1, 0], sizes = [1, 20], strides = [1, 1]} : vector<8x60xf32> to vector<1x20xf32>
    %321 = vector.extract_strided_slice %314 {offsets = [2, 0], sizes = [1, 20], strides = [1, 1]} : vector<8x60xf32> to vector<1x20xf32>
    %322 = vector.extract_strided_slice %314 {offsets = [3, 0], sizes = [1, 20], strides = [1, 1]} : vector<8x60xf32> to vector<1x20xf32>
    %323 = vector.extract_strided_slice %314 {offsets = [4, 0], sizes = [1, 20], strides = [1, 1]} : vector<8x60xf32> to vector<1x20xf32>
    %324 = vector.extract_strided_slice %314 {offsets = [5, 0], sizes = [1, 20], strides = [1, 1]} : vector<8x60xf32> to vector<1x20xf32>
    %325 = vector.extract_strided_slice %314 {offsets = [6, 0], sizes = [1, 20], strides = [1, 1]} : vector<8x60xf32> to vector<1x20xf32>
    %326 = vector.extract_strided_slice %314 {offsets = [7, 0], sizes = [1, 20], strides = [1, 1]} : vector<8x60xf32> to vector<1x20xf32>
    %cst_89 = arith.constant dense<0.000000e+00> : vector<16x60xf32>
    %327 = tpu.matmul %310, %315, %cst_89 {dimension_numbers = #tpu.dot_dimension_numbers<[1], [0], [0], [1], [0, 0, 1, 1], [], []>} : vector<16x20xf32>, vector<20x60xf32>, vector<16x60xf32> -> vector<16x60xf32>
    %328 = vector.broadcast %319 : vector<1x60xf32> to vector<16x60xf32>
    %329 = arith.addf %327, %328 : vector<16x60xf32>
    %330 = vector.extract_strided_slice %329 {offsets = [0, 0], sizes = [16, 20], strides = [1, 1]} : vector<16x60xf32> to vector<16x20xf32>
    %331 = vector.extract_strided_slice %329 {offsets = [0, 20], sizes = [16, 20], strides = [1, 1]} : vector<16x60xf32> to vector<16x20xf32>
    %332 = vector.extract_strided_slice %329 {offsets = [0, 40], sizes = [16, 20], strides = [1, 1]} : vector<16x60xf32> to vector<16x20xf32>
    %333 = vector.shape_cast %330 : vector<16x20xf32> to vector<1x16x20xf32>
    %334 = vector.broadcast %333 : vector<1x16x20xf32> to vector<5x16x20xf32>
    %335 = arith.mulf %334, %4 : vector<5x16x20xf32>
    %336 = vector.shape_cast %335 : vector<5x16x20xf32> to vector<80x20xf32>
    %cst_90 = arith.constant dense<0.000000e+00> : vector<80x16xf32>
    %337 = tpu.matmul %336, %331, %cst_90 {dimension_numbers = #tpu.dot_dimension_numbers<[1], [1], [0], [0], [0, 0, 1, 0], [], []>} : vector<80x20xf32>, vector<16x20xf32>, vector<80x16xf32> -> vector<80x16xf32>
    %338 = vector.shape_cast %337 : vector<80x16xf32> to vector<5x16x16xf32>
    %339 = vector.broadcast %3 : vector<1x16x16xf32> to vector<5x16x16xf32>
    %340 = arith.addf %338, %339 : vector<5x16x16xf32>
    %cst_91 = arith.constant dense<0xFF800000> : vector<5x16xf32>
    %341 = vector.multi_reduction <maximumf>, %340, %cst_91 [2] : vector<5x16x16xf32> to vector<5x16xf32>
    %342 = vector.shape_cast %341 : vector<5x16xf32> to vector<5x16x1xf32>
    %343 = vector.broadcast %342 : vector<5x16x1xf32> to vector<5x16x16xf32>
    %344 = arith.subf %340, %343 : vector<5x16x16xf32>
    %345 = math.exp %344 : vector<5x16x16xf32>
    %cst_92 = arith.constant dense<0.000000e+00> : vector<5x16xf32>
    %346 = vector.multi_reduction <add>, %345, %cst_92 [2] : vector<5x16x16xf32> to vector<5x16xf32>
    %347 = vector.shape_cast %346 : vector<5x16xf32> to vector<5x16x1xf32>
    %348 = vector.shape_cast %345 : vector<5x16x16xf32> to vector<80x16xf32>
    %cst_93 = arith.constant dense<0.000000e+00> : vector<80x20xf32>
    %349 = tpu.matmul %348, %332, %cst_93 {dimension_numbers = #tpu.dot_dimension_numbers<[1], [0], [0], [1], [0, 0, 1, 1], [], []>} : vector<80x16xf32>, vector<16x20xf32>, vector<80x20xf32> -> vector<80x20xf32>
    %350 = tpu.reciprocal %347 {approx = true} : vector<5x16x1xf32> -> vector<5x16x1xf32>
    %351 = vector.shape_cast %349 : vector<80x20xf32> to vector<5x16x20xf32>
    %352 = vector.broadcast %350 : vector<5x16x1xf32> to vector<5x16x20xf32>
    %353 = arith.mulf %351, %352 : vector<5x16x20xf32>
    %354 = arith.mulf %353, %4 : vector<5x16x20xf32>
    %cst_94 = arith.constant dense<0.000000e+00> : vector<16x20xf32>
    %355 = vector.multi_reduction <add>, %354, %cst_94 [0] : vector<5x16x20xf32> to vector<16x20xf32>
    %cst_95 = arith.constant dense<0.000000e+00> : vector<16x20xf32>
    %356 = tpu.matmul %355, %316, %cst_95 {dimension_numbers = #tpu.dot_dimension_numbers<[1], [0], [0], [1], [0, 0, 1, 1], [], []>} : vector<16x20xf32>, vector<20x20xf32>, vector<16x20xf32> -> vector<16x20xf32>
    %357 = vector.broadcast %320 : vector<1x20xf32> to vector<16x20xf32>
    %358 = arith.addf %356, %357 : vector<16x20xf32>
    %359 = arith.addf %310, %358 : vector<16x20xf32>
    %cst_96 = arith.constant dense<0.000000e+00> : vector<16xf32>
    %360 = vector.multi_reduction <add>, %359, %cst_96 [1] : vector<16x20xf32> to vector<16xf32>
    %361 = vector.shape_cast %360 : vector<16xf32> to vector<16x1xf32>
    %cst_97 = arith.constant 2.000000e+01 : f32
    %362 = vector.broadcast %cst_97 : f32 to vector<16x1xf32>
    %363 = arith.divf %361, %362 : vector<16x1xf32>
    %364 = vector.broadcast %363 : vector<16x1xf32> to vector<16x20xf32>
    %365 = arith.subf %359, %364 : vector<16x20xf32>
    %366 = arith.mulf %365, %365 : vector<16x20xf32>
    %cst_98 = arith.constant dense<0.000000e+00> : vector<16xf32>
    %367 = vector.multi_reduction <add>, %366, %cst_98 [1] : vector<16x20xf32> to vector<16xf32>
    %368 = vector.shape_cast %367 : vector<16xf32> to vector<16x1xf32>
    %cst_99 = arith.constant 2.000000e+01 : f32
    %369 = vector.broadcast %cst_99 : f32 to vector<16x1xf32>
    %370 = arith.divf %368, %369 : vector<16x1xf32>
    %371 = vector.broadcast %363 : vector<16x1xf32> to vector<16x20xf32>
    %372 = arith.subf %359, %371 : vector<16x20xf32>
    %cst_100 = arith.constant 9.99999974E-6 : f32
    %373 = vector.broadcast %cst_100 : f32 to vector<16x1xf32>
    %374 = arith.addf %370, %373 : vector<16x1xf32>
    %375 = math.rsqrt %374 : vector<16x1xf32>
    %376 = vector.broadcast %375 : vector<16x1xf32> to vector<16x20xf32>
    %377 = arith.mulf %372, %376 : vector<16x20xf32>
    %378 = vector.broadcast %321 : vector<1x20xf32> to vector<16x20xf32>
    %379 = arith.mulf %377, %378 : vector<16x20xf32>
    %380 = vector.broadcast %322 : vector<1x20xf32> to vector<16x20xf32>
    %381 = arith.addf %379, %380 : vector<16x20xf32>
    %cst_101 = arith.constant dense<0.000000e+00> : vector<16x20xf32>
    %382 = tpu.matmul %381, %317, %cst_101 {dimension_numbers = #tpu.dot_dimension_numbers<[1], [0], [0], [1], [0, 0, 1, 1], [], []>} : vector<16x20xf32>, vector<20x20xf32>, vector<16x20xf32> -> vector<16x20xf32>
    %383 = vector.broadcast %323 : vector<1x20xf32> to vector<16x20xf32>
    %384 = arith.addf %382, %383 : vector<16x20xf32>
    %cst_102 = arith.constant 0.000000e+00 : f32
    %385 = vector.broadcast %cst_102 : f32 to vector<16x20xf32>
    %386 = arith.maximumf %384, %385 : vector<16x20xf32>
    %cst_103 = arith.constant dense<0.000000e+00> : vector<16x20xf32>
    %387 = tpu.matmul %386, %318, %cst_103 {dimension_numbers = #tpu.dot_dimension_numbers<[1], [0], [0], [1], [0, 0, 1, 1], [], []>} : vector<16x20xf32>, vector<20x20xf32>, vector<16x20xf32> -> vector<16x20xf32>
    %388 = vector.broadcast %324 : vector<1x20xf32> to vector<16x20xf32>
    %389 = arith.addf %387, %388 : vector<16x20xf32>
    %390 = arith.addf %381, %389 : vector<16x20xf32>
    %cst_104 = arith.constant dense<0.000000e+00> : vector<16xf32>
    %391 = vector.multi_reduction <add>, %390, %cst_104 [1] : vector<16x20xf32> to vector<16xf32>
    %392 = vector.shape_cast %391 : vector<16xf32> to vector<16x1xf32>
    %cst_105 = arith.constant 2.000000e+01 : f32
    %393 = vector.broadcast %cst_105 : f32 to vector<16x1xf32>
    %394 = arith.divf %392, %393 : vector<16x1xf32>
    %395 = vector.broadcast %394 : vector<16x1xf32> to vector<16x20xf32>
    %396 = arith.subf %390, %395 : vector<16x20xf32>
    %397 = arith.mulf %396, %396 : vector<16x20xf32>
    %cst_106 = arith.constant dense<0.000000e+00> : vector<16xf32>
    %398 = vector.multi_reduction <add>, %397, %cst_106 [1] : vector<16x20xf32> to vector<16xf32>
    %399 = vector.shape_cast %398 : vector<16xf32> to vector<16x1xf32>
    %cst_107 = arith.constant 2.000000e+01 : f32
    %400 = vector.broadcast %cst_107 : f32 to vector<16x1xf32>
    %401 = arith.divf %399, %400 : vector<16x1xf32>
    %402 = vector.broadcast %394 : vector<16x1xf32> to vector<16x20xf32>
    %403 = arith.subf %390, %402 : vector<16x20xf32>
    %cst_108 = arith.constant 9.99999974E-6 : f32
    %404 = vector.broadcast %cst_108 : f32 to vector<16x1xf32>
    %405 = arith.addf %401, %404 : vector<16x1xf32>
    %406 = math.rsqrt %405 : vector<16x1xf32>
    %407 = vector.broadcast %406 : vector<16x1xf32> to vector<16x20xf32>
    %408 = arith.mulf %403, %407 : vector<16x20xf32>
    %409 = vector.broadcast %325 : vector<1x20xf32> to vector<16x20xf32>
    %410 = arith.mulf %408, %409 : vector<16x20xf32>
    %411 = vector.broadcast %326 : vector<1x20xf32> to vector<16x20xf32>
    %412 = arith.addf %410, %411 : vector<16x20xf32>
    %c0_109 = arith.constant 0 : index
    %c0_110 = arith.constant 0 : index
    %413 = vector.load %arg6[%c0_109, %c0_110] : memref<16x20xf32, #tpu.memory_space<vmem>>, vector<16x20xf32>
    tpu.vector_store %arg6[%c0_109, %c0_110], %412 {strides = array<i32>} : memref<16x20xf32, #tpu.memory_space<vmem>>, vector<16x20xf32>,
    return
  }
}

</mosaic_0001>

<bundles_post_ra>
// kernel: tpu_custom_call.1
= control target key start
LH: loop header
LB: loop body
LE: loop exit
PB: predicated region body
PF: predicated region fallthrough
CT: control target
= control target key end

     0   :  { %vm54_vm0 = vcmask 1043456   ;;  %s3894_s0 = inlined_call_operand.vmem [shape: f32[16,20], index: 0, kind: input, shape index: {}]   ;;  %s3895_s1 = inlined_call_operand.vmem [shape: f32[16,20], index: 1, kind: input, shape index: {}]   ;;  %s3896_s2 = inlined_call_operand.vmem [shape: f32[1,16,16], index: 2, kind: input, shape index: {}]   ;;  %s3897_s3 = inlined_call_operand.vmem [shape: f32[5,16,20], index: 3, kind: input, shape index: {}]   ;;  %s3898_s4 = inlined_call_operand.vmem [shape: f32[4,20,120], index: 4, kind: input, shape index: {}]   ;;  %s3899_s5 = inlined_call_operand.vmem [shape: f32[4,8,60], index: 5, kind: input, shape index: {}]   ;;  %s3900_s6 = inlined_call_operand.hbm [shape: f32[16,20], index: 6, kind: output, shape index: {}]  }
   0x1   :  { %v2976_v0 = vld [vmem:[%s3898_s4 + $0x10] sm:$0xf]  ;;  %v2981_v1 = vld [vmem:[%s3898_s4 + $0x8] sm:$0xff]  ;;  %v24_v2 = vld [vmem:[%s3894_s0] sm:$0xff] }
   0x2   :  { %2450 = vmatpush.msk.msra.mxu3 %vm54_vm0, %v2976_v0  ;;  %v26_v3 = vld [vmem:[%s3895_s1] sm:$0xff] }
   0x3   :  { %v2994_v4 = vld [vmem:[%s3898_s4] sm:$0xff]  ;;  %v2996_v5 = vadd.f32 %v26_v3, %v24_v2 }
   0x4   :  { %11 = vsyncpa [#allocation3], 0  ;;  %72 = vmatpush.msra.mxu3 %v2981_v1  ;;  %vm47_vm1 = vcmask 162816   ;;  %v25_v6 = vld [vmem:[%s3894_s0 + $0x8] sm:$0xff]  ;;  %v3015_v10 = vld [vmem:[%s3899_s5] sm:$0xff]  ;;  %s2929_s0 = smov 108  }
   0x5   :  { %v27_v7 = vld [vmem:[%s3895_s1 + $0x8] sm:$0xff]  ;;  %v46_v11 = vperm.slane %v3015_v10, 0  ;;  %s2930_s1 = smov 88   ;;  %v3025_v20 = vld [vmem:[%s3897_s3] sm:$0xff]  ;;  %v3040_v25 = vld [vmem:[%s3897_s3 + $0x10] sm:$0xff]  ;;  %vm188_vm2 = vcmask 130048  }
   0x6   :  { %73 = vmatpush.msra.mxu3 %v2994_v4  ;;  %v3008_v8 = vadd.f32 %v27_v7, %v25_v6  ;;  %v3033_v23 = vld [vmem:[%s3897_s3 + $0x8] sm:$0xff]  ;;  %v3047_v27 = vld [vmem:[%s3897_s3 + $0x18] sm:$0xff]  ;;  %v3054_v29 = vld [vmem:[%s3897_s3 + $0x20] sm:$0xff]  ;;  %s2931_s13 = smov 68   ;;  %s2932_s14 = smov 48  }
   0x7   :  { %2451 = vmatmul.msk.f32.vlgmr.msra.gmra.mxu3 %vm47_vm1, %v2996_v5  ;;  %v3061_v31 = vld [vmem:[%s3897_s3 + $0x28] sm:$0xff]  ;;  %v3068_v33 = vld [vmem:[%s3897_s3 + $0x30] sm:$0xff]  ;;  %v3075_v35 = vld [vmem:[%s3897_s3 + $0x38] sm:$0xff]  ;;  %s2934_s15 = smov 28   ;;  %s2936_s16 = smov 128  }
   0x8   :  { %v3082_v37 = vld [vmem:[%s3897_s3 + $0x40] sm:$0xff]  ;;  %v3089_v39 = vld [vmem:[%s3897_s3 + $0x48] sm:$0xff]  ;;  %s2937_s17 = smov 8  }
   0x9   :  { %v3096_v41 = vld [vmem:[%s3896_s2] sm:$0xff]  ;;  %v3103_v45 = vld [vmem:[%s3896_s2 + $0x8] sm:$0xff] }
   0xf   :  { %2452 = vmatmul.msk.f32.gmra.mxu3 %vm47_vm1, %v3008_v8 }
  0x8a   :  { %v75_v9 = vpop.f32.mrf.mxu3 }
  0x8b   :  { %v76_v13 = vadd.f32 %v75_v9, %v46_v11 }
  0x8d   :  { %v81_v22 = vmul.f32 %v76_v13, %v3025_v20  ;;  %v83_v26 = vmul.f32 %v76_v13, %v3040_v25  ;;  %v85_v30 = vmul.f32 %v76_v13, %v3054_v29  ;;  %v87_v34 = vmul.f32 %v76_v13, %v3068_v33 }
  0x8e   :  { %v89_v38 = vmul.f32 %v76_v13, %v3082_v37 }
  0x92   :  { %v78_v12 = vpop.f32.mrf.mxu3 }
  0x93   :  { %v79_v14 = vadd.f32 %v78_v12, %v46_v11 }
  0x95   :  { %95 = vrot.lane.b32.xlu0 %v79_v14, %s2929_s0  ;;  %v2607_v15 = vpack.i.bf16 %v76_v13, %v79_v14  ;;  %v82_v24 = vmul.f32 %v79_v14, %v3033_v23  ;;  %v84_v28 = vmul.f32 %v79_v14, %v3047_v27  ;;  %v86_v32 = vmul.f32 %v79_v14, %v3061_v31 }
  0x96   :  { %v88_v36 = vmul.f32 %v79_v14, %v3075_v35  ;;  %v90_v40 = vmul.f32 %v79_v14, %v3089_v39 }
  0x97   :  { %2608 = vrot.lane.b32.xlu2 %v2607_v15, %s2930_s1 }
  0x9d   :  { %93 = vrot.lane.b32.xlu0 %v76_v13, %s2929_s0 }
  0xf1   :  { %v2609_v16 = vpop.permute.xlu2 %2608 }
  0xf2   :  { %v2610_v17 = vunpack.i.l.bf16 %v2609_v16  ;;  %v2611_v18 = vunpack.i.h.bf16 %v2609_v16 }
  0xf4   :  { %329 = vmatpush.msra.mxu2 %v2610_v17 }
  0xf6   :  { %330 = vmatpush.msra.mxu2 %v2611_v18 }
 0x107   :  { %v96_v19 = vpop.permute.xlu0 %95 }
 0x108   :  { %2453 = vmatpush.xpose.msk.msra.mxu1 %vm47_vm1, %v96_v19 }
 0x10f   :  { %v94_v21 = vpop.permute.xlu0 %93 }
 0x110   :  { %2454 = vmatpush.xpose.msk.msra.mxu1 %vm47_vm1, %v94_v21 }
 0x113   :  { %2455 = vmatmul.msk.f32.vlgmr.msra.gmra.mxu1 %vm47_vm1, %v81_v22 }
 0x11b   :  { %2456 = vmatmul.msk.f32.gmra.mxu1 %vm47_vm1, %v82_v24 }
 0x123   :  { %2457 = vmatmul.msk.f32.gmra.mxu1 %vm47_vm1, %v83_v26 }
 0x12b   :  { %2458 = vmatmul.msk.f32.gmra.mxu1 %vm47_vm1, %v84_v28 }
 0x133   :  { %2459 = vmatmul.msk.f32.gmra.mxu1 %vm47_vm1, %v85_v30 }
 0x13b   :  { %2460 = vmatmul.msk.f32.gmra.mxu1 %vm47_vm1, %v86_v32 }
 0x143   :  { %2461 = vmatmul.msk.f32.gmra.mxu1 %vm47_vm1, %v87_v34 }
 0x14b   :  { %2462 = vmatmul.msk.f32.gmra.mxu1 %vm47_vm1, %v88_v36 }
 0x153   :  { %2463 = vmatmul.msk.f32.gmra.mxu1 %vm47_vm1, %v89_v38 }
 0x15b   :  { %2464 = vmatmul.msk.f32.gmra.mxu1 %vm47_vm1, %v90_v40 }
 0x190   :  { %v148_v42 = vpop.f32.mrf.mxu1 }
 0x191   :  { %v178_v43 = vadd.f32 %v148_v42, %v3096_v41 }
 0x193   :  { %v189_v44 = vsel %vm188_vm2, %v178_v43, -inf }
 0x194   :  { %190 = vmax.xlane.f32.xlu1 %v189_v44 }
 0x198   :  { %v151_v46 = vpop.f32.mrf.mxu1 }
 0x199   :  { %v179_v47 = vadd.f32 %v151_v46, %v3103_v45 }
 0x19b   :  { %v192_v48 = vsel %vm188_vm2, %v179_v47, -inf }
 0x19c   :  { %193 = vmax.xlane.f32.xlu1 %v192_v48 }
 0x1a0   :  { %v154_v49 = vpop.f32.mrf.mxu1 }
 0x1a1   :  { %v180_v50 = vadd.f32 %v154_v49, %v3096_v41 }
 0x1a3   :  { %v195_v51 = vsel %vm188_vm2, %v180_v50, -inf }
 0x1a4   :  { %196 = vmax.xlane.f32.xlu2 %v195_v51 }
 0x1a8   :  { %v157_v52 = vpop.f32.mrf.mxu1 }
 0x1a9   :  { %v181_v53 = vadd.f32 %v157_v52, %v3103_v45 }
 0x1ab   :  { %v198_v54 = vsel %vm188_vm2, %v181_v53, -inf }
 0x1ac   :  { %199 = vmax.xlane.f32.xlu0 %v198_v54 }
 0x1b0   :  { %v160_v55 = vpop.f32.mrf.mxu1 }
 0x1b1   :  { %v182_v56 = vadd.f32 %v160_v55, %v3096_v41 }
 0x1b3   :  { %v201_v57 = vsel %vm188_vm2, %v182_v56, -inf }
 0x1b4   :  { %202 = vmax.xlane.f32.xlu1 %v201_v57 }
 0x1b8   :  { %v163_v58 = vpop.f32.mrf.mxu1 }
 0x1b9   :  { %v183_v59 = vadd.f32 %v163_v58, %v3103_v45 }
 0x1bb   :  { %v204_v60 = vsel %vm188_vm2, %v183_v59, -inf }
 0x1bc   :  { %205 = vmax.xlane.f32.xlu1 %v204_v60 }
 0x1c0   :  { %v166_v61 = vpop.f32.mrf.mxu1 }
 0x1c1   :  { %v184_v62 = vadd.f32 %v166_v61, %v3096_v41 }
 0x1c3   :  { %v207_v63 = vsel %vm188_vm2, %v184_v62, -inf }
 0x1c4   :  { %208 = vmax.xlane.f32.xlu1 %v207_v63 }
 0x1c8   :  { %v169_v2 = vpop.f32.mrf.mxu1 }
 0x1c9   :  { %v3118_v3 = vadd.f32 %v169_v2, %v3103_v45 }
 0x1cb   :  { %v210_v6 = vsel %vm188_vm2, %v3118_v3, -inf }
 0x1cc   :  { %211 = vmax.xlane.f32.xlu1 %v210_v6 }
 0x1d0   :  { %v172_v7 = vpop.f32.mrf.mxu1 }
 0x1d1   :  { %v3123_v9 = vadd.f32 %v172_v7, %v3096_v41 }
 0x1d3   :  { %v213_v11 = vsel %vm188_vm2, %v3123_v9, -inf }
 0x1d4   :  { %214 = vmax.xlane.f32.xlu1 %v213_v11 }
 0x1d8   :  { %v175_v12 = vpop.f32.mrf.mxu1 }
 0x1d9   :  { %v3128_v13 = vadd.f32 %v175_v12, %v3103_v45 }
 0x1db   :  { %v216_v14 = vsel %vm188_vm2, %v3128_v13, -inf }
 0x1dc   :  { %217 = vmax.xlane.f32.xlu2 %v216_v14 }
 0x207   :  { %v191_v15 = vpop.xlane.xlu1 %190 }
 0x208   :  { %v219_v16 = vsub.f32 %v178_v43, %v191_v15 }
 0x20a   :  { %v229_v17 = vmul.f32 1.442695, %v219_v16 }
 0x20c   :  { %2687 = vpow2.f32 %v229_v17 }
 0x20f   :  { %v194_v18 = vpop.xlane.xlu1 %193 }
 0x210   :  { %v220_v19 = vsub.f32 %v179_v47, %v194_v18 }
 0x212   :  { %v2688_v21 = vpop.eup %2687  ;;  %v231_v22 = vmul.f32 1.442695, %v220_v19 }
 0x213   :  { %2465 = vmatmul.msk.f32.vlgmr.msra.gmra.mxu2 %vm188_vm2, %v2688_v21  ;;  %v249_v24 = vsel %vm188_vm2, %v2688_v21, 0.0  ;;  %v3157_v21 = vpack.i.bf16 %v2994_v4, %v2981_v1 }
 0x214   :  { %2689 = vpow2.f32 %v231_v22  ;;  %250 = vadd.xlane.f32.xlu1 %v249_v24 }
 0x217   :  { %v197_v26 = vpop.xlane.xlu2 %196 }
 0x218   :  { %v221_v28 = vsub.f32 %v180_v50, %v197_v26 }
 0x21a   :  { %v2690_v30 = vpop.eup %2689  ;;  %v233_v32 = vmul.f32 1.442695, %v221_v28 }
 0x21b   :  { %2466 = vmatmul.msk.f32.gmra.mxu2 %vm188_vm2, %v2690_v30  ;;  %v252_v34 = vsel %vm188_vm2, %v2690_v30, 0.0 }
 0x21c   :  { %2691 = vpow2.f32 %v233_v32  ;;  %253 = vadd.xlane.f32.xlu0 %v252_v34 }
 0x21f   :  { %v200_v36 = vpop.xlane.xlu0 %199 }
 0x220   :  { %v222_v38 = vsub.f32 %v181_v53, %v200_v36 }
 0x222   :  { %v2692_v40 = vpop.eup %2691  ;;  %v235_v42 = vmul.f32 1.442695, %v222_v38 }
 0x223   :  { %2467 = vmatmul.msk.f32.gmra.mxu2 %vm188_vm2, %v2692_v40  ;;  %v255_v43 = vsel %vm188_vm2, %v2692_v40, 0.0 }
 0x224   :  { %2693 = vpow2.f32 %v235_v42  ;;  %256 = vadd.xlane.f32.xlu2 %v255_v43 }
 0x227   :  { %v203_v44 = vpop.xlane.xlu1 %202 }
 0x228   :  { %v223_v46 = vsub.f32 %v182_v56, %v203_v44 }
 0x22a   :  { %v2694_v47 = vpop.eup %2693  ;;  %v237_v48 = vmul.f32 1.442695, %v223_v46 }
 0x22b   :  { %2468 = vmatmul.msk.f32.gmra.mxu2 %vm188_vm2, %v2694_v47  ;;  %v258_v14 = vsel %vm188_vm2, %v2694_v47, 0.0 }
 0x22c   :  { %2695 = vpow2.f32 %v237_v48 }
 0x22f   :  { %v206_v49 = vpop.xlane.xlu1 %205 }
 0x230   :  { %v224_v50 = vsub.f32 %v183_v59, %v206_v49 }
 0x232   :  { %v2696_v51 = vpop.eup %2695  ;;  %v239_v52 = vmul.f32 1.442695, %v224_v50 }
 0x233   :  { %2469 = vmatmul.msk.f32.gmra.mxu2 %vm188_vm2, %v2696_v51  ;;  %v261_v53 = vsel %vm188_vm2, %v2696_v51, 0.0 }
 0x234   :  { %2697 = vpow2.f32 %v239_v52  ;;  %262 = vadd.xlane.f32.xlu0 %v261_v53 }
 0x237   :  { %v209_v54 = vpop.xlane.xlu1 %208 }
 0x238   :  { %v225_v55 = vsub.f32 %v184_v62, %v209_v54 }
 0x23a   :  { %v2698_v57 = vpop.eup %2697  ;;  %v241_v58 = vmul.f32 1.442695, %v225_v55 }
 0x23b   :  { %2470 = vmatmul.msk.f32.gmra.mxu2 %vm188_vm2, %v2698_v57  ;;  %v264_v56 = vsel %vm188_vm2, %v2698_v57, 0.0 }
 0x23c   :  { %2699 = vpow2.f32 %v241_v58  ;;  %265 = vadd.xlane.f32.xlu2 %v264_v56 }
 0x23f   :  { %v212_v60 = vpop.xlane.xlu1 %211 }
 0x240   :  { %v226_v59 = vsub.f32 %v3118_v3, %v212_v60 }
 0x242   :  { %v2700_v61 = vpop.eup %2699  ;;  %v243_v63 = vmul.f32 1.442695, %v226_v59 }
 0x243   :  { %2471 = vmatmul.msk.f32.gmra.mxu2 %vm188_vm2, %v2700_v61  ;;  %v267_v2 = vsel %vm188_vm2, %v2700_v61, 0.0 }
 0x244   :  { %2701 = vpow2.f32 %v243_v63  ;;  %268 = vadd.xlane.f32.xlu1 %v267_v2 }
 0x247   :  { %v215_v62 = vpop.xlane.xlu1 %214 }
 0x248   :  { %v227_v6 = vsub.f32 %v3123_v9, %v215_v62 }
 0x24a   :  { %v2702_v7 = vpop.eup %2701  ;;  %v245_v11 = vmul.f32 1.442695, %v227_v6 }
 0x24b   :  { %2472 = vmatmul.msk.f32.gmra.mxu2 %vm188_vm2, %v2702_v7  ;;  %v270_v12 = vsel %vm188_vm2, %v2702_v7, 0.0 }
 0x24c   :  { %2703 = vpow2.f32 %v245_v11  ;;  %271 = vadd.xlane.f32.xlu0 %v270_v12  ;;  %259 = vadd.xlane.f32.xlu1 %v258_v14 }
 0x24f   :  { %v218_v3 = vpop.xlane.xlu2 %217 }
 0x250   :  { %v228_v15 = vsub.f32 %v3128_v13, %v218_v3 }
 0x252   :  { %v2704_v16 = vpop.eup %2703  ;;  %v247_v17 = vmul.f32 1.442695, %v228_v15 }
 0x253   :  { %2473 = vmatmul.msk.f32.gmra.mxu2 %vm188_vm2, %v2704_v16  ;;  %v273_v9 = vsel %vm188_vm2, %v2704_v16, 0.0 }
 0x254   :  { %2705 = vpow2.f32 %v247_v17  ;;  %274 = vadd.xlane.f32.xlu2 %v273_v9 }
 0x25a   :  { %v2706_v18 = vpop.eup %2705 }
 0x25b   :  { %2474 = vmatmul.msk.f32.gmra.mxu2 %vm188_vm2, %v2706_v18  ;;  %v276_v19 = vsel %vm188_vm2, %v2706_v18, 0.0 }
 0x25c   :  { %277 = vadd.xlane.f32.xlu1 %v276_v19 }
 0x260   :  { %2613 = vrot.lane.b32.xlu0 %v3157_v21, %s2931_s13 }
 0x26c   :  { %417 = vrot.lane.b32.xlu2 %v2976_v0, %s2931_s13 }
 0x274   :  { %516 = vrot.lane.b32.xlu2 %v2976_v0, %s2932_s14 }
 0x27c   :  { %558 = vrot.lane.b32.xlu2 %v2976_v0, %s2934_s15 }
 0x284   :  { %2623 = vrot.lane.b32.xlu2 %v3157_v21, %s2934_s15 }
 0x287   :  { %v251_v28 = vpop.xlane.xlu1 %250 }
 0x28f   :  { %v254_v34 = vpop.xlane.xlu0 %253 }
 0x296   :  { %v332_v13 = vpop.f32.mrf.mxu2 }
 0x297   :  { %v257_v32 = vpop.xlane.xlu2 %256 }
 0x298   :  { %2707 = vrcp.f32 %v257_v32 }
 0x299   :  { %2709 = vrcp.f32 %v251_v28 }
 0x29e   :  { %v335_v22 = vpop.f32.mrf.mxu2  ;;  %v2708_v44 = vpop.eup %2707 }
 0x29f   :  { %v2710_v47 = vpop.eup %2709 }
 0x2a0   :  { %v372_v51 = vmul.f32 %v2710_v47, %v332_v13 }
 0x2a2   :  { %v382_v60 = vmul.f32 %v372_v51, %v3025_v20 }
 0x2a4   :  { %v392_v3 = vsel %vm47_vm1, %v382_v60, 0.0 }
 0x2a6   :  { %v338_v24 = vpop.f32.mrf.mxu2 }
 0x2a7   :  { %v263_v1 = vpop.xlane.xlu0 %262  ;;  %v374_v48 = vmul.f32 %v2708_v44, %v338_v24 }
 0x2a8   :  { %2711 = vrcp.f32 %v263_v1 }
 0x2a9   :  { %v384_v55 = vmul.f32 %v374_v48, %v3040_v25 }
 0x2ab   :  { %v393_v62 = vsel %vm47_vm1, %v384_v55, 0.0  ;;  %v410_v55 = vperm.slane %v3015_v10, 1 }
 0x2ac   :  { %v394_v19 = vadd.f32 %v393_v62, %v392_v3  ;;  %v2933_v62 = vmov 20.0  }
 0x2ae   :  { %v341_v26 = vpop.f32.mrf.mxu2  ;;  %v2712_v49 = vpop.eup %2711 }
 0x2af   :  { %v266_v40 = vpop.xlane.xlu2 %265 }
 0x2b6   :  { %v344_v30 = vpop.f32.mrf.mxu2 }
 0x2b7   :  { %v269_v36 = vpop.xlane.xlu1 %268  ;;  %v376_v52 = vmul.f32 %v2712_v49, %v344_v30 }
 0x2b8   :  { %2713 = vrcp.f32 %v269_v36 }
 0x2b9   :  { %v386_v59 = vmul.f32 %v376_v52, %v3054_v29 }
 0x2bb   :  { %v395_v15 = vsel %vm47_vm1, %v386_v59, 0.0 }
 0x2bc   :  { %v396_v30 = vadd.f32 %v395_v15, %v394_v19 }
 0x2be   :  { %v347_v38 = vpop.f32.mrf.mxu2  ;;  %v2714_v50 = vpop.eup %2713 }
 0x2bf   :  { %v260_v4 = vpop.xlane.xlu1 %259  ;;  %v272_v46 = vpop.xlane.xlu0 %271 }
 0x2c0   :  { %2715 = vrcp.f32 %v260_v4 }
 0x2c1   :  { %2717 = vrcp.f32 %v254_v34 }
 0x2c2   :  { %2719 = vrcp.f32 %v266_v40 }
 0x2c3   :  { %2721 = vrcp.f32 %v272_v46 }
 0x2c6   :  { %v350_v42 = vpop.f32.mrf.mxu2  ;;  %v2716_v53 = vpop.eup %2715 }
 0x2c7   :  { %v275_v43 = vpop.xlane.xlu2 %274  ;;  %v378_v57 = vmul.f32 %v2714_v50, %v350_v42  ;;  %v2718_v56 = vpop.eup %2717  ;;  %v375_v61 = vmul.f32 %v2716_v53, %v341_v26 }
 0x2c8   :  { %2723 = vrcp.f32 %v275_v43  ;;  %v373_v63 = vmul.f32 %v2718_v56, %v335_v22  ;;  %v2720_v12 = vpop.eup %2719 }
 0x2c9   :  { %v388_v6 = vmul.f32 %v378_v57, %v3068_v33  ;;  %v2722_v14 = vpop.eup %2721  ;;  %v385_v16 = vmul.f32 %v375_v61, %v3047_v27  ;;  %v377_v22 = vmul.f32 %v2720_v12, %v347_v38 }
 0x2ca   :  { %v383_v18 = vmul.f32 %v373_v63, %v3033_v23 }
 0x2cb   :  { %v397_v24 = vsel %vm47_vm1, %v388_v6, 0.0  ;;  %v402_v32 = vsel %vm47_vm1, %v385_v16, 0.0  ;;  %v387_v1 = vmul.f32 %v377_v22, %v3061_v31 }
 0x2cc   :  { %v398_v36 = vadd.f32 %v397_v24, %v396_v30  ;;  %v401_v40 = vsel %vm47_vm1, %v383_v18, 0.0 }
 0x2cd   :  { %v403_v42 = vadd.f32 %v402_v32, %v401_v40  ;;  %v404_v47 = vsel %vm47_vm1, %v387_v1, 0.0 }
 0x2ce   :  { %v353_v54 = vpop.f32.mrf.mxu2  ;;  %v2724_v9 = vpop.eup %2723 }
 0x2cf   :  { %v418_v58 = vpop.permute.xlu2 %417  ;;  %v278_v17 = vpop.xlane.xlu1 %277  ;;  %v379_v26 = vmul.f32 %v2722_v14, %v353_v54  ;;  %v405_v50 = vadd.f32 %v404_v47, %v403_v42 }
 0x2d0   :  { %2475 = vmatpush.msk.msrb.mxu3 %vm54_vm0, %v418_v58  ;;  %2725 = vrcp.f32 %v278_v17 }
 0x2d1   :  { %v389_v4 = vmul.f32 %v379_v26, %v3075_v35  ;;  %2727 = vrcp.f32 %v2933_v62 }
 0x2d2   :  { %v2614_v2 = vpop.permute.xlu0 %2613 }
 0x2d3   :  { %v2615_v7 = vunpack.i.l.bf16 %v2614_v2  ;;  %v2616_v11 = vunpack.i.h.bf16 %v2614_v2  ;;  %v406_v48 = vsel %vm47_vm1, %v389_v4, 0.0 }
 0x2d4   :  { %v407_v52 = vadd.f32 %v406_v48, %v405_v50 }
 0x2d5   :  { %443 = vmatpush.msrb.mxu3 %v2615_v7 }
 0x2d6   :  { %v356_v13 = vpop.f32.mrf.mxu2  ;;  %v2726_v44 = vpop.eup %2725 }
 0x2d7   :  { %v380_v28 = vmul.f32 %v2724_v9, %v356_v13  ;;  %444 = vmatpush.msrb.mxu3 %v2616_v11  ;;  %v2728_v6 = vpop.eup %2727  ;;  %v517_v26 = vpop.permute.xlu2 %516 }
 0x2d8   :  { %v461_v7 = vmul.f32 20.0, %v2728_v6  ;;  %vm465_vm3 = vweird.f32 %v2728_v6  ;;  %2478 = vmatpush.msk.msra.mxu0 %vm54_vm0, %v517_v26 }
 0x2d9   :  { %v390_v34 = vmul.f32 %v380_v28, %v3082_v37 }
 0x2da   :  { %v462_v11 = vsub.f32 1.0, %v461_v7  ;;  %v511_v7 = vperm.slane %v3015_v10, 4 }
 0x2db   :  { %v399_v38 = vsel %vm47_vm1, %v390_v34, 0.0 }
 0x2dc   :  { %v400_v43 = vadd.f32 %v399_v38, %v398_v36 }
 0x2de   :  { %v359_v46 = vpop.f32.mrf.mxu2  ;;  %2476 = vmatmul.msk.f32.vlgmr.msrb.gmra.mxu3 %vm47_vm1, %v400_v43 }
 0x2df   :  { %v381_v49 = vmul.f32 %v2726_v44, %v359_v46  ;;  %v559_v38 = vpop.permute.xlu2 %558 }
 0x2e0   :  { %2481 = vmatpush.msk.msra.mxu3 %vm54_vm0, %v559_v38 }
 0x2e1   :  { %v391_v51 = vmul.f32 %v381_v49, %v3089_v39 }
 0x2e3   :  { %v408_v53 = vsel %vm47_vm1, %v391_v51, 0.0 }
 0x2e4   :  { %v409_v54 = vadd.f32 %v408_v53, %v407_v52  ;;  %v505_v52 = vperm.slane %v3015_v10, 2 }
 0x2e6   :  { %2477 = vmatmul.msk.f32.gmra.mxu3 %vm47_vm1, %v409_v54 }
 0x361   :  { %v446_v57 = vpop.f32.mrf.mxu3 }
 0x362   :  { %v447_v58 = vadd.f32 %v446_v57, %v410_v55 }
 0x364   :  { %v452_v56 = vadd.f32 %v447_v58, %v2996_v5  ;;  %v463_v5 = vmul.f32 %v2728_v6, %v462_v11 }
 0x366   :  { %v454_v60 = vsel %vm47_vm1, %v452_v56, 0.0  ;;  %v464_v12 = vadd.f32 %v2728_v6, %v463_v5 }
 0x367   :  { %455 = vadd.xlane.f32.xlu1 %v454_v60 }
 0x368   :  { %v3193_v14 = vsel %vm465_vm3, %v2728_v6, %v464_v12 }
 0x369   :  { %v449_v59 = vpop.f32.mrf.mxu3 }
 0x36a   :  { %v450_v61 = vadd.f32 %v449_v59, %v410_v55  ;;  %v508_v55 = vperm.slane %v3015_v10, 3 }
 0x36c   :  { %v453_v63 = vadd.f32 %v450_v61, %v3008_v8 }
 0x36e   :  { %v457_v2 = vsel %vm47_vm1, %v453_v63, 0.0 }
 0x36f   :  { %458 = vadd.xlane.f32.xlu1 %v457_v2  ;;  %v2624_v2 = vpop.permute.xlu2 %2623 }
 0x370   :  { %v2626_v62 = vunpack.i.h.bf16 %v2624_v2  ;;  %v2625_v6 = vunpack.i.l.bf16 %v2624_v2  ;;  %v642_v2 = vperm.slane %v3015_v10, 7 }
 0x372   :  { %584 = vmatpush.msra.mxu3 %v2625_v6 }
 0x374   :  { %585 = vmatpush.msra.mxu3 %v2626_v62 }
 0x3da   :  { %v456_v3 = vpop.xlane.xlu1 %455 }
 0x3db   :  { %v467_v15 = vmul.f32 %v3193_v14, %v456_v3 }
 0x3dd   :  { %v469_v16 = vsub.f32 %v452_v56, %v467_v15 }
 0x3df   :  { %v471_v17 = vmul.f32 %v469_v16, %v469_v16 }
 0x3e1   :  { %v473_v8 = vsel %vm47_vm1, %v471_v17, 0.0  ;;  %v553_v17 = vperm.slane %v3015_v10, 5 }
 0x3e2   :  { %474 = vadd.xlane.f32.xlu0 %v473_v8  ;;  %v459_v9 = vpop.xlane.xlu1 %458 }
 0x3e3   :  { %v468_v18 = vmul.f32 %v3193_v14, %v459_v9 }
 0x3e5   :  { %v470_v19 = vsub.f32 %v453_v63, %v468_v18 }
 0x3e7   :  { %v472_v13 = vmul.f32 %v470_v19, %v470_v19 }
 0x3e9   :  { %v476_v22 = vsel %vm47_vm1, %v472_v13, 0.0 }
 0x3ea   :  { %477 = vadd.xlane.f32.xlu1 %v476_v22 }
 0x403   :  { %2618 = vrot.lane.b32.xlu1 %v3157_v21, %s2932_s14 }
 0x455   :  { %v475_v24 = vpop.xlane.xlu0 %474 }
 0x456   :  { %v479_v28 = vmul.f32 %v475_v24, %v3193_v14 }
 0x458   :  { %v481_v30 = vadd.f32 1e-05, %v479_v28 }
 0x45a   :  { %2729 = vrsqrt.f32 %v481_v30  ;;  %vm489_vm5 = vweird.f32 %v481_v30 }
 0x45d   :  { %v478_v32 = vpop.xlane.xlu1 %477 }
 0x45e   :  { %v480_v34 = vmul.f32 %v478_v32, %v3193_v14 }
 0x460   :  { %v2730_v36 = vpop.eup %2729  ;;  %v482_v40 = vadd.f32 1e-05, %v480_v34 }
 0x461   :  { %v484_v1 = vmul.f32 %v2730_v36, %v481_v30  ;;  %vm490_vm4 = vweird.f32 %v2730_v36 }
 0x462   :  { %2731 = vrsqrt.f32 %v482_v40  ;;  %vm491_vm6 = vmor %vm489_vm5, %vm490_vm4  ;;  %vm499_vm8 = vweird.f32 %v482_v40 }
 0x463   :  { %v485_v4 = vmul.f32 %v2730_v36, %v484_v1 }
 0x465   :  { %v486_v0 = vmul.f32 0.5, %v485_v4 }
 0x467   :  { %v487_v42 = vsub.f32 1.5, %v486_v0 }
 0x468   :  { %v2732_v43 = vpop.eup %2731 }
 0x469   :  { %v494_v44 = vmul.f32 %v2732_v43, %v482_v40  ;;  %v488_v46 = vmul.f32 %v2730_v36, %v487_v42  ;;  %vm500_vm7 = vweird.f32 %v2732_v43  ;;  %v3226_v42 = vld [vmem:[%s3898_s4 + $0x28] sm:$0xf] }
 0x46a   :  { %vm501_vm9 = vmor %vm499_vm8, %vm500_vm7 }
 0x46b   :  { %v495_v47 = vmul.f32 %v2732_v43, %v494_v44  ;;  %v492_v49 = vsel %vm491_vm6, %v2730_v36, %v488_v46  ;;  %v3239_v44 = vld [vmem:[%s3898_s4 + $0x18] sm:$0xff] }
 0x46c   :  { %v503_v51 = vmul.f32 %v492_v49, %v469_v16 }
 0x46d   :  { %v496_v48 = vmul.f32 0.5, %v495_v47 }
 0x46e   :  { %v506_v21 = vmul.f32 %v505_v52, %v503_v51 }
 0x46f   :  { %v497_v50 = vsub.f32 1.5, %v496_v48 }
 0x470   :  { %v509_v60 = vadd.f32 %v508_v55, %v506_v21 }
 0x471   :  { %v498_v53 = vmul.f32 %v2732_v43, %v497_v50 }
 0x473   :  { %v502_v57 = vsel %vm501_vm9, %v2732_v43, %v498_v53  ;;  %v3233_v43 = vld [vmem:[%s3898_s4 + $0x20] sm:$0xff] }
 0x474   :  { %v504_v59 = vmul.f32 %v502_v57, %v470_v19 }
 0x475   :  { %v2619_v54 = vpop.permute.xlu1 %2618 }
 0x476   :  { %v2620_v58 = vunpack.i.l.bf16 %v2619_v54  ;;  %v2621_v56 = vunpack.i.h.bf16 %v2619_v54  ;;  %v507_v61 = vmul.f32 %v505_v52, %v504_v59 }
 0x478   :  { %542 = vmatpush.msra.mxu0 %v2620_v58  ;;  %v510_v63 = vadd.f32 %v508_v55, %v507_v61 }
 0x47a   :  { %543 = vmatpush.msra.mxu0 %v2621_v56 }
 0x47b   :  { %2479 = vmatmul.msk.f32.vlgmr.msra.gmra.mxu0 %vm47_vm1, %v509_v60 }
 0x47c   :  { %2488 = vmatpush.msk.msrb.mxu0 %vm54_vm0, %v3226_v42 }
 0x47e   :  { %675 = vmatpush.msrb.mxu0 %v3233_v43 }
 0x480   :  { %676 = vmatpush.msrb.mxu0 %v3239_v44 }
 0x483   :  { %2480 = vmatmul.msk.f32.gmra.mxu0 %vm47_vm1, %v510_v63 }
 0x4f8   :  { %v545_v11 = vpop.f32.mrf.mxu0 }
 0x4f9   :  { %v546_v5 = vadd.f32 %v545_v11, %v511_v7 }
 0x4fb   :  { %v551_v12 = vmax.f32 %v546_v5, 0.0 }
 0x4fd   :  { %2482 = vmatmul.msk.f32.vlgmr.msra.gmra.mxu3 %vm47_vm1, %v551_v12 }
 0x500   :  { %v548_v3 = vpop.f32.mrf.mxu0 }
 0x501   :  { %v549_v15 = vadd.f32 %v548_v3, %v511_v7 }
 0x503   :  { %v552_v16 = vmax.f32 %v549_v15, 0.0 }
 0x505   :  { %2483 = vmatmul.msk.f32.gmra.mxu3 %vm47_vm1, %v552_v16 }
 0x580   :  { %v587_v8 = vpop.f32.mrf.mxu3 }
 0x581   :  { %v588_v9 = vadd.f32 %v587_v8, %v553_v17 }
 0x583   :  { %v593_v18 = vadd.f32 %v588_v9, %v509_v60  ;;  %v639_v60 = vperm.slane %v3015_v10, 6  ;;  %v3257_v10 = vld [vmem:[%s3899_s5 + $0x8] sm:$0xff] }
 0x585   :  { %v595_v19 = vsel %vm47_vm1, %v593_v18, 0.0 }
 0x586   :  { %596 = vadd.xlane.f32.xlu2 %v595_v19 }
 0x588   :  { %v590_v13 = vpop.f32.mrf.mxu3 }
 0x589   :  { %v591_v22 = vadd.f32 %v590_v13, %v553_v17  ;;  %v651_v17 = vperm.slane %v3257_v10, 0 }
 0x58b   :  { %v594_v24 = vadd.f32 %v591_v22, %v510_v63 }
 0x58d   :  { %v598_v26 = vsel %vm47_vm1, %v594_v24, 0.0 }
 0x58e   :  { %599 = vadd.xlane.f32.xlu1 %v598_v26 }
 0x5f9   :  { %v597_v28 = vpop.xlane.xlu2 %596 }
 0x5fa   :  { %v601_v30 = vmul.f32 %v597_v28, %v3193_v14 }
 0x5fc   :  { %v603_v32 = vsub.f32 %v593_v18, %v601_v30 }
 0x5fe   :  { %v605_v34 = vmul.f32 %v603_v32, %v603_v32 }
 0x600   :  { %v607_v36 = vsel %vm47_vm1, %v605_v34, 0.0 }
 0x601   :  { %v600_v40 = vpop.xlane.xlu1 %599  ;;  %608 = vadd.xlane.f32.xlu0 %v607_v36 }
 0x602   :  { %v602_v1 = vmul.f32 %v600_v40, %v3193_v14 }
 0x604   :  { %v604_v4 = vsub.f32 %v594_v24, %v602_v1 }
 0x606   :  { %v606_v38 = vmul.f32 %v604_v4, %v604_v4 }
 0x608   :  { %v610_v0 = vsel %vm47_vm1, %v606_v38, 0.0 }
 0x609   :  { %611 = vadd.xlane.f32.xlu0 %v610_v0 }
 0x674   :  { %v609_v46 = vpop.xlane.xlu0 %608 }
 0x675   :  { %v613_v47 = vmul.f32 %v609_v46, %v3193_v14 }
 0x677   :  { %v615_v48 = vadd.f32 1e-05, %v613_v47 }
 0x679   :  { %2733 = vrsqrt.f32 %v615_v48  ;;  %vm623_vm11 = vweird.f32 %v615_v48 }
 0x67c   :  { %v612_v49 = vpop.xlane.xlu0 %611 }
 0x67d   :  { %v614_v50 = vmul.f32 %v612_v49, %v3193_v14 }
 0x67f   :  { %v2734_v51 = vpop.eup %2733  ;;  %v616_v52 = vadd.f32 1e-05, %v614_v50 }
 0x680   :  { %v618_v53 = vmul.f32 %v2734_v51, %v615_v48  ;;  %vm624_vm10 = vweird.f32 %v2734_v51 }
 0x681   :  { %2735 = vrsqrt.f32 %v616_v52  ;;  %vm625_vm12 = vmor %vm623_vm11, %vm624_vm10  ;;  %vm633_vm14 = vweird.f32 %v616_v52 }
 0x682   :  { %v619_v54 = vmul.f32 %v2734_v51, %v618_v53 }
 0x684   :  { %v620_v21 = vmul.f32 0.5, %v619_v54 }
 0x686   :  { %v621_v55 = vsub.f32 1.5, %v620_v21 }
 0x687   :  { %v2736_v57 = vpop.eup %2735 }
 0x688   :  { %v622_v58 = vmul.f32 %v2734_v51, %v621_v55  ;;  %v628_v56 = vmul.f32 %v2736_v57, %v616_v52  ;;  %vm634_vm13 = vweird.f32 %v2736_v57 }
 0x689   :  { %vm635_vm15 = vmor %vm633_vm14, %vm634_vm13 }
 0x68a   :  { %v626_v59 = vsel %vm625_vm12, %v2734_v51, %v622_v58  ;;  %v629_v61 = vmul.f32 %v2736_v57, %v628_v56 }
 0x68b   :  { %v637_v63 = vmul.f32 %v626_v59, %v603_v32 }
 0x68c   :  { %v630_v62 = vmul.f32 0.5, %v629_v61 }
 0x68d   :  { %v640_v6 = vmul.f32 %v639_v60, %v637_v63 }
 0x68e   :  { %v631_v7 = vsub.f32 1.5, %v630_v62 }
 0x68f   :  { %v3246_v11 = vadd.f32 %v642_v2, %v640_v6 }
 0x690   :  { %v632_v5 = vmul.f32 %v2736_v57, %v631_v7 }
 0x691   :  { %2489 = vmatmul.msk.f32.vlgmr.msrb.gmra.mxu0 %vm47_vm1, %v3246_v11 }
 0x692   :  { %v636_v12 = vsel %vm635_vm15, %v2736_v57, %v632_v5 }
 0x693   :  { %v638_v3 = vmul.f32 %v636_v12, %v604_v4 }
 0x695   :  { %v641_v15 = vmul.f32 %v639_v60, %v638_v3 }
 0x697   :  { %v3250_v16 = vadd.f32 %v642_v2, %v641_v15 }
 0x699   :  { %2490 = vmatmul.msk.f32.gmra.mxu0 %vm47_vm1, %v3250_v16 }
 0x70e   :  { %v678_v8 = vpop.f32.mrf.mxu0 }
 0x70f   :  { %v679_v9 = vadd.f32 %v678_v8, %v651_v17 }
 0x711   :  { %696 = vrot.lane.b32.xlu2 %v679_v9, %s2929_s0  ;;  %v684_v26 = vmul.f32 %v679_v9, %v3025_v20  ;;  %v686_v30 = vmul.f32 %v679_v9, %v3040_v25  ;;  %v688_v34 = vmul.f32 %v679_v9, %v3054_v29 }
 0x716   :  { %v681_v18 = vpop.f32.mrf.mxu0 }
 0x717   :  { %v682_v19 = vadd.f32 %v681_v18, %v651_v17 }
 0x719   :  { %698 = vrot.lane.b32.xlu0 %v682_v19, %s2929_s0  ;;  %v2627_v13 = vpack.i.bf16 %v679_v9, %v682_v19  ;;  %v685_v28 = vmul.f32 %v682_v19, %v3033_v23  ;;  %v687_v32 = vmul.f32 %v682_v19, %v3047_v27  ;;  %v689_v20 = vmul.f32 %v682_v19, %v3061_v31 }
 0x71a   :  { %v690_v23 = vmul.f32 %v679_v9, %v3068_v33  ;;  %v691_v25 = vmul.f32 %v682_v19, %v3075_v35  ;;  %v692_v27 = vmul.f32 %v679_v9, %v3082_v37  ;;  %v693_v29 = vmul.f32 %v682_v19, %v3089_v39 }
 0x76b   :  { %v697_v24 = vpop.permute.xlu2 %696 }
 0x78b   :  { %v699_v22 = vpop.permute.xlu0 %698 }
 0x78c   :  { %2491 = vmatpush.xpose.msk.msrb.mxu3 %vm47_vm1, %v699_v22 }
 0x790   :  { %2492 = vmatpush.xpose.msk.msrb.mxu3 %vm47_vm1, %v697_v24 }
 0x793   :  { %2493 = vmatmul.msk.f32.vlgmr.msrb.gmra.mxu3 %vm47_vm1, %v684_v26 }
 0x79b   :  { %2494 = vmatmul.msk.f32.gmra.mxu3 %vm47_vm1, %v685_v28 }
 0x7a3   :  { %2495 = vmatmul.msk.f32.gmra.mxu3 %vm47_vm1, %v686_v30 }
 0x7ab   :  { %2496 = vmatmul.msk.f32.gmra.mxu3 %vm47_vm1, %v687_v32 }
 0x7b3   :  { %2497 = vmatmul.msk.f32.gmra.mxu3 %vm47_vm1, %v688_v34 }
 0x7bb   :  { %2498 = vmatmul.msk.f32.gmra.mxu3 %vm47_vm1, %v689_v20 }
 0x7c3   :  { %2499 = vmatmul.msk.f32.gmra.mxu3 %vm47_vm1, %v690_v23 }
 0x7cb   :  { %2500 = vmatmul.msk.f32.gmra.mxu3 %vm47_vm1, %v691_v25 }
 0x7d3   :  { %2501 = vmatmul.msk.f32.gmra.mxu3 %vm47_vm1, %v692_v27 }
 0x7db   :  { %2502 = vmatmul.msk.f32.gmra.mxu3 %vm47_vm1, %v693_v29 }
 0x816   :  { %v751_v36 = vpop.f32.mrf.mxu3 }
 0x817   :  { %v781_v31 = vadd.f32 %v751_v36, %v3096_v41 }
 0x819   :  { %v791_v40 = vsel %vm188_vm2, %v781_v31, -inf }
 0x81a   :  { %792 = vmax.xlane.f32.xlu1 %v791_v40 }
 0x81e   :  { %v754_v33 = vpop.f32.mrf.mxu3 }
 0x81f   :  { %v782_v1 = vadd.f32 %v754_v33, %v3103_v45 }
 0x821   :  { %v794_v35 = vsel %vm188_vm2, %v782_v1, -inf }
 0x822   :  { %795 = vmax.xlane.f32.xlu0 %v794_v35 }
 0x826   :  { %v757_v4 = vpop.f32.mrf.mxu3 }
 0x827   :  { %v783_v37 = vadd.f32 %v757_v4, %v3096_v41 }
 0x829   :  { %v797_v38 = vsel %vm188_vm2, %v783_v37, -inf }
 0x82a   :  { %798 = vmax.xlane.f32.xlu2 %v797_v38 }
 0x82e   :  { %v760_v39 = vpop.f32.mrf.mxu3 }
 0x82f   :  { %v3306_v56 = vadd.f32 %v760_v39, %v3103_v45 }
 0x831   :  { %v800_v59 = vsel %vm188_vm2, %v3306_v56, -inf }
 0x833   :  { %2628 = vrot.lane.b32.xlu1 %v2627_v13, %s2930_s1 }
 0x836   :  { %v763_v0 = vpop.f32.mrf.mxu3 }
 0x837   :  { %v785_v46 = vadd.f32 %v763_v0, %v3096_v41 }
 0x839   :  { %v803_v47 = vsel %vm188_vm2, %v785_v46, -inf }
 0x83a   :  { %804 = vmax.xlane.f32.xlu0 %v803_v47 }
 0x83e   :  { %v766_v48 = vpop.f32.mrf.mxu3 }
 0x83f   :  { %v786_v49 = vadd.f32 %v766_v48, %v3103_v45 }
 0x841   :  { %v806_v50 = vsel %vm188_vm2, %v786_v49, -inf }
 0x842   :  { %807 = vmax.xlane.f32.xlu0 %v806_v50 }
 0x846   :  { %v769_v51 = vpop.f32.mrf.mxu3 }
 0x847   :  { %v787_v52 = vadd.f32 %v769_v51, %v3096_v41 }
 0x849   :  { %v809_v53 = vsel %vm188_vm2, %v787_v52, -inf }
 0x84a   :  { %810 = vmax.xlane.f32.xlu2 %v809_v53 }
 0x84e   :  { %v772_v54 = vpop.f32.mrf.mxu3 }
 0x84f   :  { %v3298_v21 = vadd.f32 %v772_v54, %v3103_v45 }
 0x851   :  { %v812_v55 = vsel %vm188_vm2, %v3298_v21, -inf }
 0x852   :  { %813 = vmax.xlane.f32.xlu0 %v812_v55 }
 0x856   :  { %v775_v57 = vpop.f32.mrf.mxu3 }
 0x857   :  { %v3303_v58 = vadd.f32 %v775_v57, %v3096_v41 }
 0x859   :  { %v815_v60 = vsel %vm188_vm2, %v3303_v58, -inf }
 0x85a   :  { %816 = vmax.xlane.f32.xlu2 %v815_v60 }
 0x85d   :  { %801 = vmax.xlane.f32.xlu1 %v800_v59  ;;  %v3341_v59 = vpack.i.bf16 %v3239_v44, %v3233_v43 }
 0x85e   :  { %v778_v61 = vpop.f32.mrf.mxu3 }
 0x85f   :  { %v3313_v63 = vadd.f32 %v778_v61, %v3103_v45 }
 0x861   :  { %v818_v2 = vsel %vm188_vm2, %v3313_v63, -inf }
 0x862   :  { %819 = vmax.xlane.f32.xlu0 %v818_v2 }
 0x88d   :  { %v793_v41 = vpop.xlane.xlu1 %792 }
 0x88e   :  { %v821_v62 = vsub.f32 %v781_v31, %v793_v41 }
 0x890   :  { %v831_v6 = vmul.f32 1.442695, %v821_v62 }
 0x892   :  { %2737 = vpow2.f32 %v831_v6 }
 0x895   :  { %v796_v7 = vpop.xlane.xlu0 %795 }
 0x896   :  { %v822_v5 = vsub.f32 %v782_v1, %v796_v7 }
 0x898   :  { %v2738_v12 = vpop.eup %2737  ;;  %v833_v3 = vmul.f32 1.442695, %v822_v5 }
 0x899   :  { %v851_v15 = vsel %vm188_vm2, %v2738_v12, 0.0 }
 0x89a   :  { %2739 = vpow2.f32 %v833_v3  ;;  %852 = vadd.xlane.f32.xlu2 %v851_v15 }
 0x89d   :  { %v799_v17 = vpop.xlane.xlu2 %798 }
 0x89e   :  { %v823_v8 = vsub.f32 %v783_v37, %v799_v17 }
 0x8a0   :  { %v2740_v45 = vpop.eup %2739  ;;  %v835_v9 = vmul.f32 1.442695, %v823_v8 }
 0x8a1   :  { %v854_v18 = vsel %vm188_vm2, %v2740_v45, 0.0 }
 0x8a2   :  { %2741 = vpow2.f32 %v835_v9  ;;  %855 = vadd.xlane.f32.xlu1 %v854_v18 }
 0x8a5   :  { %v2629_v19 = vpop.permute.xlu1 %2628 }
 0x8a6   :  { %v2630_v13 = vunpack.i.l.bf16 %v2629_v19  ;;  %v2631_v24 = vunpack.i.h.bf16 %v2629_v19 }
 0x8a8   :  { %v2742_v22 = vpop.eup %2741  ;;  %931 = vmatpush.msra.mxu0 %v2630_v13 }
 0x8a9   :  { %v857_v26 = vsel %vm188_vm2, %v2742_v22, 0.0 }
 0x8aa   :  { %932 = vmatpush.msra.mxu0 %v2631_v24  ;;  %858 = vadd.xlane.f32.xlu0 %v857_v26 }
 0x8ab   :  { %2503 = vmatmul.msk.f32.vlgmr.msra.gmra.mxu0 %vm188_vm2, %v2738_v12 }
 0x8ad   :  { %v805_v28 = vpop.xlane.xlu0 %804 }
 0x8ae   :  { %v825_v30 = vsub.f32 %v785_v46, %v805_v28 }
 0x8b0   :  { %v839_v32 = vmul.f32 1.442695, %v825_v30 }
 0x8b2   :  { %2743 = vpow2.f32 %v839_v32 }
 0x8b3   :  { %2504 = vmatmul.msk.f32.gmra.mxu0 %vm188_vm2, %v2740_v45 }
 0x8b5   :  { %v808_v34 = vpop.xlane.xlu0 %807 }
 0x8b6   :  { %v826_v20 = vsub.f32 %v786_v49, %v808_v34 }
 0x8b8   :  { %v2744_v23 = vpop.eup %2743  ;;  %v841_v25 = vmul.f32 1.442695, %v826_v20  ;;  %v3357_v20 = vld [vmem:[%s3897_s3 + $0x10] sm:$0xff] }
 0x8b9   :  { %v863_v27 = vsel %vm188_vm2, %v2744_v23, 0.0 }
 0x8ba   :  { %2745 = vpow2.f32 %v841_v25  ;;  %864 = vadd.xlane.f32.xlu1 %v863_v27  ;;  %v3363_v27 = vld [vmem:[%s3897_s3] sm:$0xff] }
 0x8bb   :  { %2505 = vmatmul.msk.f32.gmra.mxu0 %vm188_vm2, %v2742_v22 }
 0x8bd   :  { %v811_v29 = vpop.xlane.xlu2 %810 }
 0x8be   :  { %v827_v36 = vsub.f32 %v787_v52, %v811_v29 }
 0x8c0   :  { %v2746_v31 = vpop.eup %2745  ;;  %v843_v40 = vmul.f32 1.442695, %v827_v36  ;;  %v3369_v36 = vld [vmem:[%s3897_s3 + $0x20] sm:$0xff] }
 0x8c1   :  { %v866_v33 = vsel %vm188_vm2, %v2746_v31, 0.0 }
 0x8c2   :  { %2747 = vpow2.f32 %v843_v40  ;;  %867 = vadd.xlane.f32.xlu0 %v866_v33 }
 0x8c5   :  { %v814_v1 = vpop.xlane.xlu0 %813 }
 0x8c6   :  { %v828_v35 = vsub.f32 %v3298_v21, %v814_v1 }
 0x8c8   :  { %v2748_v4 = vpop.eup %2747  ;;  %v845_v37 = vmul.f32 1.442695, %v828_v35 }
 0x8c9   :  { %v869_v38 = vsel %vm188_vm2, %v2748_v4, 0.0 }
 0x8ca   :  { %2749 = vpow2.f32 %v845_v37  ;;  %870 = vadd.xlane.f32.xlu2 %v869_v38 }
 0x8cd   :  { %v817_v39 = vpop.xlane.xlu2 %816 }
 0x8ce   :  { %v829_v0 = vsub.f32 %v3303_v58, %v817_v39 }
 0x8d0   :  { %v2750_v46 = vpop.eup %2749  ;;  %v847_v47 = vmul.f32 1.442695, %v829_v0  ;;  %v802_v48 = vpop.xlane.xlu1 %801 }
 0x8d1   :  { %v824_v49 = vsub.f32 %v3306_v56, %v802_v48  ;;  %v872_v50 = vsel %vm188_vm2, %v2750_v46, 0.0 }
 0x8d2   :  { %2751 = vpow2.f32 %v847_v47  ;;  %873 = vadd.xlane.f32.xlu1 %v872_v50 }
 0x8d3   :  { %v837_v51 = vmul.f32 1.442695, %v824_v49 }
 0x8d5   :  { %2753 = vpow2.f32 %v837_v51  ;;  %v820_v52 = vpop.xlane.xlu0 %819 }
 0x8d6   :  { %v830_v53 = vsub.f32 %v3313_v63, %v820_v52 }
 0x8d8   :  { %v2752_v54 = vpop.eup %2751  ;;  %v849_v21 = vmul.f32 1.442695, %v830_v53  ;;  %v3384_v53 = vld [vmem:[%s3897_s3 + $0x18] sm:$0xff] }
 0x8d9   :  { %v875_v55 = vsel %vm188_vm2, %v2752_v54, 0.0 }
 0x8da   :  { %876 = vadd.xlane.f32.xlu0 %v875_v55  ;;  %2755 = vpow2.f32 %v849_v21 }
 0x8db   :  { %v2754_v57 = vpop.eup %2753 }
 0x8dc   :  { %2506 = vmatmul.msk.f32.gmra.mxu0 %vm188_vm2, %v2754_v57  ;;  %v860_v58 = vsel %vm188_vm2, %v2754_v57, 0.0 }
 0x8dd   :  { %861 = vadd.xlane.f32.xlu2 %v860_v58 }
 0x8e0   :  { %v2756_v56 = vpop.eup %2755 }
 0x8e1   :  { %v878_v60 = vsel %vm188_vm2, %v2756_v56, 0.0 }
 0x8e4   :  { %2507 = vmatmul.msk.f32.gmra.mxu0 %vm188_vm2, %v2744_v23 }
 0x8e5   :  { %879 = vadd.xlane.f32.xlu2 %v878_v60 }
 0x8eb   :  { %2633 = vrot.lane.b32.xlu1 %v3341_v59, %s2931_s13 }
 0x8ec   :  { %2508 = vmatmul.msk.f32.gmra.mxu0 %vm188_vm2, %v2746_v31 }
 0x8ee   :  { %1019 = vrot.lane.b32.xlu0 %v3226_v42, %s2931_s13 }
 0x8f3   :  { %1111 = vrot.lane.b32.xlu1 %v3226_v42, %s2932_s14 }
 0x8f4   :  { %2509 = vmatmul.msk.f32.gmra.mxu0 %vm188_vm2, %v2748_v4  ;;  %v3376_v4 = vld [vmem:[%s3897_s3 + $0x30] sm:$0xff] }
 0x8fb   :  { %1153 = vrot.lane.b32.xlu1 %v3226_v42, %s2934_s15 }
 0x8fc   :  { %2510 = vmatmul.msk.f32.gmra.mxu0 %vm188_vm2, %v2750_v46 }
 0x903   :  { %2643 = vrot.lane.b32.xlu1 %v3341_v59, %s2934_s15 }
 0x904   :  { %2511 = vmatmul.msk.f32.gmra.mxu0 %vm188_vm2, %v2752_v54 }
 0x90c   :  { %2512 = vmatmul.msk.f32.gmra.mxu0 %vm188_vm2, %v2756_v56  ;;  %v3391_v56 = vld [vmem:[%s3897_s3 + $0x8] sm:$0xff] }
 0x90d   :  { %v853_v17 = vpop.xlane.xlu2 %852 }
 0x915   :  { %v856_v63 = vpop.xlane.xlu1 %855 }
 0x91d   :  { %v859_v44 = vpop.xlane.xlu0 %858 }
 0x91e   :  { %2757 = vrcp.f32 %v859_v44  ;;  %v3403_v44 = vld [vmem:[%s3897_s3 + $0x40] sm:$0xff] }
 0x91f   :  { %2759 = vrcp.f32 %v853_v17 }
 0x924   :  { %v2758_v13 = vpop.eup %2757 }
 0x925   :  { %v2760_v22 = vpop.eup %2759 }
 0x928   :  { %v934_v61 = vpop.f32.mrf.mxu0 }
 0x929   :  { %v974_v28 = vmul.f32 %v2760_v22, %v934_v61  ;;  %v3397_v61 = vld [vmem:[%s3897_s3 + $0x28] sm:$0xff] }
 0x92b   :  { %v984_v29 = vmul.f32 %v3363_v27, %v974_v28 }
 0x92d   :  { %v865_v62 = vpop.xlane.xlu1 %864  ;;  %v994_v0 = vsel %vm47_vm1, %v984_v29, 0.0 }
 0x92e   :  { %2761 = vrcp.f32 %v865_v62  ;;  %v3410_v62 = vld [vmem:[%s3897_s3 + $0x38] sm:$0xff] }
 0x930   :  { %v937_v43 = vpop.f32.mrf.mxu0 }
 0x934   :  { %v2762_v26 = vpop.eup %2761 }
 0x935   :  { %v868_v2 = vpop.xlane.xlu0 %867 }
 0x938   :  { %v940_v41 = vpop.f32.mrf.mxu0 }
 0x939   :  { %v976_v24 = vmul.f32 %v2758_v13, %v940_v41 }
 0x93b   :  { %v986_v23 = vmul.f32 %v3357_v20, %v976_v24 }
 0x93d   :  { %v871_v9 = vpop.xlane.xlu2 %870  ;;  %v995_v1 = vsel %vm47_vm1, %v986_v23, 0.0 }
 0x93e   :  { %2763 = vrcp.f32 %v871_v9  ;;  %v996_v51 = vadd.f32 %v995_v1, %v994_v0 }
 0x944   :  { %v2764_v32 = vpop.eup %2763 }
 0x945   :  { %v874_v5 = vpop.xlane.xlu1 %873 }
 0x94d   :  { %v877_v6 = vpop.xlane.xlu0 %876 }
 0x950   :  { %v862_v19 = vpop.xlane.xlu2 %861 }
 0x951   :  { %2765 = vrcp.f32 %v862_v19 }
 0x952   :  { %2767 = vrcp.f32 %v856_v63 }
 0x953   :  { %2769 = vrcp.f32 %v868_v2 }
 0x954   :  { %2771 = vrcp.f32 %v874_v5 }
 0x955   :  { %2773 = vrcp.f32 %v877_v6 }
 0x957   :  { %v2766_v40 = vpop.eup %2765 }
 0x958   :  { %v2768_v33 = vpop.eup %2767  ;;  %v880_v47 = vpop.xlane.xlu2 %879 }
 0x959   :  { %v943_v7 = vpop.f32.mrf.mxu0  ;;  %v2770_v38 = vpop.eup %2769  ;;  %v975_v46 = vmul.f32 %v2768_v33, %v937_v43  ;;  %2775 = vrcp.f32 %v880_v47 }
 0x95a   :  { %v977_v35 = vmul.f32 %v2766_v40, %v943_v7  ;;  %v2772_v39 = vpop.eup %2771 }
 0x95b   :  { %v2774_v50 = vpop.eup %2773  ;;  %v985_v60 = vmul.f32 %v3391_v56, %v975_v46 }
 0x95c   :  { %v987_v54 = vmul.f32 %v3384_v53, %v977_v35 }
 0x95d   :  { %v2634_v15 = vpop.permute.xlu1 %2633 }
 0x95e   :  { %v2635_v42 = vunpack.i.l.bf16 %v2634_v15  ;;  %v2636_v8 = vunpack.i.h.bf16 %v2634_v15  ;;  %v1004_v41 = vsel %vm47_vm1, %v987_v54, 0.0 }
 0x95f   :  { %v2776_v15 = vpop.eup %2775 }
 0x960   :  { %v1020_v12 = vpop.permute.xlu0 %1019 }
 0x961   :  { %v946_v3 = vpop.f32.mrf.mxu0  ;;  %2513 = vmatpush.msk.msrb.mxu2 %vm54_vm0, %v1020_v12  ;;  %v1003_v12 = vsel %vm47_vm1, %v985_v60, 0.0 }
 0x962   :  { %v978_v30 = vmul.f32 %v2762_v26, %v946_v3  ;;  %v1012_v26 = vperm.slane %v3257_v10, 1 }
 0x963   :  { %1045 = vmatpush.msrb.mxu2 %v2635_v42  ;;  %v1005_v42 = vadd.f32 %v1004_v41, %v1003_v12 }
 0x964   :  { %v988_v31 = vmul.f32 %v3369_v36, %v978_v30 }
 0x965   :  { %1046 = vmatpush.msrb.mxu2 %v2636_v8 }
 0x966   :  { %v997_v48 = vsel %vm47_vm1, %v988_v31, 0.0 }
 0x967   :  { %v998_v58 = vadd.f32 %v997_v48, %v996_v51 }
 0x969   :  { %v949_v45 = vpop.f32.mrf.mxu0 }
 0x96a   :  { %v979_v49 = vmul.f32 %v2770_v38, %v949_v45 }
 0x96c   :  { %v989_v43 = vmul.f32 %v3397_v61, %v979_v49 }
 0x96e   :  { %v1006_v3 = vsel %vm47_vm1, %v989_v43, 0.0 }
 0x96f   :  { %v1007_v9 = vadd.f32 %v1006_v3, %v1005_v42 }
 0x971   :  { %v952_v18 = vpop.f32.mrf.mxu0 }
 0x972   :  { %v980_v25 = vmul.f32 %v2764_v32, %v952_v18  ;;  %v3421_v18 = vld [vmem:[%s3897_s3 + $0x48] sm:$0xff] }
 0x974   :  { %v990_v37 = vmul.f32 %v3376_v4, %v980_v25 }
 0x976   :  { %v999_v21 = vsel %vm47_vm1, %v990_v37, 0.0 }
 0x977   :  { %v1000_v2 = vadd.f32 %v999_v21, %v998_v58 }
 0x979   :  { %v955_v34 = vpop.f32.mrf.mxu0 }
 0x97a   :  { %v981_v55 = vmul.f32 %v2772_v39, %v955_v34 }
 0x97c   :  { %v991_v6 = vmul.f32 %v3410_v62, %v981_v55 }
 0x97e   :  { %v1008_v8 = vsel %vm47_vm1, %v991_v6, 0.0 }
 0x97f   :  { %v1009_v13 = vadd.f32 %v1008_v8, %v1007_v9 }
 0x981   :  { %v958_v52 = vpop.f32.mrf.mxu0 }
 0x982   :  { %v982_v57 = vmul.f32 %v2774_v50, %v958_v52 }
 0x984   :  { %v992_v63 = vmul.f32 %v3403_v44, %v982_v57 }
 0x986   :  { %v1001_v7 = vsel %vm47_vm1, %v992_v63, 0.0 }
 0x987   :  { %v1002_v5 = vadd.f32 %v1001_v7, %v1000_v2  ;;  %v1100_v7 = vperm.slane %v3257_v10, 2 }
 0x989   :  { %v961_v17 = vpop.f32.mrf.mxu0  ;;  %2514 = vmatmul.msk.f32.vlgmr.msrb.gmra.mxu2 %vm47_vm1, %v1002_v5 }
 0x98a   :  { %v983_v45 = vmul.f32 %v2776_v15, %v961_v17  ;;  %v1103_v15 = vperm.slane %v3257_v10, 3 }
 0x98c   :  { %v993_v19 = vmul.f32 %v3421_v18, %v983_v45 }
 0x98e   :  { %v1010_v22 = vsel %vm47_vm1, %v993_v19, 0.0 }
 0x98f   :  { %v1011_v24 = vadd.f32 %v1010_v22, %v1009_v13 }
 0x991   :  { %2515 = vmatmul.msk.f32.gmra.mxu2 %vm47_vm1, %v1011_v24 }
 0xa0c   :  { %v1048_v28 = vpop.f32.mrf.mxu2 }
 0xa0d   :  { %v1049_v30 = vadd.f32 %v1048_v28, %v1012_v26 }
 0xa0f   :  { %v1054_v32 = vadd.f32 %v1049_v30, %v3246_v11  ;;  %v1112_v11 = vpop.permute.xlu1 %1111 }
 0xa10   :  { %2516 = vmatpush.msk.msrb.mxu1 %vm54_vm0, %v1112_v11 }
 0xa11   :  { %v1056_v34 = vsel %vm47_vm1, %v1054_v32, 0.0 }
 0xa12   :  { %1057 = vadd.xlane.f32.xlu2 %v1056_v34 }
 0xa14   :  { %v1051_v23 = vpop.f32.mrf.mxu2 }
 0xa15   :  { %v1052_v25 = vadd.f32 %v1051_v23, %v1012_v26 }
 0xa17   :  { %v1055_v29 = vadd.f32 %v1052_v25, %v3250_v16  ;;  %v1154_v50 = vpop.permute.xlu1 %1153 }
 0xa18   :  { %2519 = vmatpush.msk.msra.mxu2 %vm54_vm0, %v1154_v50 }
 0xa19   :  { %v1059_v31 = vsel %vm47_vm1, %v1055_v29, 0.0 }
 0xa1a   :  { %1060 = vadd.xlane.f32.xlu2 %v1059_v31 }
 0xa1f   :  { %v2644_v26 = vpop.permute.xlu1 %2643 }
 0xa20   :  { %v2646_v28 = vunpack.i.h.bf16 %v2644_v26  ;;  %v2645_v30 = vunpack.i.l.bf16 %v2644_v26 }
 0xa22   :  { %1179 = vmatpush.msra.mxu2 %v2645_v30 }
 0xa24   :  { %1180 = vmatpush.msra.mxu2 %v2646_v28 }
 0xa85   :  { %v1058_v40 = vpop.xlane.xlu2 %1057 }
 0xa86   :  { %v1062_v33 = vmul.f32 %v1058_v40, %v3193_v14 }
 0xa88   :  { %v1064_v1 = vsub.f32 %v1054_v32, %v1062_v33  ;;  %v1106_v32 = vperm.slane %v3257_v10, 4  ;;  %v1148_v33 = vperm.slane %v3257_v10, 5 }
 0xa8a   :  { %v1066_v35 = vmul.f32 %v1064_v1, %v1064_v1 }
 0xa8c   :  { %v1068_v37 = vsel %vm47_vm1, %v1066_v35, 0.0 }
 0xa8d   :  { %1069 = vadd.xlane.f32.xlu0 %v1068_v37  ;;  %v1061_v38 = vpop.xlane.xlu2 %1060 }
 0xa8e   :  { %v1063_v39 = vmul.f32 %v1061_v38, %v3193_v14 }
 0xa90   :  { %v1065_v0 = vsub.f32 %v1055_v29, %v1063_v39 }
 0xa92   :  { %v1067_v46 = vmul.f32 %v1065_v0, %v1065_v0 }
 0xa94   :  { %v1071_v16 = vsel %vm47_vm1, %v1067_v46, 0.0 }
 0xa95   :  { %1072 = vadd.xlane.f32.xlu2 %v1071_v16 }
 0xaad   :  { %2638 = vrot.lane.b32.xlu2 %v3341_v59, %s2932_s14 }
 0xb00   :  { %v1070_v47 = vpop.xlane.xlu0 %1069 }
 0xb01   :  { %v1074_v48 = vmul.f32 %v1070_v47, %v3193_v14 }
 0xb03   :  { %v1076_v49 = vadd.f32 1e-05, %v1074_v48 }
 0xb05   :  { %2777 = vrsqrt.f32 %v1076_v49  ;;  %vm1084_vm4 = vweird.f32 %v1076_v49 }
 0xb08   :  { %v1073_v51 = vpop.xlane.xlu2 %1072 }
 0xb09   :  { %v1075_v52 = vmul.f32 %v1073_v51, %v3193_v14 }
 0xb0b   :  { %v2778_v54 = vpop.eup %2777  ;;  %v1077_v21 = vadd.f32 1e-05, %v1075_v52 }
 0xb0c   :  { %v1079_v55 = vmul.f32 %v2778_v54, %v1076_v49  ;;  %vm1085_vm3 = vweird.f32 %v2778_v54 }
 0xb0d   :  { %2779 = vrsqrt.f32 %v1077_v21  ;;  %vm1086_vm5 = vmor %vm1084_vm4, %vm1085_vm3  ;;  %vm1094_vm7 = vweird.f32 %v1077_v21 }
 0xb0e   :  { %v1080_v57 = vmul.f32 %v2778_v54, %v1079_v55 }
 0xb10   :  { %v1081_v58 = vmul.f32 0.5, %v1080_v57  ;;  %v2639_v60 = vpop.permute.xlu2 %2638  ;;  %v3460_v57 = vld [vmem:[%s3898_s4 + $0x40] sm:$0xf] }
 0xb11   :  { %v2640_v43 = vunpack.i.l.bf16 %v2639_v60  ;;  %v2641_v63 = vunpack.i.h.bf16 %v2639_v60  ;;  %v3473_v60 = vld [vmem:[%s3898_s4 + $0x30] sm:$0xff] }
 0xb12   :  { %v1082_v59 = vsub.f32 1.5, %v1081_v58  ;;  %v3467_v58 = vld [vmem:[%s3898_s4 + $0x38] sm:$0xff] }
 0xb13   :  { %v2780_v2 = vpop.eup %2779  ;;  %1137 = vmatpush.msrb.mxu1 %v2640_v43 }
 0xb14   :  { %v1083_v41 = vmul.f32 %v2778_v54, %v1082_v59  ;;  %v1089_v6 = vmul.f32 %v2780_v2, %v1077_v21  ;;  %vm1095_vm6 = vweird.f32 %v2780_v2 }
 0xb15   :  { %1138 = vmatpush.msrb.mxu1 %v2641_v63  ;;  %vm1096_vm8 = vmor %vm1094_vm7, %vm1095_vm6 }
 0xb16   :  { %v1087_v5 = vsel %vm1086_vm5, %v2778_v54, %v1083_v41  ;;  %v1090_v12 = vmul.f32 %v2780_v2, %v1089_v6 }
 0xb17   :  { %v1098_v3 = vmul.f32 %v1087_v5, %v1064_v1  ;;  %2526 = vmatpush.msk.msra.mxu1 %vm54_vm0, %v3460_v57 }
 0xb18   :  { %v1091_v42 = vmul.f32 0.5, %v1090_v12 }
 0xb19   :  { %v1101_v17 = vmul.f32 %v1100_v7, %v1098_v3  ;;  %1270 = vmatpush.msra.mxu1 %v3467_v58 }
 0xb1a   :  { %v1092_v8 = vsub.f32 1.5, %v1091_v42 }
 0xb1b   :  { %v1104_v45 = vadd.f32 %v1103_v15, %v1101_v17  ;;  %1271 = vmatpush.msra.mxu1 %v3473_v60 }
 0xb1c   :  { %v1093_v9 = vmul.f32 %v2780_v2, %v1092_v8 }
 0xb1d   :  { %2517 = vmatmul.msk.f32.vlgmr.msrb.gmra.mxu1 %vm47_vm1, %v1104_v45 }
 0xb1e   :  { %v1097_v19 = vsel %vm1096_vm8, %v2780_v2, %v1093_v9 }
 0xb1f   :  { %v1099_v13 = vmul.f32 %v1097_v19, %v1065_v0 }
 0xb21   :  { %v1102_v22 = vmul.f32 %v1100_v7, %v1099_v13 }
 0xb23   :  { %v1105_v24 = vadd.f32 %v1103_v15, %v1102_v22  ;;  %v1237_v22 = vperm.slane %v3257_v10, 7 }
 0xb25   :  { %2518 = vmatmul.msk.f32.gmra.mxu1 %vm47_vm1, %v1105_v24 }
 0xb9a   :  { %v1140_v34 = vpop.f32.mrf.mxu1 }
 0xb9b   :  { %v1141_v23 = vadd.f32 %v1140_v34, %v1106_v32 }
 0xb9d   :  { %v1146_v25 = vmax.f32 %v1141_v23, 0.0 }
 0xb9f   :  { %2520 = vmatmul.msk.f32.vlgmr.msra.gmra.mxu2 %vm47_vm1, %v1146_v25 }
 0xba2   :  { %v1143_v29 = vpop.f32.mrf.mxu1 }
 0xba3   :  { %v1144_v31 = vadd.f32 %v1143_v29, %v1106_v32 }
 0xba5   :  { %v1147_v40 = vmax.f32 %v1144_v31, 0.0 }
 0xba7   :  { %2521 = vmatmul.msk.f32.gmra.mxu2 %vm47_vm1, %v1147_v40 }
 0xc22   :  { %v1182_v1 = vpop.f32.mrf.mxu2 }
 0xc23   :  { %v1183_v35 = vadd.f32 %v1182_v1, %v1148_v33 }
 0xc25   :  { %v1188_v37 = vadd.f32 %v1183_v35, %v1104_v45  ;;  %v1234_v45 = vperm.slane %v3257_v10, 6  ;;  %v3491_v10 = vld [vmem:[%s3899_s5 + $0x10] sm:$0xff] }
 0xc26   :  { %v1246_v31 = vperm.slane %v3491_v10, 0 }
 0xc27   :  { %v1190_v38 = vsel %vm47_vm1, %v1188_v37, 0.0 }
 0xc28   :  { %1191 = vadd.xlane.f32.xlu1 %v1190_v38 }
 0xc2a   :  { %v1185_v11 = vpop.f32.mrf.mxu2 }
 0xc2b   :  { %v1186_v39 = vadd.f32 %v1185_v11, %v1148_v33 }
 0xc2d   :  { %v1189_v0 = vadd.f32 %v1186_v39, %v1105_v24 }
 0xc2f   :  { %v1193_v46 = vsel %vm47_vm1, %v1189_v0, 0.0 }
 0xc30   :  { %1194 = vadd.xlane.f32.xlu2 %v1193_v46 }
 0xc9b   :  { %v1192_v16 = vpop.xlane.xlu1 %1191 }
 0xc9c   :  { %v1196_v47 = vmul.f32 %v1192_v16, %v3193_v14 }
 0xc9e   :  { %v1198_v48 = vsub.f32 %v1188_v37, %v1196_v47 }
 0xca0   :  { %v1200_v49 = vmul.f32 %v1198_v48, %v1198_v48 }
 0xca2   :  { %v1202_v50 = vsel %vm47_vm1, %v1200_v49, 0.0 }
 0xca3   :  { %v1195_v51 = vpop.xlane.xlu2 %1194  ;;  %1203 = vadd.xlane.f32.xlu0 %v1202_v50 }
 0xca4   :  { %v1197_v52 = vmul.f32 %v1195_v51, %v3193_v14 }
 0xca6   :  { %v1199_v54 = vsub.f32 %v1189_v0, %v1197_v52 }
 0xca8   :  { %v1201_v21 = vmul.f32 %v1199_v54, %v1199_v54 }
 0xcaa   :  { %v1205_v55 = vsel %vm47_vm1, %v1201_v21, 0.0  ;;  %v3521_v21 = vld [vmem:[%s3896_s2] sm:$0xff] }
 0xcab   :  { %1206 = vadd.xlane.f32.xlu0 %v1205_v55 }
 0xd16   :  { %v1204_v43 = vpop.xlane.xlu0 %1203 }
 0xd17   :  { %v1208_v63 = vmul.f32 %v1204_v43, %v3193_v14 }
 0xd19   :  { %v1210_v59 = vadd.f32 1e-05, %v1208_v63 }
 0xd1b   :  { %2781 = vrsqrt.f32 %v1210_v59  ;;  %vm1218_vm10 = vweird.f32 %v1210_v59 }
 0xd1e   :  { %v1207_v2 = vpop.xlane.xlu0 %1206 }
 0xd1f   :  { %v1209_v41 = vmul.f32 %v1207_v2, %v3193_v14 }
 0xd21   :  { %v2782_v6 = vpop.eup %2781  ;;  %v1211_v7 = vadd.f32 1e-05, %v1209_v41 }
 0xd22   :  { %v1213_v5 = vmul.f32 %v2782_v6, %v1210_v59  ;;  %vm1219_vm9 = vweird.f32 %v2782_v6  ;;  %v3528_v59 = vld [vmem:[%s3896_s2 + $0x8] sm:$0xff] }
 0xd23   :  { %2783 = vrsqrt.f32 %v1211_v7  ;;  %vm1220_vm11 = vmor %vm1218_vm10, %vm1219_vm9  ;;  %vm1228_vm13 = vweird.f32 %v1211_v7 }
 0xd24   :  { %v1214_v12 = vmul.f32 %v2782_v6, %v1213_v5 }
 0xd26   :  { %v1215_v3 = vmul.f32 0.5, %v1214_v12 }
 0xd28   :  { %v1216_v15 = vsub.f32 1.5, %v1215_v3 }
 0xd29   :  { %v2784_v42 = vpop.eup %2783 }
 0xd2a   :  { %v1217_v17 = vmul.f32 %v2782_v6, %v1216_v15  ;;  %v1223_v8 = vmul.f32 %v2784_v42, %v1211_v7  ;;  %vm1229_vm12 = vweird.f32 %v2784_v42 }
 0xd2b   :  { %vm1230_vm14 = vmor %vm1228_vm13, %vm1229_vm12 }
 0xd2c   :  { %v1221_v9 = vsel %vm1220_vm11, %v2782_v6, %v1217_v17  ;;  %v1224_v19 = vmul.f32 %v2784_v42, %v1223_v8 }
 0xd2d   :  { %v1232_v13 = vmul.f32 %v1221_v9, %v1198_v48 }
 0xd2e   :  { %v1225_v24 = vmul.f32 0.5, %v1224_v19 }
 0xd2f   :  { %v1235_v26 = vmul.f32 %v1234_v45, %v1232_v13 }
 0xd30   :  { %v1226_v28 = vsub.f32 1.5, %v1225_v24 }
 0xd31   :  { %v3480_v30 = vadd.f32 %v1237_v22, %v1235_v26 }
 0xd32   :  { %v1227_v32 = vmul.f32 %v2784_v42, %v1226_v28 }
 0xd33   :  { %2527 = vmatmul.msk.f32.vlgmr.msra.gmra.mxu1 %vm47_vm1, %v3480_v30 }
 0xd34   :  { %v1231_v34 = vsel %vm1230_vm14, %v2784_v42, %v1227_v32 }
 0xd35   :  { %v1233_v23 = vmul.f32 %v1231_v34, %v1199_v54 }
 0xd37   :  { %v1236_v25 = vmul.f32 %v1234_v45, %v1233_v23 }
 0xd39   :  { %v3484_v29 = vadd.f32 %v1237_v22, %v1236_v25 }
 0xd3b   :  { %2528 = vmatmul.msk.f32.gmra.mxu1 %vm47_vm1, %v3484_v29 }
 0xdb0   :  { %v1273_v40 = vpop.f32.mrf.mxu1 }
 0xdb1   :  { %v1274_v33 = vadd.f32 %v1273_v40, %v1246_v31 }
 0xdb3   :  { %1291 = vrot.lane.b32.xlu1 %v1274_v33, %s2929_s0  ;;  %v1279_v39 = vmul.f32 %v3363_v27, %v1274_v33  ;;  %v1281_v46 = vmul.f32 %v3357_v20, %v1274_v33  ;;  %v1283_v47 = vmul.f32 %v3369_v36, %v1274_v33  ;;  %v1285_v49 = vmul.f32 %v3376_v4, %v1274_v33 }
 0xdb4   :  { %v1287_v51 = vmul.f32 %v3403_v44, %v1274_v33 }
 0xdb8   :  { %v1276_v1 = vpop.f32.mrf.mxu1 }
 0xdb9   :  { %v1277_v35 = vadd.f32 %v1276_v1, %v1246_v31 }
 0xdbb   :  { %1293 = vrot.lane.b32.xlu0 %v1277_v35, %s2929_s0  ;;  %v2647_v37 = vpack.i.bf16 %v1274_v33, %v1277_v35  ;;  %v1280_v0 = vmul.f32 %v3391_v56, %v1277_v35  ;;  %v1282_v16 = vmul.f32 %v3384_v53, %v1277_v35  ;;  %v1284_v48 = vmul.f32 %v3397_v61, %v1277_v35 }
 0xdbc   :  { %v1286_v50 = vmul.f32 %v3410_v62, %v1277_v35  ;;  %v1288_v52 = vmul.f32 %v3421_v18, %v1277_v35 }
 0xe25   :  { %v1292_v11 = vpop.permute.xlu1 %1291 }
 0xe2d   :  { %v1294_v38 = vpop.permute.xlu0 %1293 }
 0xe2e   :  { %2529 = vmatpush.xpose.msk.msrb.mxu2 %vm47_vm1, %v1294_v38 }
 0xe32   :  { %2530 = vmatpush.xpose.msk.msrb.mxu2 %vm47_vm1, %v1292_v11 }
 0xe35   :  { %2531 = vmatmul.msk.f32.vlgmr.msrb.gmra.mxu2 %vm47_vm1, %v1279_v39 }
 0xe3d   :  { %2532 = vmatmul.msk.f32.gmra.mxu2 %vm47_vm1, %v1280_v0 }
 0xe45   :  { %2533 = vmatmul.msk.f32.gmra.mxu2 %vm47_vm1, %v1281_v46 }
 0xe4d   :  { %2534 = vmatmul.msk.f32.gmra.mxu2 %vm47_vm1, %v1282_v16 }
 0xe55   :  { %2535 = vmatmul.msk.f32.gmra.mxu2 %vm47_vm1, %v1283_v47 }
 0xe5d   :  { %2536 = vmatmul.msk.f32.gmra.mxu2 %vm47_vm1, %v1284_v48 }
 0xe65   :  { %2537 = vmatmul.msk.f32.gmra.mxu2 %vm47_vm1, %v1285_v49 }
 0xe6d   :  { %2538 = vmatmul.msk.f32.gmra.mxu2 %vm47_vm1, %v1286_v50 }
 0xe75   :  { %2539 = vmatmul.msk.f32.gmra.mxu2 %vm47_vm1, %v1287_v51 }
 0xe7d   :  { %2540 = vmatmul.msk.f32.gmra.mxu2 %vm47_vm1, %v1288_v52 }
 0xeb8   :  { %v1346_v54 = vpop.f32.mrf.mxu2 }
 0xeb9   :  { %v1376_v55 = vadd.f32 %v3521_v21, %v1346_v54 }
 0xebb   :  { %v1386_v43 = vsel %vm188_vm2, %v1376_v55, -inf }
 0xebc   :  { %1387 = vmax.xlane.f32.xlu2 %v1386_v43 }
 0xec0   :  { %v1349_v63 = vpop.f32.mrf.mxu2 }
 0xec1   :  { %v1377_v2 = vadd.f32 %v3528_v59, %v1349_v63 }
 0xec3   :  { %v1389_v41 = vsel %vm188_vm2, %v1377_v2, -inf }
 0xec4   :  { %1390 = vmax.xlane.f32.xlu0 %v1389_v41 }
 0xec8   :  { %v1352_v6 = vpop.f32.mrf.mxu2 }
 0xec9   :  { %v1378_v7 = vadd.f32 %v3521_v21, %v1352_v6 }
 0xecb   :  { %v1392_v5 = vsel %vm188_vm2, %v1378_v7, -inf }
 0xecc   :  { %1393 = vmax.xlane.f32.xlu1 %v1392_v5 }
 0xed0   :  { %v1355_v12 = vpop.f32.mrf.mxu2 }
 0xed1   :  { %v3547_v28 = vadd.f32 %v3528_v59, %v1355_v12 }
 0xed3   :  { %v1395_v25 = vsel %vm188_vm2, %v3547_v28, -inf }
 0xed4   :  { %2648 = vrot.lane.b32.xlu2 %v2647_v37, %s2930_s1 }
 0xed8   :  { %v1358_v3 = vpop.f32.mrf.mxu2 }
 0xed9   :  { %v1380_v15 = vadd.f32 %v3521_v21, %v1358_v3 }
 0xedb   :  { %v1398_v42 = vsel %vm188_vm2, %v1380_v15, -inf }
 0xedc   :  { %1399 = vmax.xlane.f32.xlu0 %v1398_v42 }
 0xee0   :  { %v1361_v17 = vpop.f32.mrf.mxu2 }
 0xee1   :  { %v1381_v8 = vadd.f32 %v3528_v59, %v1361_v17 }
 0xee3   :  { %v1401_v45 = vsel %vm188_vm2, %v1381_v8, -inf }
 0xee4   :  { %1402 = vmax.xlane.f32.xlu0 %v1401_v45 }
 0xee8   :  { %v1364_v9 = vpop.f32.mrf.mxu2 }
 0xee9   :  { %v1382_v19 = vadd.f32 %v3521_v21, %v1364_v9 }
 0xeeb   :  { %v1404_v13 = vsel %vm188_vm2, %v1382_v19, -inf }
 0xeec   :  { %1405 = vmax.xlane.f32.xlu0 %v1404_v13 }
 0xef0   :  { %v1367_v22 = vpop.f32.mrf.mxu2 }
 0xef1   :  { %v3542_v24 = vadd.f32 %v3528_v59, %v1367_v22 }
 0xef3   :  { %v1407_v26 = vsel %vm188_vm2, %v3542_v24, -inf }
 0xef4   :  { %1408 = vmax.xlane.f32.xlu1 %v1407_v26 }
 0xef8   :  { %v1370_v32 = vpop.f32.mrf.mxu2 }
 0xef9   :  { %v3550_v34 = vadd.f32 %v3521_v21, %v1370_v32 }
 0xefb   :  { %v1410_v23 = vsel %vm188_vm2, %v3550_v34, -inf }
 0xefc   :  { %1411 = vmax.xlane.f32.xlu0 %v1410_v23 }
 0xefd   :  { %1396 = vmax.xlane.f32.xlu2 %v1395_v25 }
 0xf00   :  { %v1373_v31 = vpop.f32.mrf.mxu2 }
 0xf01   :  { %v3557_v40 = vadd.f32 %v3528_v59, %v1373_v31 }
 0xf03   :  { %v1413_v33 = vsel %vm188_vm2, %v3557_v40, -inf }
 0xf04   :  { %1414 = vmax.xlane.f32.xlu1 %v1413_v33 }
 0xf2f   :  { %v1388_v1 = vpop.xlane.xlu2 %1387 }
 0xf30   :  { %v1416_v35 = vsub.f32 %v1376_v55, %v1388_v1 }
 0xf32   :  { %v1426_v37 = vmul.f32 1.442695, %v1416_v35 }
 0xf34   :  { %2785 = vpow2.f32 %v1426_v37 }
 0xf37   :  { %v2649_v38 = vpop.permute.xlu2 %2648  ;;  %v1391_v11 = vpop.xlane.xlu0 %1390 }
 0xf38   :  { %v2650_v39 = vunpack.i.l.bf16 %v2649_v38  ;;  %v1417_v0 = vsub.f32 %v1377_v2, %v1391_v11  ;;  %v2651_v16 = vunpack.i.h.bf16 %v2649_v38 }
 0xf3a   :  { %v2786_v46 = vpop.eup %2785  ;;  %v1428_v47 = vmul.f32 1.442695, %v1417_v0  ;;  %1526 = vmatpush.msra.mxu3 %v2650_v39 }
 0xf3b   :  { %v1446_v48 = vsel %vm188_vm2, %v2786_v46, 0.0 }
 0xf3c   :  { %2787 = vpow2.f32 %v1428_v47  ;;  %1527 = vmatpush.msra.mxu3 %v2651_v16  ;;  %1447 = vadd.xlane.f32.xlu2 %v1446_v48 }
 0xf3d   :  { %2541 = vmatmul.msk.f32.vlgmr.msra.gmra.mxu3 %vm188_vm2, %v2786_v46 }
 0xf3f   :  { %v1394_v49 = vpop.xlane.xlu1 %1393 }
 0xf40   :  { %v1418_v50 = vsub.f32 %v1378_v7, %v1394_v49 }
 0xf42   :  { %v2788_v51 = vpop.eup %2787  ;;  %v1430_v52 = vmul.f32 1.442695, %v1418_v50 }
 0xf43   :  { %v1449_v54 = vsel %vm188_vm2, %v2788_v51, 0.0 }
 0xf44   :  { %2789 = vpow2.f32 %v1430_v52  ;;  %1450 = vadd.xlane.f32.xlu1 %v1449_v54 }
 0xf45   :  { %2542 = vmatmul.msk.f32.gmra.mxu3 %vm188_vm2, %v2788_v51 }
 0xf4a   :  { %v2790_v55 = vpop.eup %2789 }
 0xf4b   :  { %v1452_v43 = vsel %vm188_vm2, %v2790_v55, 0.0 }
 0xf4c   :  { %1453 = vadd.xlane.f32.xlu0 %v1452_v43 }
 0xf4d   :  { %2543 = vmatmul.msk.f32.gmra.mxu3 %vm188_vm2, %v2790_v55 }
 0xf4f   :  { %v1400_v63 = vpop.xlane.xlu0 %1399 }
 0xf50   :  { %v1420_v2 = vsub.f32 %v1380_v15, %v1400_v63 }
 0xf52   :  { %v1434_v41 = vmul.f32 1.442695, %v1420_v2 }
 0xf54   :  { %2791 = vpow2.f32 %v1434_v41 }
 0xf57   :  { %v1403_v6 = vpop.xlane.xlu0 %1402 }
 0xf58   :  { %v1421_v7 = vsub.f32 %v1381_v8, %v1403_v6 }
 0xf5a   :  { %v2792_v5 = vpop.eup %2791  ;;  %v1436_v12 = vmul.f32 1.442695, %v1421_v7 }
 0xf5b   :  { %v1458_v3 = vsel %vm188_vm2, %v2792_v5, 0.0 }
 0xf5c   :  { %2793 = vpow2.f32 %v1436_v12  ;;  %1459 = vadd.xlane.f32.xlu1 %v1458_v3 }
 0xf5f   :  { %v1406_v42 = vpop.xlane.xlu0 %1405 }
 0xf60   :  { %v1422_v17 = vsub.f32 %v1382_v19, %v1406_v42 }
 0xf62   :  { %v2794_v45 = vpop.eup %2793  ;;  %v1438_v9 = vmul.f32 1.442695, %v1422_v17 }
 0xf63   :  { %v1461_v13 = vsel %vm188_vm2, %v2794_v45, 0.0 }
 0xf64   :  { %2795 = vpow2.f32 %v1438_v9  ;;  %1462 = vadd.xlane.f32.xlu0 %v1461_v13 }
 0xf67   :  { %v1409_v22 = vpop.xlane.xlu1 %1408 }
 0xf68   :  { %v1423_v15 = vsub.f32 %v3542_v24, %v1409_v22 }
 0xf6a   :  { %v2796_v26 = vpop.eup %2795  ;;  %v1440_v32 = vmul.f32 1.442695, %v1423_v15 }
 0xf6b   :  { %v1464_v8 = vsel %vm188_vm2, %v2796_v26, 0.0 }
 0xf6c   :  { %2797 = vpow2.f32 %v1440_v32  ;;  %1465 = vadd.xlane.f32.xlu2 %v1464_v8 }
 0xf6f   :  { %v1412_v23 = vpop.xlane.xlu0 %1411 }
 0xf70   :  { %v1424_v25 = vsub.f32 %v3550_v34, %v1412_v23  ;;  %v1397_v31 = vpop.xlane.xlu2 %1396 }
 0xf71   :  { %v1419_v19 = vsub.f32 %v3547_v28, %v1397_v31 }
 0xf72   :  { %v2798_v33 = vpop.eup %2797  ;;  %v1442_v1 = vmul.f32 1.442695, %v1424_v25 }
 0xf73   :  { %v1432_v35 = vmul.f32 1.442695, %v1419_v19  ;;  %v1467_v37 = vsel %vm188_vm2, %v2798_v33, 0.0 }
 0xf74   :  { %2799 = vpow2.f32 %v1442_v1  ;;  %1468 = vadd.xlane.f32.xlu1 %v1467_v37 }
 0xf75   :  { %2801 = vpow2.f32 %v1432_v35 }
 0xf77   :  { %v1415_v24 = vpop.xlane.xlu1 %1414 }
 0xf78   :  { %v1425_v38 = vsub.f32 %v3557_v40, %v1415_v24  ;;  %v3585_v40 = vpack.i.bf16 %v3473_v60, %v3467_v58 }
 0xf7a   :  { %v2800_v11 = vpop.eup %2799  ;;  %v1444_v39 = vmul.f32 1.442695, %v1425_v38 }
 0xf7b   :  { %v2802_v0 = vpop.eup %2801  ;;  %v1470_v46 = vsel %vm188_vm2, %v2800_v11, 0.0 }
 0xf7c   :  { %2803 = vpow2.f32 %v1444_v39  ;;  %2544 = vmatmul.msk.f32.gmra.mxu3 %vm188_vm2, %v2802_v0  ;;  %1471 = vadd.xlane.f32.xlu0 %v1470_v46  ;;  %v1455_v28 = vsel %vm188_vm2, %v2802_v0, 0.0 }
 0xf7d   :  { %1456 = vadd.xlane.f32.xlu2 %v1455_v28 }
 0xf82   :  { %v2804_v34 = vpop.eup %2803 }
 0xf83   :  { %v1473_v16 = vsel %vm188_vm2, %v2804_v34, 0.0 }
 0xf84   :  { %2545 = vmatmul.msk.f32.gmra.mxu3 %vm188_vm2, %v2792_v5 }
 0xf85   :  { %1474 = vadd.xlane.f32.xlu2 %v1473_v16 }
 0xf8c   :  { %2546 = vmatmul.msk.f32.gmra.mxu3 %vm188_vm2, %v2794_v45 }
 0xf8d   :  { %2653 = vrot.lane.b32.xlu1 %v3585_v40, %s2931_s13 }
 0xf90   :  { %1614 = vrot.lane.b32.xlu0 %v3460_v57, %s2931_s13 }
 0xf94   :  { %2547 = vmatmul.msk.f32.gmra.mxu3 %vm188_vm2, %v2796_v26 }
 0xf95   :  { %1706 = vrot.lane.b32.xlu1 %v3460_v57, %s2932_s14 }
 0xf9c   :  { %2548 = vmatmul.msk.f32.gmra.mxu3 %vm188_vm2, %v2798_v33 }
 0xf9d   :  { %1748 = vrot.lane.b32.xlu1 %v3460_v57, %s2934_s15 }
 0xfa4   :  { %2549 = vmatmul.msk.f32.gmra.mxu3 %vm188_vm2, %v2800_v11 }
 0xfa5   :  { %2663 = vrot.lane.b32.xlu1 %v3585_v40, %s2934_s15 }
 0xfac   :  { %2550 = vmatmul.msk.f32.gmra.mxu3 %vm188_vm2, %v2804_v34 }
 0xfaf   :  { %v1448_v57 = vpop.xlane.xlu2 %1447 }
 0xfb7   :  { %v1451_v60 = vpop.xlane.xlu1 %1450 }
 0xfbf   :  { %v1454_v48 = vpop.xlane.xlu0 %1453 }
 0xfc0   :  { %v1529_v47 = vpop.f32.mrf.mxu3  ;;  %2805 = vrcp.f32 %v1454_v48 }
 0xfc1   :  { %2807 = vrcp.f32 %v1448_v57 }
 0xfc6   :  { %v2806_v42 = vpop.eup %2805 }
 0xfc7   :  { %v2808_v17 = vpop.eup %2807 }
 0xfc8   :  { %v1532_v58 = vpop.f32.mrf.mxu3  ;;  %v1569_v13 = vmul.f32 %v2808_v17, %v1529_v47 }
 0xfca   :  { %v1579_v23 = vmul.f32 %v3363_v27, %v1569_v13 }
 0xfcc   :  { %v1589_v38 = vsel %vm47_vm1, %v1579_v23, 0.0 }
 0xfcf   :  { %v1460_v50 = vpop.xlane.xlu1 %1459 }
 0xfd0   :  { %v1535_v49 = vpop.f32.mrf.mxu3  ;;  %2809 = vrcp.f32 %v1460_v50 }
 0xfd1   :  { %v1571_v45 = vmul.f32 %v2806_v42, %v1535_v49 }
 0xfd3   :  { %v1581_v32 = vmul.f32 %v3357_v20, %v1571_v45 }
 0xfd5   :  { %v1590_v33 = vsel %vm47_vm1, %v1581_v32, 0.0 }
 0xfd6   :  { %v2810_v9 = vpop.eup %2809  ;;  %v1591_v27 = vadd.f32 %v1590_v33, %v1589_v38 }
 0xfd7   :  { %v1463_v51 = vpop.xlane.xlu0 %1462 }
 0xfdf   :  { %v1466_v5 = vpop.xlane.xlu2 %1465 }
 0xfe0   :  { %2811 = vrcp.f32 %v1466_v5 }
 0xfe6   :  { %v2812_v15 = vpop.eup %2811 }
 0xfe7   :  { %v1469_v54 = vpop.xlane.xlu1 %1468 }
 0xfef   :  { %v1472_v55 = vpop.xlane.xlu0 %1471 }
 0xff0   :  { %v1457_v3 = vpop.xlane.xlu2 %1456 }
 0xff1   :  { %2813 = vrcp.f32 %v1457_v3 }
 0xff2   :  { %2815 = vrcp.f32 %v1451_v60 }
 0xff3   :  { %2817 = vrcp.f32 %v1463_v51 }
 0xff4   :  { %2819 = vrcp.f32 %v1469_v54 }
 0xff5   :  { %2821 = vrcp.f32 %v1472_v55 }
 0xff7   :  { %v2814_v31 = vpop.eup %2813 }
 0xff8   :  { %v2816_v19 = vpop.eup %2815  ;;  %v1475_v20 = vpop.xlane.xlu2 %1474 }
 0xff9   :  { %v2818_v37 = vpop.eup %2817  ;;  %v1570_v11 = vmul.f32 %v2816_v19, %v1532_v58  ;;  %2823 = vrcp.f32 %v1475_v20 }
 0xffa   :  { %v2820_v24 = vpop.eup %2819 }
 0xffb   :  { %v2822_v46 = vpop.eup %2821  ;;  %v1580_v60 = vmul.f32 %v3391_v56, %v1570_v11 }
 0xffd   :  { %v1598_v54 = vsel %vm47_vm1, %v1580_v60, 0.0 }
 0xfff   :  { %v1538_v52 = vpop.f32.mrf.mxu3  ;;  %v2654_v2 = vpop.permute.xlu1 %2653 }
0x1000   :  { %v2655_v41 = vunpack.i.l.bf16 %v2654_v2  ;;  %v2656_v6 = vunpack.i.h.bf16 %v2654_v2  ;;  %v1572_v1 = vmul.f32 %v2814_v31, %v1538_v52 }
0x1002   :  { %v1615_v63 = vpop.permute.xlu0 %1614 }
0x1003   :  { %2551 = vmatpush.msk.msrb.mxu1 %vm54_vm0, %v1615_v63 }
0x1005   :  { %1640 = vmatpush.msrb.mxu1 %v2655_v41 }
0x1007   :  { %v1541_v43 = vpop.f32.mrf.mxu3  ;;  %1641 = vmatpush.msrb.mxu1 %v2656_v6 }
0x1008   :  { %v1573_v22 = vmul.f32 %v2810_v9, %v1541_v43  ;;  %v2824_v43 = vpop.eup %2823 }
0x100a   :  { %v1583_v25 = vmul.f32 %v3369_v36, %v1573_v22  ;;  %v1582_v36 = vmul.f32 %v3384_v53, %v1572_v1  ;;  %v1707_v22 = vpop.permute.xlu1 %1706 }
0x100b   :  { %2554 = vmatpush.msk.msrb.mxu0 %vm54_vm0, %v1707_v22 }
0x100c   :  { %v1592_v39 = vsel %vm47_vm1, %v1583_v25, 0.0  ;;  %v1599_v50 = vsel %vm47_vm1, %v1582_v36, 0.0 }
0x100d   :  { %v1600_v63 = vadd.f32 %v1599_v50, %v1598_v54 }
0x100f   :  { %v1544_v7 = vpop.f32.mrf.mxu3 }
0x1010   :  { %v1574_v0 = vmul.f32 %v2818_v37, %v1544_v7  ;;  %v1607_v7 = vperm.slane %v3491_v10, 1 }
0x1012   :  { %v1584_v48 = vmul.f32 %v3397_v61, %v1574_v0 }
0x1014   :  { %v1601_v55 = vsel %vm47_vm1, %v1584_v48, 0.0 }
0x1017   :  { %v1547_v12 = vpop.f32.mrf.mxu3 }
0x1018   :  { %v1575_v8 = vmul.f32 %v2812_v15, %v1547_v12 }
0x101a   :  { %v1585_v35 = vmul.f32 %v3376_v4, %v1575_v8  ;;  %v1593_v4 = vadd.f32 %v1592_v39, %v1591_v27 }
0x101c   :  { %v1594_v34 = vsel %vm47_vm1, %v1585_v35, 0.0  ;;  %v1749_v35 = vpop.permute.xlu1 %1748 }
0x101d   :  { %v1595_v49 = vadd.f32 %v1594_v34, %v1593_v4  ;;  %2557 = vmatpush.msk.msra.mxu1 %vm54_vm0, %v1749_v35  ;;  %v3667_v35 = vld [vmem:[%s3898_s4 + $0x48] sm:$0xff] }
0x101f   :  { %v1550_v26 = vpop.f32.mrf.mxu3 }
0x1020   :  { %v1576_v16 = vmul.f32 %v2820_v24, %v1550_v26 }
0x1022   :  { %v1586_v51 = vmul.f32 %v3410_v62, %v1576_v16 }
0x1024   :  { %v1603_v56 = vsel %vm47_vm1, %v1586_v51, 0.0 }
0x1027   :  { %v1553_v28 = vpop.f32.mrf.mxu3 }
0x1028   :  { %v1577_v47 = vmul.f32 %v2822_v46, %v1553_v28 }
0x102a   :  { %v1587_v58 = vmul.f32 %v3403_v44, %v1577_v47  ;;  %v1602_v44 = vadd.f32 %v1601_v55, %v1600_v63  ;;  %v1695_v47 = vperm.slane %v3491_v10, 2 }
0x102c   :  { %v1596_v52 = vsel %vm47_vm1, %v1587_v58, 0.0  ;;  %v1604_v57 = vadd.f32 %v1603_v56, %v1602_v44  ;;  %v1698_v58 = vperm.slane %v3491_v10, 3  ;;  %v1701_v44 = vperm.slane %v3491_v10, 4 }
0x102d   :  { %v1597_v53 = vadd.f32 %v1596_v52, %v1595_v49 }
0x102f   :  { %v1556_v2 = vpop.f32.mrf.mxu3  ;;  %2552 = vmatmul.msk.f32.vlgmr.msrb.gmra.mxu1 %vm47_vm1, %v1597_v53 }
0x1030   :  { %v1578_v61 = vmul.f32 %v2824_v43, %v1556_v2  ;;  %v2664_v2 = vpop.permute.xlu1 %2663 }
0x1031   :  { %v2666_v56 = vunpack.i.h.bf16 %v2664_v2 }
0x1032   :  { %v1588_v41 = vmul.f32 %v3421_v18, %v1578_v61  ;;  %v2665_v61 = vunpack.i.l.bf16 %v2664_v2 }
0x1034   :  { %v1605_v62 = vsel %vm47_vm1, %v1588_v41, 0.0  ;;  %1774 = vmatpush.msra.mxu1 %v2665_v61 }
0x1035   :  { %v1606_v6 = vadd.f32 %v1605_v62, %v1604_v57 }
0x1036   :  { %1775 = vmatpush.msra.mxu1 %v2666_v56 }
0x1037   :  { %2553 = vmatmul.msk.f32.gmra.mxu1 %vm47_vm1, %v1606_v6 }
0x10ac   :  { %v1643_v5 = vpop.f32.mrf.mxu1 }
0x10ad   :  { %v1644_v12 = vadd.f32 %v1643_v5, %v1607_v7 }
0x10af   :  { %v1649_v3 = vadd.f32 %v1644_v12, %v3480_v30  ;;  %v1743_v12 = vperm.slane %v3491_v10, 5 }
0x10b1   :  { %v1651_v42 = vsel %vm47_vm1, %v1649_v3, 0.0 }
0x10b2   :  { %1652 = vadd.xlane.f32.xlu2 %v1651_v42 }
0x10b4   :  { %v1646_v17 = vpop.f32.mrf.mxu1 }
0x10b5   :  { %v1647_v45 = vadd.f32 %v1646_v17, %v1607_v7 }
0x10b7   :  { %v1650_v9 = vadd.f32 %v1647_v45, %v3484_v29 }
0x10b9   :  { %v1654_v18 = vsel %vm47_vm1, %v1650_v9, 0.0 }
0x10ba   :  { %1655 = vadd.xlane.f32.xlu2 %v1654_v18 }
0x1125   :  { %v1653_v13 = vpop.xlane.xlu2 %1652 }
0x1126   :  { %v1657_v15 = vmul.f32 %v1653_v13, %v3193_v14 }
0x1128   :  { %v1659_v26 = vsub.f32 %v1649_v3, %v1657_v15 }
0x112a   :  { %v1661_v32 = vmul.f32 %v1659_v26, %v1659_v26 }
0x112c   :  { %v1663_v30 = vsel %vm47_vm1, %v1661_v32, 0.0 }
0x112d   :  { %1664 = vadd.xlane.f32.xlu2 %v1663_v30  ;;  %v1656_v8 = vpop.xlane.xlu2 %1655 }
0x112e   :  { %v1658_v23 = vmul.f32 %v1656_v8, %v3193_v14 }
0x1130   :  { %v1660_v25 = vsub.f32 %v1650_v9, %v1658_v23 }
0x1132   :  { %v1662_v31 = vmul.f32 %v1660_v25, %v1660_v25 }
0x1134   :  { %v1666_v29 = vsel %vm47_vm1, %v1662_v31, 0.0 }
0x1135   :  { %1667 = vadd.xlane.f32.xlu0 %v1666_v29 }
0x1145   :  { %2658 = vrot.lane.b32.xlu2 %v3585_v40, %s2932_s14 }
0x11a0   :  { %v1665_v19 = vpop.xlane.xlu2 %1664 }
0x11a1   :  { %v1669_v33 = vmul.f32 %v1665_v19, %v3193_v14 }
0x11a3   :  { %v1671_v1 = vadd.f32 1e-05, %v1669_v33  ;;  %v3654_v33 = vld [vmem:[%s3898_s4 + $0x58] sm:$0xf] }
0x11a5   :  { %2825 = vrsqrt.f32 %v1671_v1  ;;  %vm1679_vm3 = vweird.f32 %v1671_v1 }
0x11a8   :  { %v1668_v37 = vpop.xlane.xlu0 %1667  ;;  %v2659_v24 = vpop.permute.xlu2 %2658 }
0x11a9   :  { %v1670_v38 = vmul.f32 %v1668_v37, %v3193_v14  ;;  %v2661_v11 = vunpack.i.h.bf16 %v2659_v24  ;;  %v2660_v20 = vunpack.i.l.bf16 %v2659_v24 }
0x11ab   :  { %v2826_v39 = vpop.eup %2825  ;;  %v1672_v0 = vadd.f32 1e-05, %v1670_v38  ;;  %1732 = vmatpush.msrb.mxu0 %v2660_v20 }
0x11ac   :  { %v1674_v46 = vmul.f32 %v2826_v39, %v1671_v1  ;;  %vm1680_vm15 = vweird.f32 %v2826_v39  ;;  %v3661_v1 = vld [vmem:[%s3898_s4 + $0x50] sm:$0xff] }
0x11ad   :  { %2827 = vrsqrt.f32 %v1672_v0  ;;  %1733 = vmatpush.msrb.mxu0 %v2661_v11  ;;  %vm1681_vm4 = vmor %vm1679_vm3, %vm1680_vm15  ;;  %vm1689_vm6 = vweird.f32 %v1672_v0 }
0x11ae   :  { %v1675_v40 = vmul.f32 %v2826_v39, %v1674_v46 }
0x11af   :  { %2564 = vmatpush.msk.msra.mxu0 %vm54_vm0, %v3654_v33 }
0x11b0   :  { %v1676_v27 = vmul.f32 0.5, %v1675_v40 }
0x11b1   :  { %1865 = vmatpush.msra.mxu0 %v3661_v1 }
0x11b2   :  { %v1677_v28 = vsub.f32 1.5, %v1676_v27 }
0x11b3   :  { %v2828_v36 = vpop.eup %2827  ;;  %1866 = vmatpush.msra.mxu0 %v3667_v35 }
0x11b4   :  { %v1678_v34 = vmul.f32 %v2826_v39, %v1677_v28  ;;  %v1684_v16 = vmul.f32 %v2828_v36, %v1672_v0  ;;  %vm1690_vm5 = vweird.f32 %v2828_v36 }
0x11b5   :  { %vm1691_vm7 = vmor %vm1689_vm6, %vm1690_vm5 }
0x11b6   :  { %v1682_v4 = vsel %vm1681_vm4, %v2826_v39, %v1678_v34  ;;  %v1685_v60 = vmul.f32 %v2828_v36, %v1684_v16 }
0x11b7   :  { %v1693_v48 = vmul.f32 %v1682_v4, %v1659_v26 }
0x11b8   :  { %v1686_v49 = vmul.f32 0.5, %v1685_v60 }
0x11b9   :  { %v1696_v50 = vmul.f32 %v1695_v47, %v1693_v48 }
0x11ba   :  { %v1687_v51 = vsub.f32 1.5, %v1686_v49 }
0x11bb   :  { %v1699_v52 = vadd.f32 %v1698_v58, %v1696_v50 }
0x11bc   :  { %v1688_v53 = vmul.f32 %v2828_v36, %v1687_v51 }
0x11bd   :  { %2555 = vmatmul.msk.f32.vlgmr.msrb.gmra.mxu0 %vm47_vm1, %v1699_v52 }
0x11be   :  { %v1692_v54 = vsel %vm1691_vm7, %v2828_v36, %v1688_v53 }
0x11bf   :  { %v1694_v55 = vmul.f32 %v1692_v54, %v1660_v25 }
0x11c1   :  { %v1697_v43 = vmul.f32 %v1695_v47, %v1694_v55  ;;  %v1829_v47 = vperm.slane %v3491_v10, 6 }
0x11c3   :  { %v1700_v63 = vadd.f32 %v1698_v58, %v1697_v43  ;;  %v1832_v58 = vperm.slane %v3491_v10, 7  ;;  %v3685_v10 = vld [vmem:[%s3899_s5 + $0x18] sm:$0xff] }
0x11c4   :  { %v1841_v2 = vperm.slane %v3685_v10, 0 }
0x11c5   :  { %2556 = vmatmul.msk.f32.gmra.mxu0 %vm47_vm1, %v1700_v63 }
0x123a   :  { %v1735_v41 = vpop.f32.mrf.mxu0 }
0x123b   :  { %v1736_v57 = vadd.f32 %v1735_v41, %v1701_v44 }
0x123d   :  { %v1741_v62 = vmax.f32 %v1736_v57, 0.0 }
0x123f   :  { %2558 = vmatmul.msk.f32.vlgmr.msra.gmra.mxu1 %vm47_vm1, %v1741_v62 }
0x1242   :  { %v1738_v6 = vpop.f32.mrf.mxu0 }
0x1243   :  { %v1739_v7 = vadd.f32 %v1738_v6, %v1701_v44 }
0x1245   :  { %v1742_v5 = vmax.f32 %v1739_v7, 0.0  ;;  %v3695_v7 = vld [vmem:[%s3897_s3] sm:$0xff] }
0x1247   :  { %2559 = vmatmul.msk.f32.gmra.mxu1 %vm47_vm1, %v1742_v5 }
0x12bc   :  { %v1777_v3 = vpop.f32.mrf.mxu1 }
0x12bd   :  { %v1778_v42 = vadd.f32 %v1777_v3, %v1743_v12 }
0x12bf   :  { %v1783_v17 = vadd.f32 %v1778_v42, %v1699_v52  ;;  %v3709_v42 = vld [vmem:[%s3897_s3 + $0x10] sm:$0xff] }
0x12c1   :  { %v1785_v45 = vsel %vm47_vm1, %v1783_v17, 0.0 }
0x12c2   :  { %1786 = vadd.xlane.f32.xlu1 %v1785_v45  ;;  %v3716_v45 = vld [vmem:[%s3897_s3 + $0x18] sm:$0xff] }
0x12c4   :  { %v1780_v9 = vpop.f32.mrf.mxu1 }
0x12c5   :  { %v1781_v18 = vadd.f32 %v1780_v9, %v1743_v12  ;;  %v3702_v12 = vld [vmem:[%s3897_s3 + $0x8] sm:$0xff] }
0x12c7   :  { %v1784_v13 = vadd.f32 %v1781_v18, %v1700_v63  ;;  %v3723_v18 = vld [vmem:[%s3897_s3 + $0x20] sm:$0xff] }
0x12c9   :  { %v1788_v22 = vsel %vm47_vm1, %v1784_v13, 0.0 }
0x12ca   :  { %1789 = vadd.xlane.f32.xlu2 %v1788_v22  ;;  %v3730_v22 = vld [vmem:[%s3897_s3 + $0x28] sm:$0xff] }
0x1335   :  { %v1787_v15 = vpop.xlane.xlu1 %1786 }
0x1336   :  { %v1791_v26 = vmul.f32 %v1787_v15, %v3193_v14 }
0x1338   :  { %v1793_v32 = vsub.f32 %v1783_v17, %v1791_v26  ;;  %v3737_v26 = vld [vmem:[%s3897_s3 + $0x30] sm:$0xff] }
0x133a   :  { %v1795_v30 = vmul.f32 %v1793_v32, %v1793_v32 }
0x133c   :  { %v1797_v8 = vsel %vm47_vm1, %v1795_v30, 0.0  ;;  %v3744_v30 = vld [vmem:[%s3897_s3 + $0x38] sm:$0xff] }
0x133d   :  { %v1790_v23 = vpop.xlane.xlu2 %1789  ;;  %1798 = vadd.xlane.f32.xlu0 %v1797_v8 }
0x133e   :  { %v1792_v25 = vmul.f32 %v1790_v23, %v3193_v14  ;;  %v3751_v23 = vld [vmem:[%s3897_s3 + $0x40] sm:$0xff] }
0x1340   :  { %v1794_v31 = vsub.f32 %v1784_v13, %v1792_v25 }
0x1342   :  { %v1796_v29 = vmul.f32 %v1794_v31, %v1794_v31 }
0x1344   :  { %v1800_v19 = vsel %vm47_vm1, %v1796_v29, 0.0 }
0x1345   :  { %1801 = vadd.xlane.f32.xlu0 %v1800_v19 }
0x13b0   :  { %v1799_v37 = vpop.xlane.xlu0 %1798 }
0x13b1   :  { %v1803_v24 = vmul.f32 %v1799_v37, %v3193_v14 }
0x13b3   :  { %v1805_v38 = vadd.f32 1e-05, %v1803_v24 }
0x13b5   :  { %2829 = vrsqrt.f32 %v1805_v38  ;;  %vm1813_vm9 = vweird.f32 %v1805_v38 }
0x13b8   :  { %v1802_v11 = vpop.xlane.xlu0 %1801 }
0x13b9   :  { %v1804_v20 = vmul.f32 %v1802_v11, %v3193_v14 }
0x13bb   :  { %v2830_v39 = vpop.eup %2829  ;;  %v1806_v0 = vadd.f32 1e-05, %v1804_v20 }
0x13bc   :  { %v1808_v46 = vmul.f32 %v2830_v39, %v1805_v38  ;;  %vm1814_vm8 = vweird.f32 %v2830_v39 }
0x13bd   :  { %2831 = vrsqrt.f32 %v1806_v0  ;;  %vm1815_vm10 = vmor %vm1813_vm9, %vm1814_vm8  ;;  %vm1823_vm12 = vweird.f32 %v1806_v0 }
0x13be   :  { %v1809_v40 = vmul.f32 %v2830_v39, %v1808_v46 }
0x13c0   :  { %v1810_v27 = vmul.f32 0.5, %v1809_v40 }
0x13c2   :  { %v1811_v28 = vsub.f32 1.5, %v1810_v27 }
0x13c3   :  { %v2832_v36 = vpop.eup %2831 }
0x13c4   :  { %v1812_v34 = vmul.f32 %v2830_v39, %v1811_v28  ;;  %v1818_v16 = vmul.f32 %v2832_v36, %v1806_v0  ;;  %vm1824_vm11 = vweird.f32 %v2832_v36 }
0x13c5   :  { %vm1825_vm13 = vmor %vm1823_vm12, %vm1824_vm11 }
0x13c6   :  { %v1816_v4 = vsel %vm1815_vm10, %v2830_v39, %v1812_v34  ;;  %v1819_v60 = vmul.f32 %v2832_v36, %v1818_v16 }
0x13c7   :  { %v1827_v48 = vmul.f32 %v1816_v4, %v1793_v32 }
0x13c8   :  { %v1820_v49 = vmul.f32 0.5, %v1819_v60 }
0x13c9   :  { %v1830_v50 = vmul.f32 %v1829_v47, %v1827_v48 }
0x13ca   :  { %v1821_v51 = vsub.f32 1.5, %v1820_v49 }
0x13cb   :  { %v3674_v52 = vadd.f32 %v1832_v58, %v1830_v50 }
0x13cc   :  { %v1822_v53 = vmul.f32 %v2832_v36, %v1821_v51 }
0x13cd   :  { %2565 = vmatmul.msk.f32.vlgmr.msra.gmra.mxu0 %vm47_vm1, %v3674_v52 }
0x13ce   :  { %v1826_v54 = vsel %vm1825_vm13, %v2832_v36, %v1822_v53 }
0x13cf   :  { %v1828_v55 = vmul.f32 %v1826_v54, %v1794_v31  ;;  %v3758_v31 = vld [vmem:[%s3897_s3 + $0x48] sm:$0xff]  ;;  %s2935_s3 = smov [#allocation2]  }
0x13d1   :  { %v1831_v43 = vmul.f32 %v1829_v47, %v1828_v55 }
0x13d3   :  { %v3678_v63 = vadd.f32 %v1832_v58, %v1831_v43 }
0x13d5   :  { %2566 = vmatmul.msk.f32.gmra.mxu0 %vm47_vm1, %v3678_v63 }
0x144a   :  { %v1868_v56 = vpop.f32.mrf.mxu0 }
0x144b   :  { %v1869_v61 = vadd.f32 %v1868_v56, %v1841_v2 }
0x144d   :  { %1886 = vrot.lane.b32.xlu2 %v1869_v61, %s2929_s0  ;;  %v1874_v5 = vmul.f32 %v3695_v7, %v1869_v61  ;;  %v1876_v17 = vmul.f32 %v3709_v42, %v1869_v61  ;;  %v1878_v13 = vmul.f32 %v3723_v18, %v1869_v61  ;;  %v1880_v32 = vmul.f32 %v3737_v26, %v1869_v61 }
0x144e   :  { %v1882_v25 = vmul.f32 %v3751_v23, %v1869_v61 }
0x1452   :  { %v1871_v44 = vpop.f32.mrf.mxu0 }
0x1453   :  { %v1872_v41 = vadd.f32 %v1871_v44, %v1841_v2 }
0x1455   :  { %1888 = vrot.lane.b32.xlu0 %v1872_v41, %s2929_s0  ;;  %v2667_v57 = vpack.i.bf16 %v1869_v61, %v1872_v41  ;;  %v1875_v3 = vmul.f32 %v3702_v12, %v1872_v41  ;;  %v1877_v9 = vmul.f32 %v3716_v45, %v1872_v41  ;;  %v1879_v15 = vmul.f32 %v3730_v22, %v1872_v41 }
0x1456   :  { %v1881_v8 = vmul.f32 %v3744_v30, %v1872_v41  ;;  %v1883_v29 = vmul.f32 %v3758_v31, %v1872_v41 }
0x14a7   :  { %v1887_v6 = vpop.permute.xlu2 %1886 }
0x14c7   :  { %v1889_v62 = vpop.permute.xlu0 %1888 }
0x14c8   :  { %2567 = vmatpush.xpose.msk.msrb.mxu1 %vm47_vm1, %v1889_v62 }
0x14cc   :  { %2568 = vmatpush.xpose.msk.msrb.mxu1 %vm47_vm1, %v1887_v6 }
0x14cf   :  { %2569 = vmatmul.msk.f32.vlgmr.msrb.gmra.mxu1 %vm47_vm1, %v1874_v5 }
0x14d7   :  { %2570 = vmatmul.msk.f32.gmra.mxu1 %vm47_vm1, %v1875_v3 }
0x14df   :  { %2571 = vmatmul.msk.f32.gmra.mxu1 %vm47_vm1, %v1876_v17 }
0x14e7   :  { %2572 = vmatmul.msk.f32.gmra.mxu1 %vm47_vm1, %v1877_v9 }
0x14ef   :  { %2573 = vmatmul.msk.f32.gmra.mxu1 %vm47_vm1, %v1878_v13 }
0x14f7   :  { %2574 = vmatmul.msk.f32.gmra.mxu1 %vm47_vm1, %v1879_v15 }
0x14ff   :  { %2575 = vmatmul.msk.f32.gmra.mxu1 %vm47_vm1, %v1880_v32 }
0x1507   :  { %2576 = vmatmul.msk.f32.gmra.mxu1 %vm47_vm1, %v1881_v8 }
0x150f   :  { %2577 = vmatmul.msk.f32.gmra.mxu1 %vm47_vm1, %v1882_v25 }
0x1517   :  { %2578 = vmatmul.msk.f32.gmra.mxu1 %vm47_vm1, %v1883_v29 }
0x154c   :  { %v1941_v19 = vpop.f32.mrf.mxu1 }
0x154d   :  { %v1971_v37 = vadd.f32 %v3521_v21, %v1941_v19 }
0x154f   :  { %v1981_v24 = vsel %vm188_vm2, %v1971_v37, -inf }
0x1550   :  { %1982 = vmax.xlane.f32.xlu1 %v1981_v24 }
0x1554   :  { %v1944_v38 = vpop.f32.mrf.mxu1 }
0x1555   :  { %v1972_v11 = vadd.f32 %v3528_v59, %v1944_v38 }
0x1557   :  { %v1984_v20 = vsel %vm188_vm2, %v1972_v11, -inf }
0x1558   :  { %1985 = vmax.xlane.f32.xlu0 %v1984_v20 }
0x155c   :  { %v1947_v39 = vpop.f32.mrf.mxu1 }
0x155d   :  { %v1973_v0 = vadd.f32 %v3521_v21, %v1947_v39 }
0x155f   :  { %v1987_v46 = vsel %vm188_vm2, %v1973_v0, -inf }
0x1560   :  { %1988 = vmax.xlane.f32.xlu2 %v1987_v46 }
0x1564   :  { %v1950_v40 = vpop.f32.mrf.mxu1 }
0x1565   :  { %v3784_v54 = vadd.f32 %v3528_v59, %v1950_v40 }
0x1567   :  { %v1990_v43 = vsel %vm188_vm2, %v3784_v54, -inf }
0x1569   :  { %2668 = vrot.lane.b32.xlu1 %v2667_v57, %s2930_s1  ;;  %s2436_s1 = sshll.u32 %s2935_s3, 4  ;;  %s2437_s1 = int_to_ptr.vmem [resolvable:$true] %s2436_s1 }
0x156c   :  { %v1953_v27 = vpop.f32.mrf.mxu1 }
0x156d   :  { %v1975_v28 = vadd.f32 %v3521_v21, %v1953_v27 }
0x156f   :  { %v1993_v36 = vsel %vm188_vm2, %v1975_v28, -inf }
0x1570   :  { %1994 = vmax.xlane.f32.xlu0 %v1993_v36 }
0x1574   :  { %v1956_v34 = vpop.f32.mrf.mxu1 }
0x1575   :  { %v1976_v16 = vadd.f32 %v3528_v59, %v1956_v34 }
0x1577   :  { %v1996_v47 = vsel %vm188_vm2, %v1976_v16, -inf }
0x1578   :  { %1997 = vmax.xlane.f32.xlu0 %v1996_v47 }
0x157c   :  { %v1959_v4 = vpop.f32.mrf.mxu1 }
0x157d   :  { %v1977_v60 = vadd.f32 %v3521_v21, %v1959_v4 }
0x157f   :  { %v1999_v48 = vsel %vm188_vm2, %v1977_v60, -inf }
0x1580   :  { %2000 = vmax.xlane.f32.xlu0 %v1999_v48 }
0x1584   :  { %v1962_v58 = vpop.f32.mrf.mxu1 }
0x1585   :  { %v3776_v49 = vadd.f32 %v3528_v59, %v1962_v58 }
0x1587   :  { %v2002_v50 = vsel %vm188_vm2, %v3776_v49, -inf }
0x1588   :  { %2003 = vmax.xlane.f32.xlu2 %v2002_v50 }
0x158c   :  { %v1965_v51 = vpop.f32.mrf.mxu1 }
0x158d   :  { %v3781_v53 = vadd.f32 %v3521_v21, %v1965_v51 }
0x158f   :  { %v2005_v55 = vsel %vm188_vm2, %v3781_v53, -inf }
0x1590   :  { %2006 = vmax.xlane.f32.xlu0 %v2005_v55 }
0x1593   :  { %1991 = vmax.xlane.f32.xlu1 %v1990_v43 }
0x1594   :  { %v1968_v2 = vpop.f32.mrf.mxu1 }
0x1595   :  { %v3791_v56 = vadd.f32 %v3528_v59, %v1968_v2 }
0x1597   :  { %v2008_v61 = vsel %vm188_vm2, %v3791_v56, -inf }
0x1598   :  { %2009 = vmax.xlane.f32.xlu2 %v2008_v61 }
0x15c3   :  { %v1983_v21 = vpop.xlane.xlu1 %1982 }
0x15c4   :  { %v2011_v44 = vsub.f32 %v1971_v37, %v1983_v21 }
0x15c6   :  { %v2021_v41 = vmul.f32 1.442695, %v2011_v44 }
0x15c8   :  { %2833 = vpow2.f32 %v2021_v41 }
0x15cb   :  { %v1986_v57 = vpop.xlane.xlu0 %1985 }
0x15cc   :  { %v2012_v62 = vsub.f32 %v1972_v11, %v1986_v57 }
0x15ce   :  { %v2834_v6 = vpop.eup %2833  ;;  %v2023_v5 = vmul.f32 1.442695, %v2012_v62 }
0x15cf   :  { %v2041_v3 = vsel %vm188_vm2, %v2834_v6, 0.0 }
0x15d0   :  { %2835 = vpow2.f32 %v2023_v5  ;;  %2042 = vadd.xlane.f32.xlu1 %v2041_v3 }
0x15d3   :  { %v1989_v17 = vpop.xlane.xlu2 %1988 }
0x15d4   :  { %v2013_v9 = vsub.f32 %v1973_v0, %v1989_v17 }
0x15d6   :  { %v2836_v59 = vpop.eup %2835  ;;  %v2025_v13 = vmul.f32 1.442695, %v2013_v9 }
0x15d7   :  { %v2044_v15 = vsel %vm188_vm2, %v2836_v59, 0.0 }
0x15d8   :  { %2837 = vpow2.f32 %v2025_v13  ;;  %2045 = vadd.xlane.f32.xlu2 %v2044_v15 }
0x15db   :  { %v2669_v32 = vpop.permute.xlu1 %2668 }
0x15dc   :  { %v2670_v8 = vunpack.i.l.bf16 %v2669_v32  ;;  %v2671_v29 = vunpack.i.h.bf16 %v2669_v32 }
0x15de   :  { %v2838_v25 = vpop.eup %2837  ;;  %2121 = vmatpush.msrb.mxu0 %v2670_v8 }
0x15df   :  { %v2047_v19 = vsel %vm188_vm2, %v2838_v25, 0.0 }
0x15e0   :  { %2122 = vmatpush.msrb.mxu0 %v2671_v29  ;;  %2048 = vadd.xlane.f32.xlu0 %v2047_v19 }
0x15e1   :  { %2579 = vmatmul.msk.f32.vlgmr.msrb.gmra.mxu0 %vm188_vm2, %v2834_v6 }
0x15e3   :  { %v1995_v37 = vpop.xlane.xlu0 %1994 }
0x15e4   :  { %v2015_v24 = vsub.f32 %v1975_v28, %v1995_v37 }
0x15e6   :  { %v2029_v38 = vmul.f32 1.442695, %v2015_v24 }
0x15e8   :  { %2839 = vpow2.f32 %v2029_v38 }
0x15e9   :  { %2580 = vmatmul.msk.f32.gmra.mxu0 %vm188_vm2, %v2836_v59 }
0x15eb   :  { %v1998_v11 = vpop.xlane.xlu0 %1997 }
0x15ec   :  { %v2016_v20 = vsub.f32 %v1976_v16, %v1998_v11 }
0x15ee   :  { %v2840_v39 = vpop.eup %2839  ;;  %v2031_v0 = vmul.f32 1.442695, %v2016_v20 }
0x15ef   :  { %v2053_v46 = vsel %vm188_vm2, %v2840_v39, 0.0 }
0x15f0   :  { %2841 = vpow2.f32 %v2031_v0  ;;  %2054 = vadd.xlane.f32.xlu2 %v2053_v46 }
0x15f1   :  { %2581 = vmatmul.msk.f32.gmra.mxu0 %vm188_vm2, %v2838_v25 }
0x15f3   :  { %v2001_v40 = vpop.xlane.xlu0 %2000 }
0x15f4   :  { %v2017_v27 = vsub.f32 %v1977_v60, %v2001_v40 }
0x15f6   :  { %v2842_v36 = vpop.eup %2841  ;;  %v2033_v34 = vmul.f32 1.442695, %v2017_v27 }
0x15f7   :  { %v2056_v28 = vsel %vm188_vm2, %v2842_v36, 0.0 }
0x15f8   :  { %2843 = vpow2.f32 %v2033_v34  ;;  %2057 = vadd.xlane.f32.xlu0 %v2056_v28 }
0x15fb   :  { %v2004_v47 = vpop.xlane.xlu2 %2003 }
0x15fc   :  { %v2018_v4 = vsub.f32 %v3776_v49, %v2004_v47 }
0x15fe   :  { %v2844_v16 = vpop.eup %2843  ;;  %v2035_v48 = vmul.f32 1.442695, %v2018_v4 }
0x15ff   :  { %v2059_v58 = vsel %vm188_vm2, %v2844_v16, 0.0 }
0x1600   :  { %2845 = vpow2.f32 %v2035_v48  ;;  %2060 = vadd.xlane.f32.xlu1 %v2059_v58 }
0x1603   :  { %v2007_v50 = vpop.xlane.xlu0 %2006 }
0x1604   :  { %v2019_v51 = vsub.f32 %v3781_v53, %v2007_v50 }
0x1606   :  { %v2846_v55 = vpop.eup %2845  ;;  %v2037_v60 = vmul.f32 1.442695, %v2019_v51  ;;  %v1992_v43 = vpop.xlane.xlu1 %1991 }
0x1607   :  { %v2014_v2 = vsub.f32 %v3784_v54, %v1992_v43  ;;  %v2062_v61 = vsel %vm188_vm2, %v2846_v55, 0.0 }
0x1608   :  { %2847 = vpow2.f32 %v2037_v60  ;;  %2063 = vadd.xlane.f32.xlu2 %v2062_v61 }
0x1609   :  { %v2027_v21 = vmul.f32 1.442695, %v2014_v2 }
0x160b   :  { %2849 = vpow2.f32 %v2027_v21  ;;  %v2010_v49 = vpop.xlane.xlu2 %2009 }
0x160c   :  { %v2020_v44 = vsub.f32 %v3791_v56, %v2010_v49  ;;  %v3821_v56 = vpack.i.bf16 %v3667_v35, %v3661_v1 }
0x160e   :  { %v2848_v41 = vpop.eup %2847  ;;  %v2039_v57 = vmul.f32 1.442695, %v2020_v44 }
0x160f   :  { %v2065_v62 = vsel %vm188_vm2, %v2848_v41, 0.0 }
0x1610   :  { %2066 = vadd.xlane.f32.xlu0 %v2065_v62  ;;  %2851 = vpow2.f32 %v2039_v57 }
0x1611   :  { %v2850_v53 = vpop.eup %2849 }
0x1612   :  { %2582 = vmatmul.msk.f32.gmra.mxu0 %vm188_vm2, %v2850_v53  ;;  %v2050_v54 = vsel %vm188_vm2, %v2850_v53, 0.0 }
0x1613   :  { %2051 = vadd.xlane.f32.xlu1 %v2050_v54 }
0x1616   :  { %v2852_v6 = vpop.eup %2851 }
0x1617   :  { %v2068_v5 = vsel %vm188_vm2, %v2852_v6, 0.0 }
0x161a   :  { %2583 = vmatmul.msk.f32.gmra.mxu0 %vm188_vm2, %v2840_v39 }
0x161b   :  { %2069 = vadd.xlane.f32.xlu1 %v2068_v5 }
0x1620   :  { %2673 = vrot.lane.b32.xlu2 %v3821_v56, %s2931_s13 }
0x1622   :  { %2584 = vmatmul.msk.f32.gmra.mxu0 %vm188_vm2, %v2842_v36 }
0x1624   :  { %2209 = vrot.lane.b32.xlu0 %v3654_v33, %s2931_s13 }
0x1628   :  { %2301 = vrot.lane.b32.xlu2 %v3654_v33, %s2932_s14 }
0x162a   :  { %2585 = vmatmul.msk.f32.gmra.mxu0 %vm188_vm2, %v2844_v16 }
0x1630   :  { %2343 = vrot.lane.b32.xlu2 %v3654_v33, %s2934_s15 }
0x1632   :  { %2586 = vmatmul.msk.f32.gmra.mxu0 %vm188_vm2, %v2846_v55 }
0x1638   :  { %2683 = vrot.lane.b32.xlu2 %v3821_v56, %s2934_s15  ;;  %s2438_s15 = sshll.u32 %s3900_s6, 4  ;;  %s2439_s15 = int_to_ptr.hbm [resolvable:$true] %s2438_s15 }
0x163a   :  { %2587 = vmatmul.msk.f32.gmra.mxu0 %vm188_vm2, %v2848_v41 }
0x1642   :  { %2588 = vmatmul.msk.f32.gmra.mxu0 %vm188_vm2, %v2852_v6 }
0x1643   :  { %v2043_v24 = vpop.xlane.xlu1 %2042 }
0x164b   :  { %v2046_v59 = vpop.xlane.xlu2 %2045 }
0x1653   :  { %v2049_v9 = vpop.xlane.xlu0 %2048 }
0x1654   :  { %2853 = vrcp.f32 %v2049_v9 }
0x1655   :  { %2855 = vrcp.f32 %v2043_v24  ;;  %v2202_v24 = vperm.slane %v3685_v10, 1 }
0x165a   :  { %v2854_v0 = vpop.eup %2853 }
0x165b   :  { %v2856_v46 = vpop.eup %2855 }
0x165e   :  { %v2124_v3 = vpop.f32.mrf.mxu0 }
0x165f   :  { %v2164_v36 = vmul.f32 %v2856_v46, %v2124_v3 }
0x1661   :  { %v2174_v48 = vmul.f32 %v3695_v7, %v2164_v36 }
0x1663   :  { %v2055_v35 = vpop.xlane.xlu2 %2054  ;;  %v2184_v21 = vsel %vm47_vm1, %v2174_v48, 0.0 }
0x1664   :  { %2857 = vrcp.f32 %v2055_v35 }
0x1666   :  { %v2127_v17 = vpop.f32.mrf.mxu0 }
0x166a   :  { %v2858_v27 = vpop.eup %2857 }
0x166b   :  { %v2058_v13 = vpop.xlane.xlu0 %2057 }
0x166e   :  { %v2130_v1 = vpop.f32.mrf.mxu0 }
0x166f   :  { %v2166_v40 = vmul.f32 %v2854_v0, %v2130_v1 }
0x1671   :  { %v2176_v4 = vmul.f32 %v3709_v42, %v2166_v40 }
0x1673   :  { %v2061_v11 = vpop.xlane.xlu1 %2060  ;;  %v2185_v55 = vsel %vm47_vm1, %v2176_v4, 0.0 }
0x1674   :  { %2859 = vrcp.f32 %v2061_v11  ;;  %v2186_v7 = vadd.f32 %v2185_v55, %v2184_v21 }
0x167a   :  { %v2860_v28 = vpop.eup %2859 }
0x167b   :  { %v2064_v8 = vpop.xlane.xlu2 %2063 }
0x1683   :  { %v2067_v15 = vpop.xlane.xlu0 %2066  ;;  %v2674_v19 = vpop.permute.xlu2 %2673 }
0x1684   :  { %v2675_v37 = vunpack.i.l.bf16 %v2674_v19  ;;  %v2676_v38 = vunpack.i.h.bf16 %v2674_v19 }
0x1686   :  { %v2052_v39 = vpop.xlane.xlu1 %2051 }
0x1687   :  { %2861 = vrcp.f32 %v2052_v39 }
0x1688   :  { %2863 = vrcp.f32 %v2046_v59 }
0x1689   :  { %2865 = vrcp.f32 %v2058_v13 }
0x168a   :  { %2867 = vrcp.f32 %v2064_v8 }
0x168b   :  { %2869 = vrcp.f32 %v2067_v15 }
0x168d   :  { %v2862_v50 = vpop.eup %2861 }
0x168e   :  { %v2864_v51 = vpop.eup %2863  ;;  %v2070_v42 = vpop.xlane.xlu1 %2069 }
0x168f   :  { %v2133_v32 = vpop.f32.mrf.mxu0  ;;  %v2866_v2 = vpop.eup %2865  ;;  %v2165_v49 = vmul.f32 %v2864_v51, %v2127_v17  ;;  %2871 = vrcp.f32 %v2070_v42 }
0x1690   :  { %v2167_v60 = vmul.f32 %v2862_v50, %v2133_v32  ;;  %v2868_v61 = vpop.eup %2867 }
0x1691   :  { %v2870_v57 = vpop.eup %2869  ;;  %v2175_v5 = vmul.f32 %v3702_v12, %v2165_v49 }
0x1693   :  { %v2193_v35 = vsel %vm47_vm1, %v2175_v5, 0.0 }
0x1695   :  { %v2872_v32 = vpop.eup %2871 }
0x1696   :  { %v2210_v25 = vpop.permute.xlu0 %2209 }
0x1697   :  { %v2136_v29 = vpop.f32.mrf.mxu0  ;;  %2589 = vmatpush.msk.msra.mxu2 %vm54_vm0, %v2210_v25 }
0x1698   :  { %v2168_v34 = vmul.f32 %v2858_v27, %v2136_v29 }
0x1699   :  { %2235 = vmatpush.msra.mxu2 %v2675_v37 }
0x169a   :  { %v2178_v58 = vmul.f32 %v3723_v18, %v2168_v34  ;;  %v2177_v18 = vmul.f32 %v3716_v45, %v2167_v60 }
0x169b   :  { %2236 = vmatpush.msra.mxu2 %v2676_v38 }
0x169c   :  { %v2187_v44 = vsel %vm47_vm1, %v2178_v58, 0.0  ;;  %v2194_v59 = vsel %vm47_vm1, %v2177_v18, 0.0 }
0x169d   :  { %v2195_v8 = vadd.f32 %v2194_v59, %v2193_v35 }
0x169f   :  { %v2139_v33 = vpop.f32.mrf.mxu0 }
0x16a0   :  { %v2169_v41 = vmul.f32 %v2866_v2, %v2139_v33 }
0x16a2   :  { %v2179_v3 = vmul.f32 %v3730_v22, %v2169_v41 }
0x16a4   :  { %v2196_v15 = vsel %vm47_vm1, %v2179_v3, 0.0  ;;  %v2293_v3 = vperm.slane %v3685_v10, 3 }
0x16a7   :  { %v2142_v20 = vpop.f32.mrf.mxu0 }
0x16a8   :  { %v2170_v16 = vmul.f32 %v2860_v28, %v2142_v20 }
0x16aa   :  { %v2180_v43 = vmul.f32 %v3737_v26, %v2170_v16  ;;  %v2188_v26 = vadd.f32 %v2187_v44, %v2186_v7 }
0x16ac   :  { %v2189_v53 = vsel %vm47_vm1, %v2180_v43, 0.0 }
0x16ad   :  { %v2190_v9 = vadd.f32 %v2189_v53, %v2188_v26 }
0x16af   :  { %v2145_v47 = vpop.f32.mrf.mxu0 }
0x16b0   :  { %v2171_v54 = vmul.f32 %v2868_v61, %v2145_v47 }
0x16b2   :  { %v2181_v13 = vmul.f32 %v3744_v30, %v2171_v54 }
0x16b4   :  { %v2198_v12 = vsel %vm47_vm1, %v2181_v13, 0.0 }
0x16b7   :  { %v2148_v62 = vpop.f32.mrf.mxu0 }
0x16b8   :  { %v2172_v6 = vmul.f32 %v2870_v57, %v2148_v62 }
0x16ba   :  { %v2182_v17 = vmul.f32 %v3751_v23, %v2172_v6  ;;  %v2197_v23 = vadd.f32 %v2196_v15, %v2195_v8  ;;  %v2290_v6 = vperm.slane %v3685_v10, 2 }
0x16bc   :  { %v2191_v1 = vsel %vm47_vm1, %v2182_v17, 0.0  ;;  %v2199_v19 = vadd.f32 %v2198_v12, %v2197_v23  ;;  %v2296_v12 = vperm.slane %v3685_v10, 4 }
0x16bd   :  { %v2192_v45 = vadd.f32 %v2191_v1, %v2190_v9 }
0x16bf   :  { %v2151_v25 = vpop.f32.mrf.mxu0  ;;  %2590 = vmatmul.msk.f32.vlgmr.msra.gmra.mxu2 %vm47_vm1, %v2192_v45 }
0x16c0   :  { %v2173_v22 = vmul.f32 %v2872_v32, %v2151_v25 }
0x16c2   :  { %v2183_v29 = vmul.f32 %v3758_v31, %v2173_v22 }
0x16c4   :  { %v2200_v30 = vsel %vm47_vm1, %v2183_v29, 0.0 }
0x16c5   :  { %v2201_v37 = vadd.f32 %v2200_v30, %v2199_v19 }
0x16c7   :  { %2591 = vmatmul.msk.f32.gmra.mxu2 %vm47_vm1, %v2201_v37 }
0x1742   :  { %v2238_v38 = vpop.f32.mrf.mxu2 }
0x1743   :  { %v2239_v33 = vadd.f32 %v2238_v38, %v2202_v24 }
0x1745   :  { %v2244_v11 = vadd.f32 %v2239_v33, %v3674_v52 }
0x1747   :  { %v2246_v20 = vsel %vm47_vm1, %v2244_v11, 0.0 }
0x1748   :  { %2247 = vadd.xlane.f32.xlu1 %v2246_v20 }
0x174a   :  { %v2241_v39 = vpop.f32.mrf.mxu2 }
0x174b   :  { %v2242_v0 = vadd.f32 %v2241_v39, %v2202_v24  ;;  %v2338_v24 = vperm.slane %v3685_v10, 5 }
0x174d   :  { %v2245_v46 = vadd.f32 %v2242_v0, %v3678_v63  ;;  %v2302_v63 = vpop.permute.xlu2 %2301 }
0x174e   :  { %2592 = vmatpush.msk.msrb.mxu3 %vm54_vm0, %v2302_v63 }
0x174f   :  { %v2249_v31 = vsel %vm47_vm1, %v2245_v46, 0.0 }
0x1750   :  { %2250 = vadd.xlane.f32.xlu1 %v2249_v31 }
0x1755   :  { %v2344_v49 = vpop.permute.xlu2 %2343 }
0x1756   :  { %2595 = vmatpush.msk.msrb.mxu2 %vm54_vm0, %v2344_v49 }
0x175d   :  { %v2684_v32 = vpop.permute.xlu2 %2683 }
0x175e   :  { %v2686_v8 = vunpack.i.h.bf16 %v2684_v32  ;;  %v2685_v25 = vunpack.i.l.bf16 %v2684_v32 }
0x1760   :  { %2369 = vmatpush.msrb.mxu2 %v2685_v25 }
0x1762   :  { %2370 = vmatpush.msrb.mxu2 %v2686_v8 }
0x17bb   :  { %v2248_v40 = vpop.xlane.xlu1 %2247 }
0x17bc   :  { %v2252_v27 = vmul.f32 %v2248_v40, %v3193_v14 }
0x17be   :  { %v2254_v36 = vsub.f32 %v2244_v11, %v2252_v27 }
0x17c0   :  { %v2256_v34 = vmul.f32 %v2254_v36, %v2254_v36 }
0x17c2   :  { %v2258_v28 = vsel %vm47_vm1, %v2256_v34, 0.0 }
0x17c3   :  { %2259 = vadd.xlane.f32.xlu0 %v2258_v28  ;;  %v2251_v47 = vpop.xlane.xlu1 %2250 }
0x17c4   :  { %v2253_v52 = vmul.f32 %v2251_v47, %v3193_v14 }
0x17c6   :  { %v2255_v4 = vsub.f32 %v2245_v46, %v2253_v52 }
0x17c8   :  { %v2257_v16 = vmul.f32 %v2255_v4, %v2255_v4 }
0x17ca   :  { %v2261_v48 = vsel %vm47_vm1, %v2257_v16, 0.0 }
0x17cb   :  { %2262 = vadd.xlane.f32.xlu1 %v2261_v48 }
0x17e4   :  { %2678 = vrot.lane.b32.xlu1 %v3821_v56, %s2932_s14 }
0x1836   :  { %v2260_v58 = vpop.xlane.xlu0 %2259 }
0x1837   :  { %v2264_v50 = vmul.f32 %v2260_v58, %v3193_v14 }
0x1839   :  { %v2266_v51 = vadd.f32 1e-05, %v2264_v50 }
0x183b   :  { %2873 = vrsqrt.f32 %v2266_v51  ;;  %vm2274_vm14 = vweird.f32 %v2266_v51 }
0x183e   :  { %v2263_v55 = vpop.xlane.xlu1 %2262 }
0x183f   :  { %v2265_v60 = vmul.f32 %v2263_v55, %v3193_v14 }
0x1841   :  { %v2874_v43 = vpop.eup %2873  ;;  %v2267_v2 = vadd.f32 1e-05, %v2265_v60 }
0x1842   :  { %v2269_v61 = vmul.f32 %v2874_v43, %v2266_v51  ;;  %vm2275_vm2 = vweird.f32 %v2874_v43 }
0x1843   :  { %2875 = vrsqrt.f32 %v2267_v2  ;;  %vm2276_vm15 = vmor %vm2274_vm14, %vm2275_vm2  ;;  %vm2284_vm3 = vweird.f32 %v2267_v2 }
0x1844   :  { %v2270_v21 = vmul.f32 %v2874_v43, %v2269_v61 }
0x1846   :  { %v2271_v42 = vmul.f32 0.5, %v2270_v21 }
0x1848   :  { %v2272_v44 = vsub.f32 1.5, %v2271_v42 }
0x1849   :  { %v2876_v41 = vpop.eup %2875 }
0x184a   :  { %v2279_v57 = vmul.f32 %v2876_v41, %v2267_v2  ;;  %v2273_v7 = vmul.f32 %v2874_v43, %v2272_v44  ;;  %vm2285_vm0 = vweird.f32 %v2876_v41 }
0x184b   :  { %vm2286_vm4 = vmor %vm2284_vm3, %vm2285_vm0 }
0x184c   :  { %v2280_v62 = vmul.f32 %v2876_v41, %v2279_v57  ;;  %v2277_v53 = vsel %vm2276_vm15, %v2874_v43, %v2273_v7  ;;  %v2424_v57 = vperm.slane %v3685_v10, 6 }
0x184d   :  { %v2288_v26 = vmul.f32 %v2277_v53, %v2254_v36 }
0x184e   :  { %v2281_v18 = vmul.f32 0.5, %v2280_v62 }
0x184f   :  { %v2291_v56 = vmul.f32 %v2290_v6, %v2288_v26 }
0x1850   :  { %v2282_v54 = vsub.f32 1.5, %v2281_v18 }
0x1851   :  { %v2294_v1 = vadd.f32 %v2293_v3, %v2291_v56 }
0x1852   :  { %v2283_v5 = vmul.f32 %v2876_v41, %v2282_v54 }
0x1854   :  { %v2287_v9 = vsel %vm2286_vm4, %v2876_v41, %v2283_v5 }
0x1855   :  { %v2289_v45 = vmul.f32 %v2287_v9, %v2255_v4 }
0x1856   :  { %v2679_v17 = vpop.permute.xlu1 %2678 }
0x1857   :  { %v2680_v59 = vunpack.i.l.bf16 %v2679_v17  ;;  %v2681_v13 = vunpack.i.h.bf16 %v2679_v17  ;;  %v2292_v35 = vmul.f32 %v2290_v6, %v2289_v45 }
0x1859   :  { %2327 = vmatpush.msrb.mxu3 %v2680_v59  ;;  %v2295_v15 = vadd.f32 %v2293_v3, %v2292_v35 }
0x185b   :  { %2328 = vmatpush.msrb.mxu3 %v2681_v13 }
0x185c   :  { %2593 = vmatmul.msk.f32.vlgmr.msrb.gmra.mxu3 %vm47_vm1, %v2294_v1 }
0x1864   :  { %2594 = vmatmul.msk.f32.gmra.mxu3 %vm47_vm1, %v2295_v15 }
0x18df   :  { %v2330_v22 = vpop.f32.mrf.mxu3 }
0x18e0   :  { %v2331_v23 = vadd.f32 %v2330_v22, %v2296_v12 }
0x18e2   :  { %v2336_v29 = vmax.f32 %v2331_v23, 0.0 }
0x18e4   :  { %2596 = vmatmul.msk.f32.vlgmr.msrb.gmra.mxu2 %vm47_vm1, %v2336_v29 }
0x18e7   :  { %v2333_v19 = vpop.f32.mrf.mxu3 }
0x18e8   :  { %v2334_v30 = vadd.f32 %v2333_v19, %v2296_v12 }
0x18ea   :  { %v2337_v37 = vmax.f32 %v2334_v30, 0.0 }
0x18ec   :  { %2597 = vmatmul.msk.f32.gmra.mxu2 %vm47_vm1, %v2337_v37 }
0x1967   :  { %v2372_v38 = vpop.f32.mrf.mxu2 }
0x1968   :  { %v2373_v33 = vadd.f32 %v2372_v38, %v2338_v24 }
0x196a   :  { %v2378_v11 = vadd.f32 %v2373_v33, %v2294_v1 }
0x196c   :  { %v2380_v20 = vsel %vm47_vm1, %v2378_v11, 0.0 }
0x196d   :  { %2381 = vadd.xlane.f32.xlu2 %v2380_v20 }
0x196f   :  { %v2375_v39 = vpop.f32.mrf.mxu2 }
0x1970   :  { %v2376_v0 = vadd.f32 %v2375_v39, %v2338_v24 }
0x1972   :  { %v2379_v46 = vadd.f32 %v2376_v0, %v2295_v15 }
0x1974   :  { %v2383_v31 = vsel %vm47_vm1, %v2379_v46, 0.0 }
0x1975   :  { %2384 = vadd.xlane.f32.xlu1 %v2383_v31 }
0x19e0   :  { %v2382_v40 = vpop.xlane.xlu2 %2381 }
0x19e1   :  { %v2386_v27 = vmul.f32 %v2382_v40, %v3193_v14 }
0x19e3   :  { %v2388_v36 = vsub.f32 %v2378_v11, %v2386_v27 }
0x19e5   :  { %v2390_v34 = vmul.f32 %v2388_v36, %v2388_v36 }
0x19e7   :  { %v2392_v28 = vsel %vm47_vm1, %v2390_v34, 0.0 }
0x19e8   :  { %v2385_v47 = vpop.xlane.xlu1 %2384  ;;  %2393 = vadd.xlane.f32.xlu0 %v2392_v28 }
0x19e9   :  { %v2387_v52 = vmul.f32 %v2385_v47, %v3193_v14 }
0x19eb   :  { %v2389_v4 = vsub.f32 %v2379_v46, %v2387_v52 }
0x19ed   :  { %v2391_v16 = vmul.f32 %v2389_v4, %v2389_v4 }
0x19ef   :  { %v2395_v48 = vsel %vm47_vm1, %v2391_v16, 0.0 }
0x19f0   :  { %2396 = vadd.xlane.f32.xlu0 %v2395_v48 }
0x1a5b   :  { %v2394_v63 = vpop.xlane.xlu0 %2393 }
0x1a5c   :  { %v2398_v58 = vmul.f32 %v2394_v63, %v3193_v14 }
0x1a5e   :  { %v2400_v50 = vadd.f32 1e-05, %v2398_v58 }
0x1a60   :  { %2877 = vrsqrt.f32 %v2400_v50  ;;  %vm2408_vm6 = vweird.f32 %v2400_v50 }
0x1a63   :  { %v2397_v51 = vpop.xlane.xlu0 %2396 }
0x1a64   :  { %v2399_v55 = vmul.f32 %v2397_v51, %v3193_v14  ;;  %v2427_v14 = vperm.slane %v3685_v10, 7 }
0x1a66   :  { %v2878_v60 = vpop.eup %2877  ;;  %v2401_v43 = vadd.f32 1e-05, %v2399_v55 }
0x1a67   :  { %v2403_v2 = vmul.f32 %v2878_v60, %v2400_v50  ;;  %vm2409_vm5 = vweird.f32 %v2878_v60 }
0x1a68   :  { %2879 = vrsqrt.f32 %v2401_v43  ;;  %vm2410_vm7 = vmor %vm2408_vm6, %vm2409_vm5  ;;  %vm2418_vm9 = vweird.f32 %v2401_v43 }
0x1a69   :  { %v2404_v61 = vmul.f32 %v2878_v60, %v2403_v2 }
0x1a6b   :  { %v2405_v21 = vmul.f32 0.5, %v2404_v61 }
0x1a6d   :  { %v2406_v49 = vsub.f32 1.5, %v2405_v21 }
0x1a6e   :  { %v2880_v42 = vpop.eup %2879 }
0x1a6f   :  { %v2407_v44 = vmul.f32 %v2878_v60, %v2406_v49  ;;  %v2413_v41 = vmul.f32 %v2880_v42, %v2401_v43  ;;  %vm2419_vm8 = vweird.f32 %v2880_v42 }
0x1a70   :  { %vm2420_vm10 = vmor %vm2418_vm9, %vm2419_vm8 }
0x1a71   :  { %v2411_v7 = vsel %vm2410_vm7, %v2878_v60, %v2407_v44  ;;  %v2414_v62 = vmul.f32 %v2880_v42, %v2413_v41 }
0x1a72   :  { %v2422_v18 = vmul.f32 %v2411_v7, %v2388_v36 }
0x1a73   :  { %v2415_v53 = vmul.f32 0.5, %v2414_v62 }
0x1a74   :  { %v2425_v54 = vmul.f32 %v2424_v57, %v2422_v18 }
0x1a75   :  { %v2416_v6 = vsub.f32 1.5, %v2415_v53 }
0x1a76   :  { %v2428_v26 = vadd.f32 %v2427_v14, %v2425_v54 }
0x1a77   :  { %v2417_v5 = vmul.f32 %v2880_v42, %v2416_v6 }
0x1a78   :  { %2430 = vst.msk [vmem:[#allocation2] sm:$0xff] %vm47_vm1, %v2428_v26 }
0x1a79   :  { %v2421_v3 = vsel %vm2420_vm10, %v2880_v42, %v2417_v5 }
0x1a7a   :  { %v2423_v56 = vmul.f32 %v2421_v3, %v2389_v4 }
0x1a7c   :  { %v2426_v17 = vmul.f32 %v2424_v57, %v2423_v56 }
0x1a7e   :  { %v2429_v10 = vadd.f32 %v2427_v14, %v2426_v17 }
0x1a80   :  { %2431 = vst.msk [vmem:[#allocation2 + $0x8] sm:$0xff] %vm47_vm1, %v2429_v10 }
0x1a81   :  { %2444 = dma.vmem_to_hbm [thread:$0]  %s2437_s1, 256, %s2439_s15, [#allocation3], %s2936_s16, %s2936_s16, %s2937_s17  }
0x1a82   :  { %2927 = dma.done.wait [#allocation3], 256  }
0x1a83   :  { %2928 = vsyncadd [#allocation3], 4294967040 }
0x1a84   :  { %2449 = vsyncpa [#allocation3], 1 }

</bundles_post_ra>
